<compile_context>
chip_gen: v7x
topology: tpu7x:2x2x1
jax: 0.10.0
libtpu: 0.0.40
codegen_flags: <defaults>
</compile_context>

<pallas_src>
import math

import jax
import jax.numpy as jnp
from jax.experimental import pallas as pl
from jax.experimental.pallas import tpu as pltpu

_SQRT2 = math.sqrt(2.0)
_BN_EPS = 1e-5
_LN_EPS = 1e-5


def _round_up(n, m):
    return ((n + m - 1) // m) * m


def _gelu(x):
    # tanh-approximate GELU: single EUP tanh per activation (the erf form has
    # no EUP instruction and lowers to a long VPU polynomial).
    return jax.nn.gelu(x, approximate=True)


# ----------------------------------------------------------------------------
# Kernel
# ----------------------------------------------------------------------------
def kent_mlp_kernel(
    x_ref,
    w1_ref, v1_ref,
    w2_ref, v2_ref,
    w3_ref, v3_ref,
    wh1_ref, vh_ref, wh2_ref,
    out_ref,
):
    """Feature-major fused forward: all activations are (features, batch_tile)."""

    def layer(w_ref, v_ref, h):
        # Linear: bf16 MXU, f32 accumulate; bias is column 0 of the packed vecs.
        z = jnp.dot(w_ref[...], h.astype(jnp.bfloat16),
                    preferred_element_type=jnp.float32)
        z = z + v_ref[:, 0:1]
        # one-pass LayerNorm over the feature (sublane) axis
        inv_n = 1.0 / z.shape[0]
        s1 = jnp.sum(z, axis=0, keepdims=True)
        s2 = jnp.sum(z * z, axis=0, keepdims=True)
        mu = s1 * inv_n
        var = s2 * inv_n - mu * mu
        zn = (z - mu) * jax.lax.rsqrt(var + _LN_EPS) * v_ref[:, 1:2] + v_ref[:, 2:3]
        # TODO(synk): Dropout(0.2) is identity in eval/inference forward (no RNG drop).
        return _gelu(zn)

    h = x_ref[...]                    # (D, TB); BN already folded into w1/b1
    h = layer(w1_ref, v1_ref, h)      # (H1, TB)
    h = layer(w2_ref, v2_ref, h)      # (H2, TB)
    h = layer(w3_ref, v3_ref, h)      # (H3, TB)

    # fused heads: one (64, H3) matmul, GELU, one sublane-padded (8, 64) matmul
    k = _gelu(jnp.dot(wh1_ref[...], h.astype(jnp.bfloat16),
                      preferred_element_type=jnp.float32) + vh_ref[:, 0:1])
    y = jnp.dot(wh2_ref[...], k.astype(jnp.bfloat16),
                preferred_element_type=jnp.float32) + vh_ref[0:8, 1:2]
    # row 0 = log_kappa (identity), row 1 = beta_ratio (sigmoid), rows 2..7 pad
    row = jax.lax.broadcasted_iota(jnp.int32, y.shape, 0)
    out_ref[...] = jnp.where(row == 1, jax.nn.sigmoid(y), y)


# ----------------------------------------------------------------------------
# Parameter fusion (trace-time)
# ----------------------------------------------------------------------------
def fuse_params(raw):
    """Fold eval-mode BN into Linear #1, transpose to feature-major, fuse heads."""
    (bn_g, bn_b, bn_m, bn_v,
     w1, b1, g1, be1,
     w2, b2, g2, be2,
     w3, b3, g3, be3,
     wk1, bk1, wk2, bk2,
     wb1, bb1, wb2, bb2) = raw

    # BN(x) = x * scale + shift  (eval mode, running stats)
    scale = bn_g / jnp.sqrt(bn_v + _BN_EPS)                # (1, D)
    shift = bn_b - bn_m * scale                            # (1, D)
    # feature-major weights: h = W @ x_t + b with W stored (out, in)
    w1t = (w1 * scale.reshape(-1, 1)).T                    # (H1, D)
    b1f = (b1 + shift @ w1).T                              # (H1, 1)

    def pack_vecs(*cols):                                  # (H,1) columns -> (H,8)
        h = cols[0].shape[0]
        v = jnp.zeros((h, 8), jnp.float32)
        for j, c in enumerate(cols):
            v = v.at[:, j:j + 1].set(c)
        return v

    v1 = pack_vecs(b1f, g1.T, be1.T)
    v2 = pack_vecs(b2.T, g2.T, be2.T)
    v3 = pack_vecs(b3.T, g3.T, be3.T)

    # heads: [wk1 | wb1]^T -> (64, H3); second layer block-diagonal, padded to
    # 8 output rows (full sublane group) so the final matmul/store is aligned.
    wh1 = jnp.concatenate([wk1, wb1], axis=1).T            # (64, H3)
    bh1 = jnp.concatenate([bk1, bb1], axis=1).T            # (64, 1)
    hk = wk1.shape[1]                                      # 32
    wh2 = jnp.zeros((8, wh1.shape[0]), jnp.float32)
    wh2 = wh2.at[0, :hk].set(wk2[:, 0]).at[1, hk:].set(wb2[:, 0])
    bh2 = jnp.zeros((8, 1), jnp.float32)
    bh2 = bh2.at[0, 0].set(bk2[0, 0]).at[1, 0].set(bb2[0, 0])

    vh = pack_vecs(bh1)                                    # (64, 8): col 0 = bh1
    vh = vh.at[0:8, 1:2].set(bh2)                          # col 1[:8] = padded bh2

    bf16 = lambda w: w.astype(jnp.bfloat16)                # identical under MXU
    return (bf16(w1t), v1, bf16(w2.T), v2, bf16(w3.T), v3,
            bf16(wh1), vh, bf16(wh2))


# ----------------------------------------------------------------------------
# Wrapper
# ----------------------------------------------------------------------------
def kent_mlp_forward(x, fused_params, *, block_rows=2048):
    """x: (B, input_dim) float32; fused_params: output of fuse_params()."""
    assert block_rows % 128 == 0, "batch tile must be lane-aligned"
    B, D = x.shape
    # batch tile along the lane axis: multiple of 128 (unmasked loads/stores),
    # capped at block_rows so intermediates fit VMEM on v5e/v6e/v7x.
    TB = min(block_rows, _round_up(B, 128))
    Bp = _round_up(B, TB)
    xt = x.T                                               # feature-major (D, B)
    if Bp != B:
        xt = jnp.pad(xt, ((0, 0), (0, Bp - B)))
    grid = (Bp // TB,)
    # TODO(synk): on v7x (2 TensorCores) pick block_rows so the grid length is
    # even; with a 1-long/odd grid one core idles on the "parallel" axis.

    x_spec = pl.BlockSpec((D, TB), lambda i: (0, i))
    out_spec = pl.BlockSpec((8, TB), lambda i: (0, i))
    # weights / packed vectors stay VMEM-resident across all grid steps
    w_specs = [pl.BlockSpec(p.shape, lambda i: (0, 0)) for p in fused_params]

    # advisory cost estimate
    h1, d_in = fused_params[0].shape
    h2 = fused_params[2].shape[0]
    h3 = fused_params[4].shape[0]
    hh = fused_params[6].shape[0]
    flops_row = 2 * (d_in * h1 + h1 * h2 + h2 * h3 + h3 * hh + hh * 8)
    trans_row = h1 + h2 + h3 + hh + 8          # one tanh per GELU act + sigmoids
    param_bytes = sum(int(p.size) * int(p.dtype.itemsize) for p in fused_params)
    cost = pl.CostEstimate(
        flops=int(Bp) * int(flops_row),
        transcendentals=int(Bp) * int(trans_row),
        bytes_accessed=int(Bp) * (d_in + 8) * 4 + param_bytes,
    )

    out_t = pl.pallas_call(
        kent_mlp_kernel,
        out_shape=jax.ShapeDtypeStruct((8, Bp), jnp.float32),
        grid=grid,
        in_specs=[x_spec] + w_specs,
        out_specs=out_spec,
        compiler_params=pltpu.CompilerParams(
            dimension_semantics=("parallel",),
            # large batch tiles overflow v5e's 16 MiB default scoped VMEM;
            # 32 MiB also leaves >=2x headroom on v7x's 64 MiB per-TC VMEM.
            vmem_limit_bytes=32 * 1024 * 1024),
        cost_estimate=cost,
    )(xt, *fused_params)
    # rows: 0 = log_kappa, 1 = beta_ratio, 2..7 = padding
    return out_t[:2, :B].T


# ----------------------------------------------------------------------------
# Parameter construction & pure-JAX reference (torch semantics, exact GELU)
# ----------------------------------------------------------------------------
def _kaiming_linear(key, fan_in, fan_out):
    # nn.init.kaiming_normal_(weight, nonlinearity='relu'): std = sqrt(2/fan_in);
    # bias = 0. Stored here as (in, out); fuse_params transposes to (out, in).
    std = math.sqrt(2.0 / fan_in)
    w = jax.random.normal(key, (fan_in, fan_out), jnp.float32) * std
    b = jnp.zeros((1, fan_out), jnp.float32)
    return w, b


def make_params(key, input_dim=4, hidden_dims=(256, 128, 64)):
    keys = jax.random.split(key, 8)

    # BatchNorm1d(input_dim): gamma=1, beta=0, running_mean=0, running_var=1
    bn_g = jnp.ones((1, input_dim), jnp.float32)
    bn_b = jnp.zeros((1, input_dim), jnp.float32)
    bn_m = jnp.zeros((1, input_dim), jnp.float32)
    bn_v = jnp.ones((1, input_dim), jnp.float32)

    w1, b1 = _kaiming_linear(keys[0], input_dim, hidden_dims[0])
    g1 = jnp.ones((1, hidden_dims[0]), jnp.float32)
    be1 = jnp.zeros((1, hidden_dims[0]), jnp.float32)

    w2, b2 = _kaiming_linear(keys[1], hidden_dims[0], hidden_dims[1])
    g2 = jnp.ones((1, hidden_dims[1]), jnp.float32)
    be2 = jnp.zeros((1, hidden_dims[1]), jnp.float32)

    w3, b3 = _kaiming_linear(keys[2], hidden_dims[1], hidden_dims[2])
    g3 = jnp.ones((1, hidden_dims[2]), jnp.float32)
    be3 = jnp.zeros((1, hidden_dims[2]), jnp.float32)

    wk1, bk1 = _kaiming_linear(keys[3], hidden_dims[2], 32)   # log_kappa head
    wk2, bk2 = _kaiming_linear(keys[4], 32, 1)
    wb1, bb1 = _kaiming_linear(keys[5], hidden_dims[2], 32)   # beta_ratio head
    wb2, bb2 = _kaiming_linear(keys[6], 32, 1)

    return (bn_g, bn_b, bn_m, bn_v,
            w1, b1, g1, be1,
            w2, b2, g2, be2,
            w3, b3, g3, be3,
            wk1, bk1, wk2, bk2,
            wb1, bb1, wb2, bb2)


def _gelu_exact(x):
    return 0.5 * x * (1.0 + jax.lax.erf(x / _SQRT2))


def _layernorm_ref(x, gamma, beta, eps=_LN_EPS):
    mu = jnp.mean(x, axis=-1, keepdims=True)
    var = jnp.mean((x - mu) ** 2, axis=-1, keepdims=True)
    return (x - mu) * jax.lax.rsqrt(var + eps) * gamma + beta


def reference_forward(x, raw):
    """Pure-JAX reference of the original (unfolded, unfused, exact-GELU) model."""
    (bn_g, bn_b, bn_m, bn_v,
     w1, b1, g1, be1,
     w2, b2, g2, be2,
     w3, b3, g3, be3,
     wk1, bk1, wk2, bk2,
     wb1, bb1, wb2, bb2) = raw
    h = (x - bn_m) * jax.lax.rsqrt(bn_v + _BN_EPS) * bn_g + bn_b
    h = _gelu_exact(_layernorm_ref(h @ w1 + b1, g1, be1))
    h = _gelu_exact(_layernorm_ref(h @ w2 + b2, g2, be2))
    h = _gelu_exact(_layernorm_ref(h @ w3 + b3, g3, be3))
    lk = _gelu_exact(h @ wk1 + bk1) @ wk2 + bk2
    br = jax.nn.sigmoid(_gelu_exact(h @ wb1 + bb1) @ wb2 + bb2)
    return jnp.concatenate([lk, br], axis=1)


if __name__ == "__main__":
    key = jax.random.PRNGKey(0)
    k_x, k_p = jax.random.split(key)

    input_dim = 4
    hidden_dims = (256, 128, 64)
    batch = 8

    x = jax.random.normal(k_x, (batch, input_dim), jnp.float32)
    raw_params = make_params(k_p, input_dim, hidden_dims)
    fused_params = fuse_params(raw_params)

    out = kent_mlp_forward(x, fused_params)
    out = jax.block_until_ready(out)

    ref = reference_forward(x, raw_params)

    assert out.shape == (batch, 2), out.shape
    assert bool(jnp.all(jnp.isfinite(out)))
    # column 1 is a sigmoid output -> must be in (0, 1)
    assert bool(jnp.all((out[:, 1] > 0.0) & (out[:, 1] < 1.0)))
    # fused/folded kernel vs. unfused exact reference (loose tol: bf16 MXU
    # truncation + tanh-GELU approximation, both well below 5e-2)
    assert bool(jnp.allclose(out, ref, rtol=5e-2, atol=5e-2))

    print("KERNEL_OK")
</pallas_src>

<mosaic_0001>
module attributes {stable_mosaic.version = 11 : i64} {
  func.func @kent_mlp_kernel(%arg0: i32, %arg1: memref<4x128xf32, #tpu.memory_space<vmem>>, %arg2: memref<256x4xbf16, #tpu.memory_space<vmem>>, %arg3: memref<256x8xf32, #tpu.memory_space<vmem>>, %arg4: memref<128x256xbf16, #tpu.memory_space<vmem>>, %arg5: memref<128x8xf32, #tpu.memory_space<vmem>>, %arg6: memref<64x128xbf16, #tpu.memory_space<vmem>>, %arg7: memref<64x8xf32, #tpu.memory_space<vmem>>, %arg8: memref<64x64xbf16, #tpu.memory_space<vmem>>, %arg9: memref<64x8xf32, #tpu.memory_space<vmem>>, %arg10: memref<8x64xbf16, #tpu.memory_space<vmem>>, %arg11: memref<8x128xf32, #tpu.memory_space<vmem>>) attributes {dimension_semantics = [#tpu.dimension_semantics<parallel>], iteration_bounds = array<i64: 1>, scalar_prefetch = 0 : i64, scratch_operands = 0 : i64, tpu.core_type = #tpu.core_type<tc>, window_params = [{transform_indices = @transform_0, window_bounds = array<i64: 4, 128>}, {pipeline_mode = #tpu.pipeline_mode<synchronous>, transform_indices = @transform_1, window_bounds = array<i64: 256, 4>}, {pipeline_mode = #tpu.pipeline_mode<synchronous>, transform_indices = @transform_2, window_bounds = array<i64: 256, 8>}, {pipeline_mode = #tpu.pipeline_mode<synchronous>, transform_indices = @transform_3, window_bounds = array<i64: 128, 256>}, {pipeline_mode = #tpu.pipeline_mode<synchronous>, transform_indices = @transform_4, window_bounds = array<i64: 128, 8>}, {pipeline_mode = #tpu.pipeline_mode<synchronous>, transform_indices = @transform_5, window_bounds = array<i64: 64, 128>}, {pipeline_mode = #tpu.pipeline_mode<synchronous>, transform_indices = @transform_6, window_bounds = array<i64: 64, 8>}, {pipeline_mode = #tpu.pipeline_mode<synchronous>, transform_indices = @transform_7, window_bounds = array<i64: 64, 64>}, {pipeline_mode = #tpu.pipeline_mode<synchronous>, transform_indices = @transform_8, window_bounds = array<i64: 64, 8>}, {pipeline_mode = #tpu.pipeline_mode<synchronous>, transform_indices = @transform_9, window_bounds = array<i64: 8, 64>}, {transform_indices = @transform_10, window_bounds = array<i64: 8, 128>}]} {
    %c0 = arith.constant 0 : index
    %c0_0 = arith.constant 0 : index
    %0 = vector.load %arg1[%c0, %c0_0] : memref<4x128xf32, #tpu.memory_space<vmem>>, vector<4x128xf32>
    %c0_1 = arith.constant 0 : index
    %c0_2 = arith.constant 0 : index
    %1 = vector.load %arg2[%c0_1, %c0_2] : memref<256x4xbf16, #tpu.memory_space<vmem>>, vector<256x4xbf16>
    %2 = arith.truncf %0 : vector<4x128xf32> to vector<4x128xbf16>
    %cst = arith.constant dense<0.000000e+00> : vector<256x128xf32>
    %3 = tpu.matmul %1, %2, %cst {dimension_numbers = #tpu.dot_dimension_numbers<[1], [0], [0], [1], [0, 0, 1, 1], [], []>} : vector<256x4xbf16>, vector<4x128xbf16>, vector<256x128xf32> -> vector<256x128xf32>
    %c0_3 = arith.constant 0 : index
    %c0_4 = arith.constant 0 : index
    %4 = vector.load %arg3[%c0_3, %c0_4] : memref<256x8xf32, #tpu.memory_space<vmem>>, vector<256x1xf32>
    %5 = vector.broadcast %4 : vector<256x1xf32> to vector<256x128xf32>
    %6 = arith.addf %3, %5 : vector<256x128xf32>
    %cst_5 = arith.constant dense<0.000000e+00> : vector<128xf32>
    %7 = vector.multi_reduction <add>, %6, %cst_5 [0] : vector<256x128xf32> to vector<128xf32>
    %8 = vector.shape_cast %7 : vector<128xf32> to vector<1x128xf32>
    %9 = arith.mulf %6, %6 : vector<256x128xf32>
    %cst_6 = arith.constant dense<0.000000e+00> : vector<128xf32>
    %10 = vector.multi_reduction <add>, %9, %cst_6 [0] : vector<256x128xf32> to vector<128xf32>
    %11 = vector.shape_cast %10 : vector<128xf32> to vector<1x128xf32>
    %cst_7 = arith.constant 3.906250e-03 : f32
    %12 = vector.broadcast %cst_7 : f32 to vector<1x128xf32>
    %13 = arith.mulf %8, %12 : vector<1x128xf32>
    %cst_8 = arith.constant 3.906250e-03 : f32
    %14 = vector.broadcast %cst_8 : f32 to vector<1x128xf32>
    %15 = arith.mulf %11, %14 : vector<1x128xf32>
    %16 = arith.mulf %13, %13 : vector<1x128xf32>
    %17 = arith.subf %15, %16 : vector<1x128xf32>
    %18 = vector.broadcast %13 : vector<1x128xf32> to vector<256x128xf32>
    %19 = arith.subf %6, %18 : vector<256x128xf32>
    %cst_9 = arith.constant 9.99999974E-6 : f32
    %20 = vector.broadcast %cst_9 : f32 to vector<1x128xf32>
    %21 = arith.addf %17, %20 : vector<1x128xf32>
    %22 = math.rsqrt %21 : vector<1x128xf32>
    %23 = vector.broadcast %22 : vector<1x128xf32> to vector<256x128xf32>
    %24 = arith.mulf %19, %23 : vector<256x128xf32>
    %c0_10 = arith.constant 0 : index
    %c1 = arith.constant 1 : index
    %25 = vector.load %arg3[%c0_10, %c1] : memref<256x8xf32, #tpu.memory_space<vmem>>, vector<256x1xf32>
    %26 = vector.broadcast %25 : vector<256x1xf32> to vector<256x128xf32>
    %27 = arith.mulf %24, %26 : vector<256x128xf32>
    %c0_11 = arith.constant 0 : index
    %c2 = arith.constant 2 : index
    %28 = vector.load %arg3[%c0_11, %c2] : memref<256x8xf32, #tpu.memory_space<vmem>>, vector<256x1xf32>
    %29 = vector.broadcast %28 : vector<256x1xf32> to vector<256x128xf32>
    %30 = arith.addf %27, %29 : vector<256x128xf32>
    %31 = arith.mulf %30, %30 : vector<256x128xf32>
    %32 = arith.mulf %30, %31 : vector<256x128xf32>
    %cst_12 = arith.constant 4.471500e-02 : f32
    %33 = vector.broadcast %cst_12 : f32 to vector<256x128xf32>
    %34 = arith.mulf %33, %32 : vector<256x128xf32>
    %35 = arith.addf %30, %34 : vector<256x128xf32>
    %cst_13 = arith.constant 0.797884583 : f32
    %36 = vector.broadcast %cst_13 : f32 to vector<256x128xf32>
    %37 = arith.mulf %36, %35 : vector<256x128xf32>
    %38 = math.tanh %37 : vector<256x128xf32>
    %cst_14 = arith.constant 1.000000e+00 : f32
    %39 = vector.broadcast %cst_14 : f32 to vector<256x128xf32>
    %40 = arith.addf %39, %38 : vector<256x128xf32>
    %cst_15 = arith.constant 5.000000e-01 : f32
    %41 = vector.broadcast %cst_15 : f32 to vector<256x128xf32>
    %42 = arith.mulf %41, %40 : vector<256x128xf32>
    %43 = arith.mulf %30, %42 : vector<256x128xf32>
    %c0_16 = arith.constant 0 : index
    %c0_17 = arith.constant 0 : index
    %44 = vector.load %arg4[%c0_16, %c0_17] : memref<128x256xbf16, #tpu.memory_space<vmem>>, vector<128x256xbf16>
    %45 = arith.truncf %43 : vector<256x128xf32> to vector<256x128xbf16>
    %cst_18 = arith.constant dense<0.000000e+00> : vector<128x128xf32>
    %46 = tpu.matmul %44, %45, %cst_18 {dimension_numbers = #tpu.dot_dimension_numbers<[1], [0], [0], [1], [0, 0, 1, 1], [], []>} : vector<128x256xbf16>, vector<256x128xbf16>, vector<128x128xf32> -> vector<128x128xf32>
    %c0_19 = arith.constant 0 : index
    %c0_20 = arith.constant 0 : index
    %47 = vector.load %arg5[%c0_19, %c0_20] : memref<128x8xf32, #tpu.memory_space<vmem>>, vector<128x1xf32>
    %48 = vector.broadcast %47 : vector<128x1xf32> to vector<128x128xf32>
    %49 = arith.addf %46, %48 : vector<128x128xf32>
    %cst_21 = arith.constant dense<0.000000e+00> : vector<128xf32>
    %50 = vector.multi_reduction <add>, %49, %cst_21 [0] : vector<128x128xf32> to vector<128xf32>
    %51 = vector.shape_cast %50 : vector<128xf32> to vector<1x128xf32>
    %52 = arith.mulf %49, %49 : vector<128x128xf32>
    %cst_22 = arith.constant dense<0.000000e+00> : vector<128xf32>
    %53 = vector.multi_reduction <add>, %52, %cst_22 [0] : vector<128x128xf32> to vector<128xf32>
    %54 = vector.shape_cast %53 : vector<128xf32> to vector<1x128xf32>
    %cst_23 = arith.constant 7.812500e-03 : f32
    %55 = vector.broadcast %cst_23 : f32 to vector<1x128xf32>
    %56 = arith.mulf %51, %55 : vector<1x128xf32>
    %cst_24 = arith.constant 7.812500e-03 : f32
    %57 = vector.broadcast %cst_24 : f32 to vector<1x128xf32>
    %58 = arith.mulf %54, %57 : vector<1x128xf32>
    %59 = arith.mulf %56, %56 : vector<1x128xf32>
    %60 = arith.subf %58, %59 : vector<1x128xf32>
    %61 = vector.broadcast %56 : vector<1x128xf32> to vector<128x128xf32>
    %62 = arith.subf %49, %61 : vector<128x128xf32>
    %cst_25 = arith.constant 9.99999974E-6 : f32
    %63 = vector.broadcast %cst_25 : f32 to vector<1x128xf32>
    %64 = arith.addf %60, %63 : vector<1x128xf32>
    %65 = math.rsqrt %64 : vector<1x128xf32>
    %66 = vector.broadcast %65 : vector<1x128xf32> to vector<128x128xf32>
    %67 = arith.mulf %62, %66 : vector<128x128xf32>
    %c0_26 = arith.constant 0 : index
    %c1_27 = arith.constant 1 : index
    %68 = vector.load %arg5[%c0_26, %c1_27] : memref<128x8xf32, #tpu.memory_space<vmem>>, vector<128x1xf32>
    %69 = vector.broadcast %68 : vector<128x1xf32> to vector<128x128xf32>
    %70 = arith.mulf %67, %69 : vector<128x128xf32>
    %c0_28 = arith.constant 0 : index
    %c2_29 = arith.constant 2 : index
    %71 = vector.load %arg5[%c0_28, %c2_29] : memref<128x8xf32, #tpu.memory_space<vmem>>, vector<128x1xf32>
    %72 = vector.broadcast %71 : vector<128x1xf32> to vector<128x128xf32>
    %73 = arith.addf %70, %72 : vector<128x128xf32>
    %74 = arith.mulf %73, %73 : vector<128x128xf32>
    %75 = arith.mulf %73, %74 : vector<128x128xf32>
    %cst_30 = arith.constant 4.471500e-02 : f32
    %76 = vector.broadcast %cst_30 : f32 to vector<128x128xf32>
    %77 = arith.mulf %76, %75 : vector<128x128xf32>
    %78 = arith.addf %73, %77 : vector<128x128xf32>
    %cst_31 = arith.constant 0.797884583 : f32
    %79 = vector.broadcast %cst_31 : f32 to vector<128x128xf32>
    %80 = arith.mulf %79, %78 : vector<128x128xf32>
    %81 = math.tanh %80 : vector<128x128xf32>
    %cst_32 = arith.constant 1.000000e+00 : f32
    %82 = vector.broadcast %cst_32 : f32 to vector<128x128xf32>
    %83 = arith.addf %82, %81 : vector<128x128xf32>
    %cst_33 = arith.constant 5.000000e-01 : f32
    %84 = vector.broadcast %cst_33 : f32 to vector<128x128xf32>
    %85 = arith.mulf %84, %83 : vector<128x128xf32>
    %86 = arith.mulf %73, %85 : vector<128x128xf32>
    %c0_34 = arith.constant 0 : index
    %c0_35 = arith.constant 0 : index
    %87 = vector.load %arg6[%c0_34, %c0_35] : memref<64x128xbf16, #tpu.memory_space<vmem>>, vector<64x128xbf16>
    %88 = arith.truncf %86 : vector<128x128xf32> to vector<128x128xbf16>
    %cst_36 = arith.constant dense<0.000000e+00> : vector<64x128xf32>
    %89 = tpu.matmul %87, %88, %cst_36 {dimension_numbers = #tpu.dot_dimension_numbers<[1], [0], [0], [1], [0, 0, 1, 1], [], []>} : vector<64x128xbf16>, vector<128x128xbf16>, vector<64x128xf32> -> vector<64x128xf32>
    %c0_37 = arith.constant 0 : index
    %c0_38 = arith.constant 0 : index
    %90 = vector.load %arg7[%c0_37, %c0_38] : memref<64x8xf32, #tpu.memory_space<vmem>>, vector<64x1xf32>
    %91 = vector.broadcast %90 : vector<64x1xf32> to vector<64x128xf32>
    %92 = arith.addf %89, %91 : vector<64x128xf32>
    %cst_39 = arith.constant dense<0.000000e+00> : vector<128xf32>
    %93 = vector.multi_reduction <add>, %92, %cst_39 [0] : vector<64x128xf32> to vector<128xf32>
    %94 = vector.shape_cast %93 : vector<128xf32> to vector<1x128xf32>
    %95 = arith.mulf %92, %92 : vector<64x128xf32>
    %cst_40 = arith.constant dense<0.000000e+00> : vector<128xf32>
    %96 = vector.multi_reduction <add>, %95, %cst_40 [0] : vector<64x128xf32> to vector<128xf32>
    %97 = vector.shape_cast %96 : vector<128xf32> to vector<1x128xf32>
    %cst_41 = arith.constant 1.562500e-02 : f32
    %98 = vector.broadcast %cst_41 : f32 to vector<1x128xf32>
    %99 = arith.mulf %94, %98 : vector<1x128xf32>
    %cst_42 = arith.constant 1.562500e-02 : f32
    %100 = vector.broadcast %cst_42 : f32 to vector<1x128xf32>
    %101 = arith.mulf %97, %100 : vector<1x128xf32>
    %102 = arith.mulf %99, %99 : vector<1x128xf32>
    %103 = arith.subf %101, %102 : vector<1x128xf32>
    %104 = vector.broadcast %99 : vector<1x128xf32> to vector<64x128xf32>
    %105 = arith.subf %92, %104 : vector<64x128xf32>
    %cst_43 = arith.constant 9.99999974E-6 : f32
    %106 = vector.broadcast %cst_43 : f32 to vector<1x128xf32>
    %107 = arith.addf %103, %106 : vector<1x128xf32>
    %108 = math.rsqrt %107 : vector<1x128xf32>
    %109 = vector.broadcast %108 : vector<1x128xf32> to vector<64x128xf32>
    %110 = arith.mulf %105, %109 : vector<64x128xf32>
    %c0_44 = arith.constant 0 : index
    %c1_45 = arith.constant 1 : index
    %111 = vector.load %arg7[%c0_44, %c1_45] : memref<64x8xf32, #tpu.memory_space<vmem>>, vector<64x1xf32>
    %112 = vector.broadcast %111 : vector<64x1xf32> to vector<64x128xf32>
    %113 = arith.mulf %110, %112 : vector<64x128xf32>
    %c0_46 = arith.constant 0 : index
    %c2_47 = arith.constant 2 : index
    %114 = vector.load %arg7[%c0_46, %c2_47] : memref<64x8xf32, #tpu.memory_space<vmem>>, vector<64x1xf32>
    %115 = vector.broadcast %114 : vector<64x1xf32> to vector<64x128xf32>
    %116 = arith.addf %113, %115 : vector<64x128xf32>
    %117 = arith.mulf %116, %116 : vector<64x128xf32>
    %118 = arith.mulf %116, %117 : vector<64x128xf32>
    %cst_48 = arith.constant 4.471500e-02 : f32
    %119 = vector.broadcast %cst_48 : f32 to vector<64x128xf32>
    %120 = arith.mulf %119, %118 : vector<64x128xf32>
    %121 = arith.addf %116, %120 : vector<64x128xf32>
    %cst_49 = arith.constant 0.797884583 : f32
    %122 = vector.broadcast %cst_49 : f32 to vector<64x128xf32>
    %123 = arith.mulf %122, %121 : vector<64x128xf32>
    %124 = math.tanh %123 : vector<64x128xf32>
    %cst_50 = arith.constant 1.000000e+00 : f32
    %125 = vector.broadcast %cst_50 : f32 to vector<64x128xf32>
    %126 = arith.addf %125, %124 : vector<64x128xf32>
    %cst_51 = arith.constant 5.000000e-01 : f32
    %127 = vector.broadcast %cst_51 : f32 to vector<64x128xf32>
    %128 = arith.mulf %127, %126 : vector<64x128xf32>
    %129 = arith.mulf %116, %128 : vector<64x128xf32>
    %c0_52 = arith.constant 0 : index
    %c0_53 = arith.constant 0 : index
    %130 = vector.load %arg8[%c0_52, %c0_53] : memref<64x64xbf16, #tpu.memory_space<vmem>>, vector<64x64xbf16>
    %131 = arith.truncf %129 : vector<64x128xf32> to vector<64x128xbf16>
    %cst_54 = arith.constant dense<0.000000e+00> : vector<64x128xf32>
    %132 = tpu.matmul %130, %131, %cst_54 {dimension_numbers = #tpu.dot_dimension_numbers<[1], [0], [0], [1], [0, 0, 1, 1], [], []>} : vector<64x64xbf16>, vector<64x128xbf16>, vector<64x128xf32> -> vector<64x128xf32>
    %c0_55 = arith.constant 0 : index
    %c0_56 = arith.constant 0 : index
    %133 = vector.load %arg9[%c0_55, %c0_56] : memref<64x8xf32, #tpu.memory_space<vmem>>, vector<64x1xf32>
    %134 = vector.broadcast %133 : vector<64x1xf32> to vector<64x128xf32>
    %135 = arith.addf %132, %134 : vector<64x128xf32>
    %136 = arith.mulf %135, %135 : vector<64x128xf32>
    %137 = arith.mulf %135, %136 : vector<64x128xf32>
    %cst_57 = arith.constant 4.471500e-02 : f32
    %138 = vector.broadcast %cst_57 : f32 to vector<64x128xf32>
    %139 = arith.mulf %138, %137 : vector<64x128xf32>
    %140 = arith.addf %135, %139 : vector<64x128xf32>
    %cst_58 = arith.constant 0.797884583 : f32
    %141 = vector.broadcast %cst_58 : f32 to vector<64x128xf32>
    %142 = arith.mulf %141, %140 : vector<64x128xf32>
    %143 = math.tanh %142 : vector<64x128xf32>
    %cst_59 = arith.constant 1.000000e+00 : f32
    %144 = vector.broadcast %cst_59 : f32 to vector<64x128xf32>
    %145 = arith.addf %144, %143 : vector<64x128xf32>
    %cst_60 = arith.constant 5.000000e-01 : f32
    %146 = vector.broadcast %cst_60 : f32 to vector<64x128xf32>
    %147 = arith.mulf %146, %145 : vector<64x128xf32>
    %148 = arith.mulf %135, %147 : vector<64x128xf32>
    %c0_61 = arith.constant 0 : index
    %c0_62 = arith.constant 0 : index
    %149 = vector.load %arg10[%c0_61, %c0_62] : memref<8x64xbf16, #tpu.memory_space<vmem>>, vector<8x64xbf16>
    %150 = arith.truncf %148 : vector<64x128xf32> to vector<64x128xbf16>
    %cst_63 = arith.constant dense<0.000000e+00> : vector<8x128xf32>
    %151 = tpu.matmul %149, %150, %cst_63 {dimension_numbers = #tpu.dot_dimension_numbers<[1], [0], [0], [1], [0, 0, 1, 1], [], []>} : vector<8x64xbf16>, vector<64x128xbf16>, vector<8x128xf32> -> vector<8x128xf32>
    %c0_64 = arith.constant 0 : index
    %c1_65 = arith.constant 1 : index
    %152 = vector.load %arg9[%c0_64, %c1_65] : memref<64x8xf32, #tpu.memory_space<vmem>>, vector<8x1xf32>
    %153 = vector.broadcast %152 : vector<8x1xf32> to vector<8x128xf32>
    %154 = arith.addf %151, %153 : vector<8x128xf32>
    %155 = tpu.iota {dimensions = array<i32: 0>} : vector<8x128xi32>
    %c1_i32 = arith.constant 1 : i32
    %156 = vector.broadcast %c1_i32 : i32 to vector<8x128xi32>
    %157 = arith.cmpi eq, %155, %156 : vector<8x128xi32>
    %158 = arith.negf %154 : vector<8x128xf32>
    %159 = math.exp %158 : vector<8x128xf32>
    %cst_66 = arith.constant 1.000000e+00 : f32
    %160 = vector.broadcast %cst_66 : f32 to vector<8x128xf32>
    %161 = arith.addf %160, %159 : vector<8x128xf32>
    %162 = arith.divf %160, %161 : vector<8x128xf32>
    %163 = arith.select %157, %162, %154 : vector<8x128xi1>, vector<8x128xf32>
    %c0_67 = arith.constant 0 : index
    %c0_68 = arith.constant 0 : index
    %164 = vector.load %arg11[%c0_67, %c0_68] : memref<8x128xf32, #tpu.memory_space<vmem>>, vector<8x128xf32>
    tpu.vector_store %arg11[%c0_67, %c0_68], %163 {strides = array<i32>} : memref<8x128xf32, #tpu.memory_space<vmem>>, vector<8x128xf32>,
    return
  }
  func.func @transform_0(%arg0: i32) -> (i32, i32) {
    %c0_i32 = arith.constant 0 : i32
    %c0_i32_0 = arith.constant 0 : i32
    return %c0_i32, %arg0 : i32, i32
  }
  func.func @transform_1(%arg0: i32) -> (i32, i32) {
    %c0_i32 = arith.constant 0 : i32
    %c0_i32_0 = arith.constant 0 : i32
    %c0_i32_1 = arith.constant 0 : i32
    return %c0_i32, %c0_i32_0 : i32, i32
  }
  func.func @transform_2(%arg0: i32) -> (i32, i32) {
    %c0_i32 = arith.constant 0 : i32
    %c0_i32_0 = arith.constant 0 : i32
    %c0_i32_1 = arith.constant 0 : i32
    return %c0_i32, %c0_i32_0 : i32, i32
  }
  func.func @transform_3(%arg0: i32) -> (i32, i32) {
    %c0_i32 = arith.constant 0 : i32
    %c0_i32_0 = arith.constant 0 : i32
    %c0_i32_1 = arith.constant 0 : i32
    return %c0_i32, %c0_i32_0 : i32, i32
  }
  func.func @transform_4(%arg0: i32) -> (i32, i32) {
    %c0_i32 = arith.constant 0 : i32
    %c0_i32_0 = arith.constant 0 : i32
    %c0_i32_1 = arith.constant 0 : i32
    return %c0_i32, %c0_i32_0 : i32, i32
  }
  func.func @transform_5(%arg0: i32) -> (i32, i32) {
    %c0_i32 = arith.constant 0 : i32
    %c0_i32_0 = arith.constant 0 : i32
    %c0_i32_1 = arith.constant 0 : i32
    return %c0_i32, %c0_i32_0 : i32, i32
  }
  func.func @transform_6(%arg0: i32) -> (i32, i32) {
    %c0_i32 = arith.constant 0 : i32
    %c0_i32_0 = arith.constant 0 : i32
    %c0_i32_1 = arith.constant 0 : i32
    return %c0_i32, %c0_i32_0 : i32, i32
  }
  func.func @transform_7(%arg0: i32) -> (i32, i32) {
    %c0_i32 = arith.constant 0 : i32
    %c0_i32_0 = arith.constant 0 : i32
    %c0_i32_1 = arith.constant 0 : i32
    return %c0_i32, %c0_i32_0 : i32, i32
  }
  func.func @transform_8(%arg0: i32) -> (i32, i32) {
    %c0_i32 = arith.constant 0 : i32
    %c0_i32_0 = arith.constant 0 : i32
    %c0_i32_1 = arith.constant 0 : i32
    return %c0_i32, %c0_i32_0 : i32, i32
  }
  func.func @transform_9(%arg0: i32) -> (i32, i32) {
    %c0_i32 = arith.constant 0 : i32
    %c0_i32_0 = arith.constant 0 : i32
    %c0_i32_1 = arith.constant 0 : i32
    return %c0_i32, %c0_i32_0 : i32, i32
  }
  func.func @transform_10(%arg0: i32) -> (i32, i32) {
    %c0_i32 = arith.constant 0 : i32
    %c0_i32_0 = arith.constant 0 : i32
    return %c0_i32, %arg0 : i32, i32
  }
}

</mosaic_0001>

<bundles_post_ra>
// kernel: tpu_custom_call.1
= control target key start
LH: loop header
LB: loop body
LE: loop exit
PB: predicated region body
PF: predicated region fallthrough
CT: control target
= control target key end

     0   :  { %vm392_vm0 = vcmask 1041408   ;;  %v5406_v2 = vmov 0   ;;  %vm343_vm1 = vcmask 31744   ;;  %s5395_s0 = inlined_call_operand.vmem [shape: f32[4,128], index: 0, kind: input, shape index: {}]   ;;  %s5396_s1 = inlined_call_operand.vmem [shape: bf16[256,4], index: 1, kind: input, shape index: {}]   ;;  %s5397_s2 = inlined_call_operand.vmem [shape: f32[256,8], index: 2, kind: input, shape index: {}]   ;;  %s5398_s3 = inlined_call_operand.vmem [shape: bf16[128,256], index: 3, kind: input, shape index: {}]   ;;  %s5399_s4 = inlined_call_operand.vmem [shape: f32[128,8], index: 4, kind: input, shape index: {}]   ;;  %s5400_s5 = inlined_call_operand.vmem [shape: bf16[64,128], index: 5, kind: input, shape index: {}]   ;;  %s5401_s6 = inlined_call_operand.vmem [shape: f32[64,8], index: 6, kind: input, shape index: {}]   ;;  %s5402_s7 = inlined_call_operand.vmem [shape: bf16[64,64], index: 7, kind: input, shape index: {}]   ;;  %s5403_s8 = inlined_call_operand.vmem [shape: f32[64,8], index: 8, kind: input, shape index: {}]   ;;  %s5404_s9 = inlined_call_operand.vmem [shape: bf16[8,64], index: 9, kind: input, shape index: {}]   ;;  %s5405_s10 = inlined_call_operand.hbm [shape: f32[8,128], index: 10, kind: output, shape index: {}]  }
   0x1   :  { %v3308_v0 = vld [vmem:[%s5397_s2 + $0x10] sm:$0xff]  ;;  %v37_v1 = vld [vmem:[%s5395_s0] sm:$0xf]  ;;  %2978 = vset.pattern.permute.xlu1 %v5406_v2  ;;  %2977 = vset.pattern.permute.xlu0 %v5406_v2  ;;  %v3322_v6 = vld [vmem:[%s5397_s2 + $0x18] sm:$0xff] }
   0x2   :  { %v70_v3 = vpack.c.bf16 %v37_v1, %v37_v1  ;;  %v3034_v4 = vld [vmem:[%s5396_s1] sm:$0xff]   ;;  %115 = vperm.xlu1 %2978, %v3308_v0   ;;  %v3035_v7 = vld [vmem:[%s5396_s1 + $0x8] sm:$0xff]   ;;  %v3036_v8 = vld [vmem:[%s5396_s1 + $0x10] sm:$0xff]  }
   0x3   :  { %2886 = vmatprep.mubr.msk.bf16.mxu0 %vm343_vm1, %v3034_v4  ;;  %v3335_v9 = vld [vmem:[%s5397_s2] sm:$0xff]  ;;  %v3341_v10 = vld [vmem:[%s5397_s2 + $0x28] sm:$0xff]  ;;  %v3354_v12 = vld [vmem:[%s5397_s2 + $0x38] sm:$0xff] }
   0x4   :  { %2970 = vmatprep.subr.msk.bf16.mxu0 %vm392_vm0, %v70_v3  ;;  %v394_v5 = vsel %vm392_vm0, %v70_v3, 0  ;;  %105 = vperm.xlu0 %2977, %v3335_v9   ;;  %v3348_v11 = vld [vmem:[%s5397_s2 + $0x8] sm:$0xff]  ;;  %v3037_v13 = vld [vmem:[%s5396_s1 + $0x18] sm:$0xff]   ;;  %v3038_v14 = vld [vmem:[%s5396_s1 + $0x20] sm:$0xff]  }
   0x5   :  { %2885 = vmatpush3.bf16.msra.mxu0 %v394_v5  ;;  %v3366_v15 = vld [vmem:[%s5397_s2 + $0x20] sm:$0xff]  ;;  %v3373_v16 = vld [vmem:[%s5397_s2 + $0x48] sm:$0xff]  ;;  %v3380_v17 = vld [vmem:[%s5397_s2 + $0x30] sm:$0xff] }
   0x6   :  { %120 = vperm.xlu1 %2978, %v3322_v6   ;;  %v3386_v18 = vld [vmem:[%s5397_s2 + $0x58] sm:$0xff]  ;;  %v3039_v19 = vld [vmem:[%s5396_s1 + $0x28] sm:$0xff]   ;;  %v3040_v20 = vld [vmem:[%s5396_s1 + $0x30] sm:$0xff]  }
   0x7   :  { %v3398_v21 = vld [vmem:[%s5397_s2 + $0x40] sm:$0xff]  ;;  %v3405_v22 = vld [vmem:[%s5397_s2 + $0x68] sm:$0xff]  ;;  %v3412_v23 = vld [vmem:[%s5397_s2 + $0x50] sm:$0xff] }
   0x8   :  { %2887 = vmatmul.mubr.msk.bf16.vlgmr.msra.gmra.mrb[0].mxu0 %vm343_vm1, %v3035_v7  ;;  %110 = vperm.xlu0 %2977, %v3348_v11   ;;  %v3417_v24 = vld [vmem:[%s5397_s2 + $0x78] sm:$0xff]  ;;  %v3042_v26 = vld [vmem:[%s5396_s1 + $0x40] sm:$0xff]   ;;  %v3435_v28 = vld [vmem:[%s5397_s2 + $0x88] sm:$0xff] }
   0x9   :  { %2890 = vmatprep.mubr.msk.bf16.mxu0 %vm343_vm1, %v3036_v8  ;;  %v3041_v25 = vld [vmem:[%s5396_s1 + $0x38] sm:$0xff]   ;;  %v3429_v27 = vld [vmem:[%s5397_s2 + $0x60] sm:$0xff]  ;;  %v3441_v29 = vld [vmem:[%s5397_s2 + $0x70] sm:$0xff] }
   0xa   :  { %130 = vperm.xlu1 %2978, %v3341_v10   ;;  %v3449_v30 = vld [vmem:[%s5397_s2 + $0x98] sm:$0xff]  ;;  %v3043_v31 = vld [vmem:[%s5396_s1 + $0x48] sm:$0xff]   ;;  %v3044_v32 = vld [vmem:[%s5396_s1 + $0x50] sm:$0xff]  }
   0xb   :  { %v87_v33 = vld [vmem:[%s5397_s2 + $0x80] sm:$0xff] }
   0xc   :  { %125 = vperm.xlu0 %2977, %v3366_v15  }
   0xe   :  { %140 = vperm.xlu1 %2978, %v3354_v12  }
  0x10   :  { %2891 = vmatmul.mubr.msk.bf16.gmra.mrb[4].mxu0 %vm343_vm1, %v3037_v13  ;;  %135 = vperm.xlu0 %2977, %v3380_v17  }
  0x11   :  { %2894 = vmatprep.mubr.msk.bf16.mxu0 %vm343_vm1, %v3038_v14 }
  0x12   :  { %150 = vperm.xlu1 %2978, %v3373_v16  }
  0x14   :  { %145 = vperm.xlu0 %2977, %v3398_v21  }
  0x16   :  { %160 = vperm.xlu1 %2978, %v3386_v18  }
  0x18   :  { %2895 = vmatmul.mubr.msk.bf16.gmra.mrb[8].mxu0 %vm343_vm1, %v3039_v19  ;;  %155 = vperm.xlu0 %2977, %v3412_v23  }
  0x19   :  { %2898 = vmatprep.mubr.msk.bf16.mxu0 %vm343_vm1, %v3040_v20 }
  0x1a   :  { %170 = vperm.xlu1 %2978, %v3405_v22  }
  0x1c   :  { %165 = vperm.xlu0 %2977, %v3429_v27  }
  0x1e   :  { %180 = vperm.xlu1 %2978, %v3417_v24  }
  0x20   :  { %2899 = vmatmul.mubr.msk.bf16.gmra.mrb[12].mxu0 %vm343_vm1, %v3041_v25  ;;  %175 = vperm.xlu0 %2977, %v3441_v29  }
  0x21   :  { %2902 = vmatprep.mubr.msk.bf16.mxu0 %vm343_vm1, %v3042_v26 }
  0x22   :  { %190 = vperm.xlu1 %2978, %v3435_v28  }
  0x23   :  { %15 = vsyncpa [#allocation3], 0  ;;  %v3467_v34 = vld [vmem:[%s5397_s2 + $0xa8] sm:$0xff]  ;;  %v89_v35 = vld [vmem:[%s5397_s2 + $0x90] sm:$0xff]  ;;  %v5410_v52 = vmov 1   ;;  %v5408_v53 = vmov 2  }
  0x24   :  { %185 = vperm.xlu0 %2977, %v87_v33   ;;  %v3477_v36 = vld [vmem:[%s5397_s2 + $0xb8] sm:$0xff]  ;;  %v3046_v38 = vld [vmem:[%s5396_s1 + $0x60] sm:$0xff]   ;;  %v3493_v40 = vld [vmem:[%s5397_s2 + $0xc8] sm:$0xff]  ;;  %vm2487_vm2 = vcmask 523264   ;;  %vm3248_vm3 = vmmov 0   ;;  %s3249_s15 = smov [#allocation2]  }
  0x25   :  { %v3045_v37 = vld [vmem:[%s5396_s1 + $0x58] sm:$0xff]   ;;  %v91_v39 = vld [vmem:[%s5397_s2 + $0xa0] sm:$0xff]  ;;  %v3499_v41 = vld [vmem:[%s5397_s2 + $0xb0] sm:$0xff]  ;;  %s2708_s16 = sshll.u32 %s3249_s15, 4  ;;  %s2709_s16 = int_to_ptr.vmem [resolvable:$true] %s2708_s16 }
  0x26   :  { %200 = vperm.xlu1 %2978, %v3449_v30   ;;  %v3505_v42 = vld [vmem:[%s5397_s2 + $0xd8] sm:$0xff]  ;;  %v3047_v43 = vld [vmem:[%s5396_s1 + $0x68] sm:$0xff]   ;;  %v3048_v44 = vld [vmem:[%s5396_s1 + $0x70] sm:$0xff]   ;;  %p3225_p1 = scmp.lt.s32.totalorder %s2709_s16, %s2709_s16 }
  0x27   :  { %v3517_v45 = vld [vmem:[%s5397_s2 + $0xc0] sm:$0xff]  ;;  %v3524_v46 = vld [vmem:[%s5397_s2 + $0xe8] sm:$0xff]  ;;  %v3531_v47 = vld [vmem:[%s5397_s2 + $0xd0] sm:$0xff] }
  0x28   :  { %2903 = vmatmul.mubr.msk.bf16.gmra.mrb[16].mxu0 %vm343_vm1, %v3043_v31  ;;  %195 = vperm.xlu0 %2977, %v89_v35   ;;  %v3537_v48 = vld [vmem:[%s5397_s2 + $0xf8] sm:$0xff]  ;;  %v3546_v50 = vld [vmem:[%s5397_s2 + $0xe0] sm:$0xff]  ;;  %v3554_v51 = vld [vmem:[%s5397_s2 + $0xf0] sm:$0xff] }
  0x29   :  { %2906 = vmatprep.mubr.msk.bf16.mxu0 %vm343_vm1, %v3044_v32  ;;  %v3049_v49 = vld [vmem:[%s5396_s1 + $0x78] sm:$0xff]  }
  0x2a   :  { %210 = vperm.xlu1 %2978, %v3467_v34  }
  0x2c   :  { %205 = vperm.xlu0 %2977, %v91_v39  }
  0x2e   :  { %220 = vperm.xlu1 %2978, %v3477_v36  }
  0x30   :  { %2907 = vmatmul.mubr.msk.bf16.gmra.mrb[20].mxu0 %vm343_vm1, %v3045_v37  ;;  %215 = vperm.xlu0 %2977, %v3499_v41  }
  0x31   :  { %2910 = vmatprep.mubr.msk.bf16.mxu0 %vm343_vm1, %v3046_v38 }
  0x32   :  { %230 = vperm.xlu1 %2978, %v3493_v40  }
  0x34   :  { %225 = vperm.xlu0 %2977, %v3517_v45  }
  0x36   :  { %240 = vperm.xlu1 %2978, %v3505_v42  }
  0x38   :  { %2911 = vmatmul.mubr.msk.bf16.gmra.mrb[24].mxu0 %vm343_vm1, %v3047_v43  ;;  %235 = vperm.xlu0 %2977, %v3531_v47  }
  0x39   :  { %2914 = vmatprep.mubr.msk.bf16.mxu0 %vm343_vm1, %v3048_v44 }
  0x3a   :  { %250 = vperm.xlu1 %2978, %v3524_v46  }
  0x3c   :  { %245 = vperm.xlu0 %2977, %v3546_v50  }
  0x3e   :  { %260 = vperm.xlu1 %2978, %v3537_v48  }
  0x40   :  { %2915 = vmatmul.mubr.msk.bf16.gmra.mrb[28].mxu0 %vm343_vm1, %v3049_v49  ;;  %255 = vperm.xlu0 %2977, %v3554_v51  }
  0x42   :  { %2980 = vset.pattern.permute.xlu1 %v5410_v52 }
  0x43   :  { %802 = vperm.xlu1 %2980, %v3435_v28  }
  0x44   :  { %2979 = vset.pattern.permute.xlu0 %v5410_v52 }
  0x45   :  { %798 = vperm.xlu0 %2979, %v87_v33  }
  0x47   :  { %734 = vperm.xlu1 %2980, %v3335_v9  }
  0x49   :  { %738 = vperm.xlu0 %2979, %v3348_v11  }
  0x4b   :  { %2981 = vset.pattern.permute.xlu1 %v5408_v53 }
  0x4c   :  { %958 = vperm.xlu1 %2981, %v87_v33  }
  0x4d   :  { %806 = vperm.xlu0 %2979, %v89_v35  }
  0x50   :  { %894 = vperm.xlu1 %2981, %v3335_v9  }
  0x51   :  { %746 = vperm.xlu0 %2979, %v3322_v6  }
  0x54   :  { %898 = vperm.xlu1 %2981, %v3348_v11  }
  0x55   :  { %814 = vperm.xlu0 %2979, %v91_v39  }
  0x58   :  { %2982 = vset.pattern.permute.xlu1 %v5410_v52 }
  0x59   :  { %810 = vperm.xlu1 %2982, %v3449_v30   ;;  %754 = vperm.xlu0 %2979, %v3341_v10  }
  0x5d   :  { %742 = vperm.xlu1 %2982, %v3308_v0   ;;  %822 = vperm.xlu0 %2979, %v3499_v41  }
  0x61   :  { %2983 = vset.pattern.permute.xlu1 %v5408_v53  ;;  %762 = vperm.xlu0 %2979, %v3354_v12  }
  0x62   :  { %966 = vperm.xlu1 %2983, %v89_v35  }
  0x65   :  { %830 = vperm.xlu0 %2979, %v3517_v45  }
  0x66   :  { %902 = vperm.xlu1 %2983, %v3308_v0  }
  0x69   :  { %770 = vperm.xlu0 %2979, %v3373_v16  }
  0x6a   :  { %906 = vperm.xlu1 %2983, %v3322_v6  }
  0x6d   :  { %838 = vperm.xlu0 %2979, %v3531_v47  }
  0x6e   :  { %2984 = vset.pattern.permute.xlu1 %v5410_v52 }
  0x6f   :  { %818 = vperm.xlu1 %2984, %v3467_v34  }
  0x71   :  { %778 = vperm.xlu0 %2979, %v3386_v18  }
  0x73   :  { %750 = vperm.xlu1 %2984, %v3366_v15  }
  0x75   :  { %846 = vperm.xlu0 %2979, %v3546_v50  }
  0x77   :  { %2985 = vset.pattern.permute.xlu1 %v5408_v53 }
  0x78   :  { %974 = vperm.xlu1 %2985, %v91_v39  }
  0x79   :  { %786 = vperm.xlu0 %2979, %v3405_v22  }
  0x7c   :  { %910 = vperm.xlu1 %2985, %v3366_v15  }
  0x7d   :  { %854 = vperm.xlu0 %2979, %v3554_v51  }
  0x80   :  { %914 = vperm.xlu1 %2985, %v3341_v10  }
  0x81   :  { %v3588_v54 = vpop.permute.xlu1 %115  ;;  %794 = vperm.xlu0 %2979, %v3417_v24  }
  0x83   :  { %v3595_v56 = vpop.permute.xlu0 %105 }
  0x84   :  { %2986 = vset.pattern.permute.xlu1 %v5410_v52 }
  0x85   :  { %v3592_v55 = vpop.permute.xlu1 %120  ;;  %826 = vperm.xlu1 %2986, %v3477_v36   ;;  %2995 = vset.pattern.permute.xlu0 %v5408_v53 }
  0x86   :  { %962 = vperm.xlu0 %2995, %v3435_v28  }
  0x87   :  { %v3602_v58 = vpop.permute.xlu0 %110 }
  0x89   :  { %v3598_v57 = vpop.permute.xlu1 %130  ;;  %758 = vperm.xlu1 %2986, %v3380_v17  }
  0x8a   :  { %970 = vperm.xlu0 %2995, %v3449_v30  }
  0x8b   :  { %v3609_v60 = vpop.permute.xlu0 %125 }
  0x8d   :  { %v3604_v59 = vpop.permute.xlu1 %140  ;;  %2987 = vset.pattern.permute.xlu1 %v5408_v53 }
  0x8e   :  { %982 = vperm.xlu1 %2987, %v3499_v41   ;;  %978 = vperm.xlu0 %2995, %v3467_v34  }
  0x8f   :  { %v3615_v62 = vpop.permute.xlu0 %135 }
  0x91   :  { %v3611_v61 = vpop.permute.xlu1 %150 }
  0x92   :  { %918 = vperm.xlu1 %2987, %v3380_v17   ;;  %986 = vperm.xlu0 %2995, %v3477_v36  }
  0x93   :  { %v3623_v1 = vpop.permute.xlu0 %145 }
  0x95   :  { %v3617_v63 = vpop.permute.xlu1 %160 }
  0x96   :  { %922 = vperm.xlu1 %2987, %v3354_v12   ;;  %994 = vperm.xlu0 %2995, %v3493_v40  }
  0x97   :  { %v3632_v4 = vpop.permute.xlu0 %155 }
  0x99   :  { %v3621_v0 = vpop.permute.xlu1 %170 }
  0x9a   :  { %2988 = vset.pattern.permute.xlu1 %v5410_v52  ;;  %1002 = vperm.xlu0 %2995, %v3505_v42  }
  0x9b   :  { %834 = vperm.xlu1 %2988, %v3493_v40   ;;  %v3641_v7 = vpop.permute.xlu0 %165 }
  0x9d   :  { %v3628_v3 = vpop.permute.xlu1 %180 }
  0x9e   :  { %1010 = vperm.xlu0 %2995, %v3524_v46  }
  0x9f   :  { %766 = vperm.xlu1 %2988, %v3398_v21   ;;  %v3648_v9 = vpop.permute.xlu0 %175 }
  0xa1   :  { %v3634_v5 = vpop.permute.xlu1 %190 }
  0xa2   :  { %1018 = vperm.xlu0 %2995, %v3537_v48  }
  0xa3   :  { %2989 = vset.pattern.permute.xlu1 %v5408_v53  ;;  %v3657_v12 = vpop.permute.xlu0 %185 }
  0xa4   :  { %990 = vperm.xlu1 %2989, %v3517_v45  }
  0xa5   :  { %v3639_v6 = vpop.permute.xlu1 %200 }
  0xa6   :  { %2997 = vset.pattern.permute.xlu0 %v5406_v2 }
  0xa7   :  { %v3662_v14 = vpop.permute.xlu0 %195 }
  0xa8   :  { %926 = vperm.xlu1 %2989, %v3398_v21  }
  0xa9   :  { %v3645_v8 = vpop.permute.xlu1 %210 }
  0xac   :  { %930 = vperm.xlu1 %2989, %v3373_v16   ;;  %v3668_v16 = vpop.permute.xlu0 %205 }
  0xad   :  { %v3651_v10 = vpop.permute.xlu1 %220 }
  0xb0   :  { %2990 = vset.pattern.permute.xlu1 %v5410_v52  ;;  %v3676_v20 = vpop.permute.xlu0 %215 }
  0xb1   :  { %v3654_v11 = vpop.permute.xlu1 %230  ;;  %842 = vperm.xlu1 %2990, %v3505_v42  }
  0xb4   :  { %v3682_v25 = vpop.permute.xlu0 %225 }
  0xb5   :  { %v3659_v13 = vpop.permute.xlu1 %240  ;;  %774 = vperm.xlu1 %2990, %v3412_v23  }
  0xb8   :  { %v3687_v28 = vpop.permute.xlu0 %235 }
  0xb9   :  { %v3664_v15 = vpop.permute.xlu1 %250  ;;  %2991 = vset.pattern.permute.xlu1 %v5408_v53 }
  0xba   :  { %998 = vperm.xlu1 %2991, %v3531_v47  }
  0xbc   :  { %v3696_v30 = vpop.permute.xlu0 %245 }
  0xbd   :  { %v3670_v17 = vpop.permute.xlu1 %260 }
  0xbe   :  { %934 = vperm.xlu1 %2991, %v3412_v23  }
  0xc0   :  { %v3701_v33 = vpop.permute.xlu0 %255 }
  0xc2   :  { %v3673_v19 = vpop.permute.xlu1 %802  ;;  %938 = vperm.xlu1 %2991, %v3386_v18  }
  0xc3   :  { %5439 = vst [vmem:[#allocation5_spill] sm:$0xff] %v3673_v19 }
  0xc4   :  { %v3728_v44 = vpop.permute.xlu0 %798 }
  0xc6   :  { %2992 = vset.pattern.permute.xlu1 %v5410_v52  ;;  %v3679_v21 = vpop.permute.xlu1 %734 }
  0xc7   :  { %850 = vperm.xlu1 %2992, %v3524_v46  }
  0xcb   :  { %782 = vperm.xlu1 %2992, %v3429_v27   ;;  %v3685_v26 = vpop.permute.xlu1 %958 }
  0xcc   :  { %5440 = vst [vmem:[#allocation6_spill] sm:$0xff] %v3685_v26 }
  0xcf   :  { %2993 = vset.pattern.permute.xlu1 %v5408_v53  ;;  %v3690_v23 = vpop.permute.xlu1 %894 }
  0xd0   :  { %5441 = vst [vmem:[#allocation7_spill] sm:$0xff] %v3690_v23  ;;  %1006 = vperm.xlu1 %2993, %v3546_v50  }
  0xd3   :  { %v3693_v18 = vpop.permute.xlu1 %898 }
  0xd4   :  { %5442 = vst [vmem:[#allocation8_spill] sm:$0xff] %v3693_v18  ;;  %942 = vperm.xlu1 %2993, %v3429_v27  }
  0xd8   :  { %946 = vperm.xlu1 %2993, %v3405_v22   ;;  %v3699_v31 = vpop.permute.xlu1 %810 }
  0xd9   :  { %5443 = vst [vmem:[#allocation9_spill] sm:$0xff] %v3699_v31 }
  0xdb   :  { %v2888_v32 = vpop.f32.mrb[0].mxu0 }
  0xdc   :  { %v430_v34 = vpop.f32.mrb[1].mxu0  ;;  %2994 = vset.pattern.permute.xlu1 %v5410_v52  ;;  %v3707_v36 = vpop.permute.xlu1 %742  ;;  %v3711_v38 = vadd.f32 %v2888_v32, %v3588_v54 }
  0xdd   :  { %v3704_v35 = vadd.f32 %v430_v34, %v3595_v56  ;;  %v2889_v37 = vpop.f32.mrb[2].mxu0  ;;  %858 = vperm.xlu1 %2994, %v3537_v48  }
  0xde   :  { %v433_v27 = vpop.f32.mrb[3].mxu0  ;;  %v3719_v40 = vadd.f32 %v2889_v37, %v3592_v55  ;;  %v596_v45 = vmul.f32 %v3711_v38, %v3711_v38 }
  0xdf   :  { %v3714_v22 = vadd.f32 %v433_v27, %v3602_v58  ;;  %v594_v39 = vmul.f32 %v3704_v35, %v3704_v35 }
  0xe0   :  { %v597_v50 = vmul.f32 %v3719_v40, %v3719_v40 }
  0xe1   :  { %v557_v41 = vadd.f32 %v3714_v22, %v3704_v35  ;;  %v595_v42 = vmul.f32 %v3714_v22, %v3714_v22  ;;  %790 = vperm.xlu1 %2994, %v3441_v29   ;;  %v3726_v43 = vpop.permute.xlu1 %966 }
  0xe2   :  { %5444 = vst [vmem:[#allocation10_spill] sm:$0xff] %v3726_v43 }
  0xe3   :  { %v558_v46 = vadd.f32 %v557_v41, %v3711_v38  ;;  %v626_v47 = vadd.f32 %v595_v42, %v594_v39  ;;  %v2892_v48 = vpop.f32.mrb[4].mxu0  ;;  %v3752_v42 = vpop.permute.xlu0 %738 }
  0xe4   :  { %v446_v49 = vpop.f32.mrb[5].mxu0  ;;  %v3740_v32 = vadd.f32 %v2892_v48, %v3615_v62 }
  0xe5   :  { %v627_v54 = vadd.f32 %v626_v47, %v596_v45  ;;  %v3736_v55 = vadd.f32 %v446_v49, %v3609_v60  ;;  %v559_v56 = vadd.f32 %v558_v46, %v3719_v40  ;;  %v2893_v58 = vpop.f32.mrb[6].mxu0  ;;  %2996 = vset.pattern.permute.xlu1 %v5408_v53  ;;  %v3743_v34 = vpop.permute.xlu1 %902 }
  0xe6   :  { %5445 = vst [vmem:[#allocation11_spill] sm:$0xff] %v3743_v34  ;;  %v449_v37 = vpop.f32.mrb[7].mxu0  ;;  %1014 = vperm.xlu1 %2996, %v3554_v51   ;;  %v3755_v45 = vadd.f32 %v2893_v58, %v3604_v59  ;;  %v600_v49 = vmul.f32 %v3740_v32, %v3740_v32 }
  0xe7   :  { %v560_v27 = vadd.f32 %v559_v56, %v3736_v55  ;;  %v598_v39 = vmul.f32 %v3736_v55, %v3736_v55  ;;  %v628_v41 = vadd.f32 %v627_v54, %v597_v50  ;;  %v3749_v60 = vadd.f32 %v449_v37, %v3598_v57 }
  0xe8   :  { %v601_v59 = vmul.f32 %v3755_v45, %v3755_v45 }
  0xe9   :  { %v629_v62 = vadd.f32 %v628_v41, %v598_v39  ;;  %v561_v46 = vadd.f32 %v560_v27, %v3749_v60  ;;  %v599_v47 = vmul.f32 %v3749_v60, %v3749_v60  ;;  %v3760_v48 = vpop.permute.xlu1 %906 }
  0xea   :  { %5446 = vst [vmem:[#allocation12_spill] sm:$0xff] %v3760_v48  ;;  %950 = vperm.xlu1 %2996, %v3441_v29  }
  0xeb   :  { %v562_v57 = vadd.f32 %v561_v46, %v3740_v32  ;;  %v630_v50 = vadd.f32 %v629_v62, %v599_v47  ;;  %v2896_v51 = vpop.f32.mrb[8].mxu0  ;;  %v3775_v46 = vpop.permute.xlu0 %806 }
  0xec   :  { %v462_v54 = vpop.f32.mrb[9].mxu0  ;;  %v3773_v39 = vadd.f32 %v2896_v51, %v3632_v4 }
  0xed   :  { %v631_v56 = vadd.f32 %v630_v50, %v600_v49  ;;  %v3769_v58 = vadd.f32 %v462_v54, %v3623_v1  ;;  %v563_v37 = vadd.f32 %v562_v57, %v3755_v45  ;;  %v2897_v27 = vpop.f32.mrb[10].mxu0 }
  0xee   :  { %v465_v41 = vpop.f32.mrb[11].mxu0  ;;  %954 = vperm.xlu1 %2996, %v3417_v24   ;;  %v3784_v1 = vpop.permute.xlu1 %818  ;;  %v3787_v4 = vadd.f32 %v2897_v27, %v3617_v63  ;;  %v604_v54 = vmul.f32 %v3773_v39, %v3773_v39 }
  0xef   :  { %v564_v29 = vadd.f32 %v563_v37, %v3769_v58  ;;  %v602_v62 = vmul.f32 %v3769_v58, %v3769_v58  ;;  %v632_v47 = vadd.f32 %v631_v56, %v601_v59  ;;  %v3781_v49 = vadd.f32 %v465_v41, %v3611_v61  ;;  %5447 = vst [vmem:[#allocation13_spill] sm:$0xff] %v3784_v1  ;;  %v3798_v41 = vpop.permute.xlu0 %746 }
  0xf0   :  { %v605_v63 = vmul.f32 %v3787_v4, %v3787_v4 }
  0xf1   :  { %v633_v57 = vadd.f32 %v632_v47, %v602_v62  ;;  %v565_v50 = vadd.f32 %v564_v29, %v3781_v49  ;;  %v603_v51 = vmul.f32 %v3781_v49, %v3781_v49 }
  0xf2   :  { %v3795_v56 = vpop.permute.xlu1 %750  ;;  %2998 = vset.pattern.permute.xlu1 %v5406_v2 }
  0xf3   :  { %v566_v59 = vadd.f32 %v565_v50, %v3773_v39  ;;  %v634_v61 = vadd.f32 %v633_v57, %v603_v51  ;;  %v2900_v24 = vpop.f32.mrb[12].mxu0 }
  0xf4   :  { %v478_v37 = vpop.f32.mrb[13].mxu0  ;;  %v3807_v57 = vadd.f32 %v2900_v24, %v3648_v9  ;;  %v3823_v24 = vpop.permute.xlu0 %814 }
  0xf5   :  { %v635_v27 = vadd.f32 %v634_v61, %v604_v54  ;;  %v3803_v29 = vadd.f32 %v478_v37, %v3641_v7  ;;  %v567_v62 = vadd.f32 %v566_v59, %v3787_v4  ;;  %v2901_v47 = vpop.f32.mrb[14].mxu0  ;;  %5450 = vst [vmem:[#allocation16_spill] sm:$0xff] %v3823_v24 }
  0xf6   :  { %5448 = vst [vmem:[#allocation14_spill] sm:$0xff] %v3807_v57  ;;  %v481_v50 = vpop.f32.mrb[15].mxu0  ;;  %v3818_v61 = vadd.f32 %v2901_v47, %v3628_v3  ;;  %v608_v37 = vmul.f32 %v3807_v57, %v3807_v57 }
  0xf7   :  { %v568_v51 = vadd.f32 %v567_v62, %v3803_v29  ;;  %v606_v2 = vmul.f32 %v3803_v29, %v3803_v29  ;;  %v636_v53 = vadd.f32 %v635_v27, %v605_v63  ;;  %v3813_v52 = vadd.f32 %v481_v50, %v3621_v0  ;;  %v3815_v54 = vpop.permute.xlu1 %974 }
  0xf8   :  { %5449 = vst [vmem:[#allocation15_spill] sm:$0xff] %v3815_v54 }
  0xf9   :  { %v637_v7 = vadd.f32 %v636_v53, %v606_v2  ;;  %v569_v59 = vadd.f32 %v568_v51, %v3813_v52  ;;  %v607_v9 = vmul.f32 %v3813_v52, %v3813_v52  ;;  %v609_v53 = vmul.f32 %v3818_v61, %v3818_v61 }
  0xfb   :  { %v570_v63 = vadd.f32 %v569_v59, %v3807_v57  ;;  %v638_v0 = vadd.f32 %v637_v7, %v607_v9  ;;  %v2904_v27 = vpop.f32.mrb[16].mxu0  ;;  %v3828_v62 = vpop.permute.xlu1 %910 }
  0xfc   :  { %5451 = vst [vmem:[#allocation17_spill] sm:$0xff] %v3828_v62  ;;  %v494_v2 = vpop.f32.mrb[17].mxu0  ;;  %v3837_v26 = vadd.f32 %v2904_v27, %v3662_v14 }
  0xfd   :  { %v639_v3 = vadd.f32 %v638_v0, %v608_v37  ;;  %v3833_v47 = vadd.f32 %v494_v2, %v3657_v12  ;;  %v571_v50 = vadd.f32 %v570_v63, %v3818_v61  ;;  %v2905_v51 = vpop.f32.mrb[18].mxu0  ;;  %v3847_v12 = vpop.permute.xlu0 %754 }
  0xfe   :  { %v497_v1 = vpop.f32.mrb[19].mxu0  ;;  %v3850_v63 = vadd.f32 %v2905_v51, %v3639_v6  ;;  %v612_v2 = vmul.f32 %v3837_v26, %v3837_v26 }
  0xff   :  { %v572_v7 = vadd.f32 %v571_v50, %v3833_v47  ;;  %v610_v59 = vmul.f32 %v3833_v47, %v3833_v47  ;;  %v640_v9 = vadd.f32 %v639_v3, %v609_v53  ;;  %v3843_v31 = vadd.f32 %v497_v1, %v3634_v5  ;;  %v3845_v37 = vpop.permute.xlu1 %914 }
 0x100   :  { %5452 = vst [vmem:[#allocation18_spill] sm:$0xff] %v3845_v37  ;;  %v613_v50 = vmul.f32 %v3850_v63, %v3850_v63 }
 0x101   :  { %v641_v0 = vadd.f32 %v640_v9, %v610_v59  ;;  %v573_v14 = vadd.f32 %v572_v7, %v3843_v31  ;;  %v611_v27 = vmul.f32 %v3843_v31, %v3843_v31 }
 0x103   :  { %v574_v53 = vadd.f32 %v573_v14, %v3837_v26  ;;  %v642_v5 = vadd.f32 %v641_v0, %v611_v27  ;;  %v2908_v1 = vpop.f32.mrb[20].mxu0  ;;  %v3869_v14 = vpop.permute.xlu0 %822 }
 0x104   :  { %v510_v3 = vpop.f32.mrb[21].mxu0  ;;  %v3864_v7 = vpop.permute.xlu1 %826  ;;  %v3867_v19 = vadd.f32 %v2908_v1, %v3676_v20  ;;  %5454 = vst [vmem:[#allocation20_spill] sm:$0xff] %v3869_v14 }
 0x105   :  { %v643_v59 = vadd.f32 %v642_v5, %v612_v2  ;;  %v3861_v6 = vadd.f32 %v510_v3, %v3668_v16  ;;  %v575_v51 = vadd.f32 %v574_v53, %v3850_v63  ;;  %5453 = vst [vmem:[#allocation19_spill] sm:$0xff] %v3864_v7  ;;  %v2909_v9 = vpop.f32.mrb[22].mxu0 }
 0x106   :  { %v513_v54 = vpop.f32.mrb[23].mxu0  ;;  %v3878_v53 = vadd.f32 %v2909_v9, %v3651_v10 }
 0x107   :  { %v576_v0 = vadd.f32 %v575_v51, %v3861_v6  ;;  %v614_v27 = vmul.f32 %v3861_v6, %v3861_v6  ;;  %v644_v2 = vadd.f32 %v643_v59, %v613_v50  ;;  %v3875_v16 = vadd.f32 %v513_v54, %v3645_v8  ;;  %v3888_v54 = vpop.permute.xlu0 %762 }
 0x108   :  { %v3883_v1 = vpop.permute.xlu1 %758  ;;  %v616_v51 = vmul.f32 %v3867_v19, %v3867_v19  ;;  %v617_v10 = vmul.f32 %v3878_v53, %v3878_v53 }
 0x109   :  { %v645_v5 = vadd.f32 %v644_v2, %v614_v27  ;;  %v577_v3 = vadd.f32 %v576_v0, %v3875_v16  ;;  %v615_v20 = vmul.f32 %v3875_v16, %v3875_v16 }
 0x10b   :  { %v578_v7 = vadd.f32 %v577_v3, %v3867_v19  ;;  %v646_v50 = vadd.f32 %v645_v5, %v615_v20  ;;  %v2912_v59 = vpop.f32.mrb[24].mxu0 }
 0x10c   :  { %v526_v8 = vpop.f32.mrb[25].mxu0  ;;  %v3897_v43 = vadd.f32 %v2912_v59, %v3687_v28 }
 0x10d   :  { %v647_v9 = vadd.f32 %v646_v50, %v616_v51  ;;  %v3893_v0 = vadd.f32 %v526_v8, %v3682_v25  ;;  %v579_v27 = vadd.f32 %v578_v7, %v3878_v53  ;;  %v2913_v2 = vpop.f32.mrb[26].mxu0  ;;  %v3899_v37 = vpop.permute.xlu1 %982 }
 0x10e   :  { %5455 = vst [vmem:[#allocation21_spill] sm:$0xff] %v3899_v37  ;;  %v529_v5 = vpop.f32.mrb[27].mxu0  ;;  %v3908_v50 = vadd.f32 %v2913_v2, %v3659_v13  ;;  %v3915_v8 = vpop.permute.xlu0 %830 }
 0x10f   :  { %v580_v3 = vadd.f32 %v579_v27, %v3893_v0  ;;  %v618_v20 = vmul.f32 %v3893_v0, %v3893_v0  ;;  %v648_v62 = vadd.f32 %v647_v9, %v617_v10  ;;  %v3905_v51 = vadd.f32 %v529_v5, %v3654_v11  ;;  %5457 = vst [vmem:[#allocation23_spill] sm:$0xff] %v3915_v8 }
 0x110   :  { %v620_v27 = vmul.f32 %v3897_v43, %v3897_v43  ;;  %v621_v13 = vmul.f32 %v3908_v50, %v3908_v50 }
 0x111   :  { %v649_v25 = vadd.f32 %v648_v62, %v618_v20  ;;  %v581_v7 = vadd.f32 %v580_v3, %v3905_v51  ;;  %v619_v28 = vmul.f32 %v3905_v51, %v3905_v51  ;;  %v3913_v59 = vpop.permute.xlu1 %918 }
 0x112   :  { %5456 = vst [vmem:[#allocation22_spill] sm:$0xff] %v3913_v59 }
 0x113   :  { %v582_v10 = vadd.f32 %v581_v7, %v3897_v43  ;;  %v650_v11 = vadd.f32 %v649_v25, %v619_v28  ;;  %v2916_v9 = vpop.f32.mrb[28].mxu0 }
 0x114   :  { %v542_v62 = vpop.f32.mrb[29].mxu0  ;;  %v3927_v37 = vadd.f32 %v2916_v9, %v3701_v33 }
 0x115   :  { %v651_v2 = vadd.f32 %v650_v11, %v620_v27  ;;  %v3923_v5 = vadd.f32 %v542_v62, %v3696_v30  ;;  %v583_v3 = vadd.f32 %v582_v10, %v3908_v50  ;;  %v2917_v20 = vpop.f32.mrb[30].mxu0  ;;  %v3929_v8 = vpop.permute.xlu1 %922 }
 0x116   :  { %5459 = vst [vmem:[#allocation25_spill] sm:$0xff] %v3927_v37  ;;  %5460 = vst [vmem:[#allocation26_spill] sm:$0xff] %v3929_v8  ;;  %v545_v59 = vpop.f32.mrb[31].mxu0  ;;  %v3937_v30 = vpop.permute.xlu0 %770  ;;  %v3940_v10 = vadd.f32 %v2917_v20, %v3670_v17  ;;  %v624_v62 = vmul.f32 %v3927_v37, %v3927_v37 }
 0x117   :  { %5458 = vst [vmem:[#allocation24_spill] sm:$0xff] %v3923_v5  ;;  %v584_v25 = vadd.f32 %v583_v3, %v3923_v5  ;;  %v622_v7 = vmul.f32 %v3923_v5, %v3923_v5  ;;  %v652_v28 = vadd.f32 %v651_v2, %v621_v13  ;;  %v3935_v27 = vadd.f32 %v545_v59, %v3664_v15 }
 0x118   :  { %5461 = vst [vmem:[#allocation27_spill] sm:$0xff] %v3940_v10  ;;  %v625_v15 = vmul.f32 %v3940_v10, %v3940_v10 }
 0x119   :  { %v653_v11 = vadd.f32 %v652_v28, %v622_v7  ;;  %v585_v33 = vadd.f32 %v584_v25, %v3935_v27  ;;  %v623_v9 = vmul.f32 %v3935_v27, %v3935_v27 }
 0x11a   :  { %v3948_v2 = vpop.permute.xlu1 %834  ;;  %v3953_v20 = vpop.permute.xlu0 %838 }
 0x11b   :  { %v586_v3 = vadd.f32 %v585_v33, %v3927_v37  ;;  %v654_v13 = vadd.f32 %v653_v11, %v623_v9  ;;  %5462 = vst [vmem:[#allocation28_spill] sm:$0xff] %v3953_v20 }
 0x11d   :  { %v587_v59 = vadd.f32 %v586_v3, %v3940_v10  ;;  %v655_v17 = vadd.f32 %v654_v13, %v624_v62 }
 0x11e   :  { %v3955_v28 = vpop.permute.xlu1 %766  ;;  %v3959_v11 = vpop.permute.xlu0 %778 }
 0x11f   :  { %v588_v25 = vrot.slane %v587_v59, 4  ;;  %v656_v7 = vadd.f32 %v655_v17, %v625_v15 }
 0x121   :  { %v589_v8 = vadd.f32 %v588_v25, %v587_v59  ;;  %v657_v48 = vrot.slane %v656_v7, 4 }
 0x122   :  { %v3963_v20 = vpop.permute.xlu0 %846 }
 0x123   :  { %v590_v34 = vrot.slane %v589_v8, 2  ;;  %v658_v18 = vadd.f32 %v657_v48, %v656_v7  ;;  %v3957_v33 = vpop.permute.xlu1 %990  ;;  %5463 = vst [vmem:[#allocation29_spill] sm:$0xff] %v3963_v20 }
 0x125   :  { %v591_v9 = vadd.f32 %v590_v34, %v589_v8  ;;  %v659_v23 = vrot.slane %v658_v18, 2 }
 0x127   :  { %v592_v14 = vrot.slane %v591_v9, 1  ;;  %v660_v24 = vadd.f32 %v659_v23, %v658_v18  ;;  %v3961_v3 = vpop.permute.xlu1 %926 }
 0x129   :  { %v593_v62 = vadd.f32 %v592_v14, %v591_v9  ;;  %v661_v13 = vrot.slane %v660_v24, 1  ;;  %v3977_v14 = vpop.permute.xlu0 %786 }
 0x12b   :  { %v662_v15 = vadd.f32 %v661_v13, %v660_v24  ;;  %v3965_v17 = vmul.f32 0.00390625, %v593_v62  ;;  %v3967_v59 = vpop.permute.xlu1 %930 }
 0x12d   :  { %v664_v48 = vmul.f32 0.00390625, %v662_v15  ;;  %v665_v25 = vmul.f32 %v3965_v17, %v3965_v17  ;;  %v676_v23 = vsub.f32 %v3781_v49, %v3965_v17  ;;  %v678_v18 = vsub.f32 %v3787_v4, %v3965_v17 }
 0x12e   :  { %v680_v9 = vsub.f32 %v3813_v52, %v3965_v17  ;;  %v682_v49 = vsub.f32 %v3818_v61, %v3965_v17  ;;  %v683_v4 = vsub.f32 %v3833_v47, %v3965_v17  ;;  %v3052_v52 = vld [vmem:[%s5398_s3 + $0x4] ss:$8 sps:$4 sm:$0xff]   ;;  %v687_v61 = vsub.f32 %v3861_v6, %v3965_v17  ;;  %v4024_v47 = vpop.permute.xlu0 %854 }
 0x12f   :  { %v666_v8 = vsub.f32 %v664_v48, %v665_v25  ;;  %v685_v48 = vsub.f32 %v3837_v26, %v3965_v17  ;;  %v691_v62 = vsub.f32 %v3893_v0, %v3965_v17  ;;  %1581 = vmatprep.mubr.bf16.mxu1 %v3052_v52  ;;  %5464 = vst [vmem:[#allocation30_spill] sm:$0xff] %v4024_v47 }
 0x130   :  { %v3985_v13 = vpop.permute.xlu1 %842  ;;  %v667_v52 = vsub.f32 %v3704_v35, %v3965_v17  ;;  %v668_v7 = vsub.f32 %v3714_v22, %v3965_v17  ;;  %v669_v34 = vsub.f32 %v3711_v38, %v3965_v17  ;;  %v671_v25 = vsub.f32 %v3736_v55, %v3965_v17 }
 0x131   :  { %v699_v24 = vadd.f32 1e-05, %v666_v8  ;;  %v689_v8 = vsub.f32 %v3867_v19, %v3965_v17  ;;  %v670_v19 = vsub.f32 %v3719_v40, %v3965_v17  ;;  %v672_v0 = vsub.f32 %v3749_v60, %v3965_v17 }
 0x132   :  { %v795_v15 = vpop.permute.xlu0 %794  ;;  %v673_v35 = vsub.f32 %v3740_v32, %v3965_v17  ;;  %v674_v22 = vsub.f32 %v3755_v45, %v3965_v17  ;;  %v675_v38 = vsub.f32 %v3769_v58, %v3965_v17 }
 0x133   :  { %3082 = vrsqrt.f32 %v699_v24  ;;  %v692_v24 = vsub.f32 %v3905_v51, %v3965_v17 }
 0x134   :  { %v4020_v26 = vpop.permute.xlu1 %774 }
 0x139   :  { %v4026_v51 = vpop.permute.xlu1 %998 }
 0x13d   :  { %v4040_v6 = vpop.eup %3082  ;;  %v4054_v57 = vpop.permute.xlu1 %934 }
 0x13e   :  { %v726_v55 = vmul.f32 %v4040_v6, %v692_v24  ;;  %v701_v47 = vmul.f32 %v4040_v6, %v667_v52  ;;  %v702_v60 = vmul.f32 %v4040_v6, %v668_v7  ;;  %v703_v37 = vmul.f32 %v4040_v6, %v669_v34 }
 0x13f   :  { %v704_v32 = vmul.f32 %v4040_v6, %v670_v19  ;;  %v705_v45 = vmul.f32 %v4040_v6, %v671_v25  ;;  %v706_v10 = vmul.f32 %v4040_v6, %v672_v0  ;;  %v707_v58 = vmul.f32 %v4040_v6, %v673_v35  ;;  %v4070_v0 = vpop.permute.xlu0 %962 }
 0x140   :  { %v4061_v40 = vmul.f32 %v3948_v2, %v726_v55  ;;  %v708_v24 = vmul.f32 %v4040_v6, %v674_v22  ;;  %v710_v52 = vmul.f32 %v4040_v6, %v676_v23  ;;  %v712_v7 = vmul.f32 %v4040_v6, %v678_v18 }
 0x141   :  { %v714_v34 = vmul.f32 %v4040_v6, %v680_v9  ;;  %v716_v20 = vmul.f32 %v4040_v6, %v682_v49  ;;  %v717_v19 = vmul.f32 %v4040_v6, %v683_v4  ;;  %v719_v25 = vmul.f32 %v4040_v6, %v685_v48  ;;  %v4084_v5 = vpop.permute.xlu1 %938 }
 0x142   :  { %v721_v35 = vmul.f32 %v4040_v6, %v687_v61  ;;  %v723_v2 = vmul.f32 %v4040_v6, %v689_v8  ;;  %v709_v22 = vmul.f32 %v4040_v6, %v675_v38  ;;  %v861_v23 = vmul.f32 %v3679_v21, %v701_v47 }
 0x143   :  { %v862_v18 = vmul.f32 %v3752_v42, %v702_v60  ;;  %v863_v9 = vmul.f32 %v3707_v36, %v703_v37  ;;  %v864_v49 = vmul.f32 %v3798_v41, %v704_v32  ;;  %v865_v4 = vmul.f32 %v3795_v56, %v705_v45  ;;  %v5473_v45 = vld [vmem:[#allocation18_spill] sm:$0xff] }
 0x144   :  { %v869_v48 = vmul.f32 %v3955_v28, %v709_v22  ;;  %v866_v55 = vmul.f32 %v3847_v12, %v706_v10  ;;  %v867_v61 = vmul.f32 %v3883_v1, %v707_v58  ;;  %v868_v8 = vmul.f32 %v3888_v54, %v708_v24  ;;  %v5466_v12 = vld [vmem:[#allocation16_spill] sm:$0xff] }
 0x145   :  { %v870_v21 = vmul.f32 %v3937_v30, %v710_v52  ;;  %v4088_v42 = vmul.f32 %v3959_v11, %v712_v7  ;;  %v4091_v36 = vmul.f32 %v3977_v14, %v714_v34  ;;  %v4093_v41 = vmul.f32 %v795_v15, %v716_v20  ;;  %v5467_v54 = vld [vmem:[#allocation20_spill] sm:$0xff]  ;;  %v5468_v30 = vld [vmem:[#allocation7_spill] sm:$0xff]  ;;  %v4111_v15 = vpop.permute.xlu0 %970  ;;  %v5476_v34 = vld [vmem:[#allocation26_spill] sm:$0xff] }
 0x146   :  { %v4096_v56 = vmul.f32 %v3728_v44, %v717_v19  ;;  %v879_v37 = vmul.f32 %v3775_v46, %v719_v25  ;;  %v881_v1 = vmul.f32 %v5466_v12, %v721_v35  ;;  %v883_v10 = vmul.f32 %v5467_v54, %v723_v2  ;;  %v5469_v11 = vld [vmem:[#allocation8_spill] sm:$0xff]  ;;  %v5470_v14 = vld [vmem:[#allocation11_spill] sm:$0xff]  ;;  %v5472_v46 = vld [vmem:[#allocation17_spill] sm:$0xff] }
 0x147   :  { %5465 = vst [vmem:[#allocation31_spill] sm:$0xff] %v4093_v41  ;;  %v725_v28 = vmul.f32 %v4040_v6, %v691_v62  ;;  %v4103_v47 = vadd.f32 %v5468_v30, %v861_v23  ;;  %v4106_v38 = vadd.f32 %v5469_v11, %v862_v18  ;;  %v4109_v20 = vadd.f32 %v5470_v14, %v863_v9  ;;  %v5471_v44 = vld [vmem:[#allocation12_spill] sm:$0xff]  ;;  %v5474_v62 = vld [vmem:[#allocation22_spill] sm:$0xff]  ;;  %v5475_v52 = vld [vmem:[#allocation23_spill] sm:$0xff] }
 0x148   :  { %v4114_v60 = vadd.f32 %v5471_v44, %v864_v49  ;;  %v4117_v32 = vadd.f32 %v5472_v46, %v865_v4  ;;  %v4120_v58 = vadd.f32 %v5473_v45, %v866_v55  ;;  %v4123_v24 = vadd.f32 %v5474_v62, %v867_v61  ;;  %v5477_v25 = vld [vmem:[#allocation10_spill] sm:$0xff]  ;;  %v5478_v2 = vld [vmem:[#allocation15_spill] sm:$0xff]  ;;  %v5479_v23 = vld [vmem:[#allocation21_spill] sm:$0xff]  ;;  %v4145_v55 = vpop.permute.xlu1 %850 }
 0x149   :  { %v885_v7 = vmul.f32 %v5475_v52, %v725_v28  ;;  %v4127_v19 = vadd.f32 %v5476_v34, %v868_v8  ;;  %v4130_v35 = vadd.f32 %v5477_v25, %v879_v37  ;;  %v4133_v22 = vadd.f32 %v5478_v2, %v881_v1  ;;  %v4170_v11 = vpop.permute.xlu0 %978 }
 0x14a   :  { %v4136_v18 = vadd.f32 %v5479_v23, %v883_v10  ;;  %v4139_v9 = vadd.f32 %v3961_v3, %v869_v48  ;;  %v1055_v49 = vmul.f32 %v4109_v20, %v4109_v20  ;;  %v1056_v4 = vmul.f32 %v4114_v60, %v4114_v60 }
 0x14b   :  { %v4148_v61 = vadd.f32 %v3957_v33, %v885_v7  ;;  %v1057_v8 = vmul.f32 %v4117_v32, %v4117_v32  ;;  %v1058_v37 = vmul.f32 %v4120_v58, %v4120_v58  ;;  %v1059_v3 = vmul.f32 %v4123_v24, %v4123_v24 }
 0x14c   :  { %v1061_v48 = vmul.f32 %v4139_v9, %v4139_v9  ;;  %v1060_v12 = vmul.f32 %v4127_v19, %v4127_v19  ;;  %v1075_v1 = vmul.f32 %v4136_v18, %v4136_v18  ;;  %v4163_v33 = vadd.f32 %v3967_v59, %v870_v21 }
 0x14d   :  { %v1077_v54 = vmul.f32 %v4148_v61, %v4148_v61  ;;  %v1087_v10 = vmul.f32 %v1055_v49, %v4109_v20  ;;  %v1088_v28 = vmul.f32 %v1056_v4, %v4114_v60  ;;  %v1089_v30 = vmul.f32 %v1057_v8, %v4117_v32  ;;  %v4185_v49 = vpop.permute.xlu1 %782  ;;  %v5482_v8 = vld [vmem:[#allocation5_spill] sm:$0xff] }
 0x14e   :  { %5480 = vst [vmem:[#allocation16_spill] sm:$0xff] %v4163_v33  ;;  %v1093_v14 = vmul.f32 %v1061_v48, %v4139_v9  ;;  %v1062_v44 = vmul.f32 %v4163_v33, %v4163_v33  ;;  %v1090_v46 = vmul.f32 %v1058_v37, %v4120_v58  ;;  %v1091_v59 = vmul.f32 %v1059_v3, %v4123_v24 }
 0x14f   :  { %v1109_v21 = vmul.f32 %v1077_v54, %v4148_v61  ;;  %v1092_v45 = vmul.f32 %v1060_v12, %v4127_v19  ;;  %v1107_v62 = vmul.f32 %v1075_v1, %v4136_v18  ;;  %v5481_v52 = vsub.f32 %v3843_v31, %v3965_v17 }
 0x150   :  { %v1125_v34 = vmul.f32 0.044715, %v1093_v14  ;;  %v1094_v25 = vmul.f32 %v1062_v44, %v4163_v33  ;;  %v1119_v2 = vmul.f32 0.044715, %v1087_v10  ;;  %v1120_v23 = vmul.f32 0.044715, %v1088_v28 }
 0x151   :  { %v718_v7 = vmul.f32 %v4040_v6, %v5481_v52  ;;  %v1141_v4 = vmul.f32 0.044715, %v1109_v21  ;;  %v1121_v3 = vmul.f32 0.044715, %v1089_v30  ;;  %v1122_v48 = vmul.f32 0.044715, %v1090_v46  ;;  %v987_v21 = vpop.permute.xlu0 %986 }
 0x152   :  { %v1157_v12 = vadd.f32 %v1125_v34, %v4139_v9  ;;  %v1126_v1 = vmul.f32 0.044715, %v1094_v25  ;;  %v1123_v54 = vmul.f32 0.044715, %v1091_v59  ;;  %v1124_v41 = vmul.f32 0.044715, %v1092_v45 }
 0x153   :  { %v878_v37 = vmul.f32 %v5482_v8, %v718_v7  ;;  %v1173_v31 = vadd.f32 %v1141_v4, %v4148_v61  ;;  %v1139_v44 = vmul.f32 0.044715, %v1107_v62  ;;  %v5483_v10 = vsub.f32 %v3908_v50, %v3965_v17  ;;  %v4206_v4 = vpop.permute.xlu1 %1006 }
 0x154   :  { %v1189_v52 = vmul.f32 0.7978846, %v1157_v12  ;;  %v1158_v30 = vadd.f32 %v1126_v1, %v4163_v33  ;;  %v1151_v46 = vadd.f32 %v1119_v2, %v4109_v20  ;;  %v1152_v59 = vadd.f32 %v1120_v23, %v4114_v60  ;;  %v5516_v33 = vld [vmem:[#allocation25_spill] sm:$0xff] }
 0x155   :  { %v4191_v14 = vadd.f32 %v4070_v0, %v878_v37  ;;  %v728_v28 = vmul.f32 %v4040_v6, %v5483_v10  ;;  %v1205_v45 = vmul.f32 0.7978846, %v1173_v31  ;;  %v1153_v62 = vadd.f32 %v1121_v3, %v4117_v32 }
 0x156   :  { %3084 = vtanh.f32 %v1189_v52  ;;  %v1190_v50 = vmul.f32 0.7978846, %v1158_v30  ;;  %v1154_v34 = vadd.f32 %v1122_v48, %v4120_v58  ;;  %v1155_v25 = vadd.f32 %v1123_v54, %v4123_v24 }
 0x157   :  { %v1070_v7 = vmul.f32 %v4191_v14, %v4191_v14  ;;  %v888_v0 = vmul.f32 %v3985_v13, %v728_v28  ;;  %3086 = vtanh.f32 %v1205_v45  ;;  %v1156_v23 = vadd.f32 %v1124_v41, %v4127_v19  ;;  %v995_v41 = vpop.permute.xlu0 %994  ;;  %v5486_v28 = vld [vmem:[#allocation9_spill] sm:$0xff] }
 0x158   :  { %v1171_v8 = vadd.f32 %v1139_v44, %v4136_v18  ;;  %3088 = vtanh.f32 %v1190_v50  ;;  %v5484_v13 = vsub.f32 %v3850_v63, %v3965_v17  ;;  %v1183_v3 = vmul.f32 0.7978846, %v1151_v46 }
 0x159   :  { %v1102_v2 = vmul.f32 %v1070_v7, %v4191_v14  ;;  %v1184_v12 = vmul.f32 0.7978846, %v1152_v59  ;;  %v1185_v1 = vmul.f32 0.7978846, %v1153_v62  ;;  %v1186_v54 = vmul.f32 0.7978846, %v1154_v34 }
 0x15a   :  { %v720_v37 = vmul.f32 %v4040_v6, %v5484_v13  ;;  %v5485_v31 = vsub.f32 %v3773_v39, %v3965_v17  ;;  %v1187_v52 = vmul.f32 0.7978846, %v1155_v25  ;;  %v1188_v30 = vmul.f32 0.7978846, %v1156_v23  ;;  %v5490_v25 = vld [vmem:[#allocation13_spill] sm:$0xff] }
 0x15b   :  { %v4215_v48 = vmul.f32 0.044715, %v1102_v2  ;;  %v1203_v45 = vmul.f32 0.7978846, %v1171_v8  ;;  %3090 = vtanh.f32 %v1183_v3  ;;  %v5487_v46 = vsub.f32 %v3875_v16, %v3965_v17  ;;  %v4241_v16 = vpop.permute.xlu1 %942 }
 0x15c   :  { %v711_v10 = vmul.f32 %v4040_v6, %v5485_v31  ;;  %v880_v44 = vmul.f32 %v5486_v28, %v720_v37  ;;  %v5488_v7 = vsub.f32 %v3878_v53, %v3965_v17  ;;  %3092 = vtanh.f32 %v1184_v12  ;;  %v5491_v53 = vld [vmem:[#allocation19_spill] sm:$0xff] }
 0x15d   :  { %v722_v59 = vmul.f32 %v4040_v6, %v5487_v46  ;;  %v5489_v50 = vsub.f32 %v3897_v43, %v3965_v17  ;;  %v4239_v34 = vadd.f32 %v995_v41, %v4061_v40  ;;  %3094 = vtanh.f32 %v1185_v1  ;;  %v5493_v43 = vld [vmem:[#allocation28_spill] sm:$0xff] }
 0x15e   :  { %v871_v63 = vmul.f32 %v4020_v26, %v711_v10  ;;  %v724_v39 = vmul.f32 %v4040_v6, %v5488_v7  ;;  %v4232_v62 = vadd.f32 %v4111_v15, %v880_v44  ;;  %3096 = vtanh.f32 %v1186_v54 }
 0x15f   :  { %v727_v26 = vmul.f32 %v4040_v6, %v5489_v50  ;;  %v882_v2 = vmul.f32 %v5490_v25, %v722_v59  ;;  %v1078_v40 = vmul.f32 %v4239_v34, %v4239_v34  ;;  %3098 = vtanh.f32 %v1187_v52  ;;  %v947_v46 = vpop.permute.xlu1 %946 }
 0x160   :  { %v884_v23 = vmul.f32 %v5491_v53, %v724_v39  ;;  %v4246_v8 = vadd.f32 %v4054_v57, %v871_v63  ;;  %v1072_v15 = vmul.f32 %v4232_v62, %v4232_v62  ;;  %v1003_v57 = vpop.permute.xlu0 %1002  ;;  %v4260_v1 = vpop.eup %3084  ;;  %3100 = vtanh.f32 %v1188_v30 }
 0x161   :  { %v887_v13 = vmul.f32 %v5493_v43, %v727_v26  ;;  %v4254_v37 = vadd.f32 %v4170_v11, %v882_v2  ;;  %v1110_v10 = vmul.f32 %v1078_v40, %v4239_v34  ;;  %v4267_v41 = vpop.eup %3086  ;;  %3102 = vtanh.f32 %v1203_v45 }
 0x162   :  { %5492 = vst [vmem:[#allocation20_spill] sm:$0xff] %v4246_v8  ;;  %v4256_v3 = vadd.f32 %v987_v21, %v884_v23  ;;  %v1063_v12 = vmul.f32 %v4246_v8, %v4246_v8  ;;  %v1104_v31 = vmul.f32 %v1072_v15, %v4232_v62  ;;  %v4274_v44 = vpop.eup %3088  ;;  %v4278_v63 = vadd.f32 %v1003_v57, %v888_v0 }
 0x163   :  { %v4264_v54 = vadd.f32 %v4026_v51, %v887_v13  ;;  %v1074_v11 = vmul.f32 %v4254_v37, %v4254_v37  ;;  %v1142_v30 = vmul.f32 0.044715, %v1110_v10  ;;  %v4284_v39 = vadd.f32 %v4084_v5, %v4088_v42 }
 0x164   :  { %v1076_v21 = vmul.f32 %v4256_v3, %v4256_v3  ;;  %v1095_v28 = vmul.f32 %v1063_v12, %v4246_v8  ;;  %v1136_v52 = vmul.f32 0.044715, %v1104_v31  ;;  %5495 = vst [vmem:[#allocation8_spill] sm:$0xff] %v4278_v63  ;;  %v1080_v0 = vmul.f32 %v4278_v63, %v4278_v63 }
 0x165   :  { %5494 = vst [vmem:[#allocation7_spill] sm:$0xff] %v4264_v54  ;;  %v1079_v51 = vmul.f32 %v4264_v54, %v4264_v54  ;;  %v1106_v45 = vmul.f32 %v1074_v11, %v4254_v37  ;;  %5496 = vst [vmem:[#allocation11_spill] sm:$0xff] %v4284_v39  ;;  %v1174_v25 = vadd.f32 %v1142_v30, %v4239_v34  ;;  %v4291_v2 = vpop.eup %3090 }
 0x166   :  { %v1108_v59 = vmul.f32 %v1076_v21, %v4256_v3  ;;  %v1127_v7 = vmul.f32 0.044715, %v1095_v28  ;;  %v1168_v50 = vadd.f32 %v1136_v52, %v4232_v62  ;;  %v1064_v43 = vmul.f32 %v4284_v39, %v4284_v39  ;;  %v4296_v5 = vpop.eup %3092 }
 0x167   :  { %v1111_v26 = vmul.f32 %v1079_v51, %v4264_v54  ;;  %v1138_v53 = vmul.f32 0.044715, %v1106_v45  ;;  %v1206_v40 = vmul.f32 0.7978846, %v1174_v25  ;;  %v1112_v12 = vmul.f32 %v1080_v0, %v4278_v63  ;;  %v4299_v57 = vpop.eup %3094  ;;  %v1011_v0 = vpop.permute.xlu0 %1010 }
 0x168   :  { %v1140_v23 = vmul.f32 0.044715, %v1108_v59  ;;  %v1159_v15 = vadd.f32 %v1127_v7, %v4246_v8  ;;  %v1200_v42 = vmul.f32 0.7978846, %v1168_v50  ;;  %v1096_v21 = vmul.f32 %v1064_v43, %v4284_v39  ;;  %v4304_v28 = vpop.eup %3096  ;;  %v859_v59 = vpop.permute.xlu1 %858 }
 0x169   :  { %v1143_v13 = vmul.f32 0.044715, %v1111_v26  ;;  %v1170_v31 = vadd.f32 %v1138_v53, %v4254_v37  ;;  %v1144_v51 = vmul.f32 0.044715, %v1112_v12  ;;  %v5497_v30 = vsub.f32 %v3935_v27, %v3965_v17  ;;  %v4311_v7 = vpop.eup %3098  ;;  %v5499_v12 = vld [vmem:[#allocation24_spill] sm:$0xff] }
 0x16a   :  { %v1172_v10 = vadd.f32 %v1140_v23, %v4256_v3  ;;  %v1191_v11 = vmul.f32 0.7978846, %v1159_v15  ;;  %3104 = vtanh.f32 %v1200_v42  ;;  %v1128_v25 = vmul.f32 0.044715, %v1096_v21  ;;  %v4313_v53 = vpop.eup %3100 }
 0x16b   :  { %v1175_v52 = vadd.f32 %v1143_v13, %v4264_v54  ;;  %v730_v45 = vmul.f32 %v4040_v6, %v5497_v30  ;;  %v1202_v50 = vmul.f32 0.7978846, %v1170_v31  ;;  %3106 = vtanh.f32 %v1206_v40  ;;  %v4317_v42 = vpop.eup %3102  ;;  %v5503_v30 = vld [vmem:[#allocation29_spill] sm:$0xff] }
 0x16c   :  { %v1204_v26 = vmul.f32 0.7978846, %v1172_v10  ;;  %3108 = vtanh.f32 %v1191_v11  ;;  %v1176_v15 = vadd.f32 %v1144_v51, %v4278_v63  ;;  %v1160_v27 = vadd.f32 %v1128_v25, %v4284_v39 }
 0x16d   :  { %v1207_v23 = vmul.f32 0.7978846, %v1175_v52  ;;  %v890_v43 = vmul.f32 %v4145_v55, %v730_v45  ;;  %3110 = vtanh.f32 %v1202_v50  ;;  %v5498_v13 = vsub.f32 %v3803_v29, %v3965_v17  ;;  %v4338_v45 = vld [vmem:[%s5399_s4 + $0x8] sm:$0xff] }
 0x16e   :  { %v5500_v31 = vsub.f32 %v5499_v12, %v3965_v17  ;;  %3112 = vtanh.f32 %v1204_v26  ;;  %v1208_v11 = vmul.f32 0.7978846, %v1176_v15  ;;  %v4331_v55 = vadd.f32 %v947_v46, %v4091_v36  ;;  %5504 = vst [vmem:[#allocation18_spill] sm:$0xff] %v4338_v45  ;;  %v5505_v36 = vld [vmem:[#allocation27_spill] sm:$0xff]  ;;  %1396 = vperm.xlu1 %2998, %v4338_v45   ;;  %v5509_v15 = vld [vmem:[#allocation14_spill] sm:$0xff] }
 0x16f   :  { %v713_v40 = vmul.f32 %v4040_v6, %v5498_v13  ;;  %v4328_v21 = vadd.f32 %v1011_v0, %v890_v43  ;;  %3114 = vtanh.f32 %v1207_v23  ;;  %v1192_v52 = vmul.f32 0.7978846, %v1160_v27  ;;  %v4362_v13 = vld [vmem:[%s5399_s4 + $0x10] sm:$0xff] }
 0x170   :  { %v729_v10 = vmul.f32 %v4040_v6, %v5500_v31  ;;  %5502 = vst [vmem:[#allocation17_spill] sm:$0xff] %v4331_v55  ;;  %3116 = vtanh.f32 %v1208_v11  ;;  %v1066_v26 = vmul.f32 %v4331_v55, %v4331_v55  ;;  %v5506_v46 = vsub.f32 %v5505_v36, %v3965_v17  ;;  %v5511_v31 = vld [vmem:[#allocation6_spill] sm:$0xff] }
 0x171   :  { %5501 = vst [vmem:[#allocation12_spill] sm:$0xff] %v4328_v21  ;;  %v873_v51 = vmul.f32 %v4185_v49, %v713_v40  ;;  %v1082_v50 = vmul.f32 %v4328_v21, %v4328_v21  ;;  %v791_v49 = vpop.permute.xlu1 %790  ;;  %3118 = vtanh.f32 %v1192_v52  ;;  %v5510_v43 = vsub.f32 %v5509_v15, %v3965_v17  ;;  %v4367_v40 = vld [vmem:[%s5399_s4] sm:$0xff]  ;;  %v1019_v52 = vpop.permute.xlu0 %1018 }
 0x172   :  { %v889_v29 = vmul.f32 %v5503_v30, %v729_v10  ;;  %v732_v25 = vmul.f32 %v4040_v6, %v5506_v46  ;;  %v4373_v10 = vadd.f32 %v5511_v31, %v4096_v56  ;;  %1391 = vperm.xlu0 %2997, %v4367_v40   ;;  %1401 = vperm.xlu1 %2998, %v4362_v13  }
 0x173   :  { %v4353_v23 = vadd.f32 %v4241_v16, %v873_v51  ;;  %v715_v27 = vmul.f32 %v4040_v6, %v5510_v43  ;;  %v1098_v16 = vmul.f32 %v1066_v26, %v4331_v55  ;;  %v1053_v43 = vmul.f32 %v4103_v47, %v4103_v47 }
 0x174   :  { %v4350_v0 = vadd.f32 %v4206_v4, %v889_v29  ;;  %v1114_v4 = vmul.f32 %v1082_v50, %v4328_v21  ;;  %v892_v12 = vmul.f32 %v859_v59, %v732_v25  ;;  %v1166_v29 = vadd.f32 %v4215_v48, %v4191_v14  ;;  %v4387_v59 = vld [vmem:[%s5399_s4 + $0x18] sm:$0xff]  ;;  %v3105_v56 = vpop.eup %3104 }
 0x175   :  { %5508 = vst [vmem:[#allocation23_spill] sm:$0xff] %v4353_v23  ;;  %v1065_v51 = vmul.f32 %v4353_v23, %v4353_v23  ;;  %v4380_v30 = vmul.f32 %v791_v49, %v715_v27  ;;  %5512 = vst [vmem:[#allocation26_spill] sm:$0xff] %v4387_v59  ;;  %v1130_v26 = vmul.f32 0.044715, %v1098_v16  ;;  %v1069_v46 = vmul.f32 %v4373_v10, %v4373_v10  ;;  %v4394_v25 = vpop.eup %3106  ;;  %v4403_v27 = vld [vmem:[%s5399_s4 + $0x20] sm:$0xff] }
 0x176   :  { %5507 = vst [vmem:[#allocation22_spill] sm:$0xff] %v4350_v0  ;;  %v1081_v11 = vmul.f32 %v4350_v0, %v4350_v0  ;;  %v1146_v50 = vmul.f32 0.044715, %v1114_v4  ;;  %v4389_v36 = vadd.f32 %v1019_v52, %v892_v12  ;;  %v1198_v15 = vmul.f32 0.7978846, %v1166_v29  ;;  %5513 = vst [vmem:[#allocation10_spill] sm:$0xff] %v4403_v27  ;;  %v4405_v4 = vpop.eup %3108  ;;  %1406 = vperm.xlu0 %2997, %v4387_v59  }
 0x177   :  { %v1097_v48 = vmul.f32 %v1065_v51, %v4353_v23  ;;  %v1162_v12 = vadd.f32 %v1130_v26, %v4331_v55  ;;  %v4413_v52 = vpop.eup %3110  ;;  %v1054_v39 = vmul.f32 %v4106_v38, %v4106_v38  ;;  %1411 = vperm.xlu1 %2998, %v4403_v27   ;;  %v1085_v8 = vmul.f32 %v1053_v43, %v4103_v47  ;;  %v1015_v27 = vpop.permute.xlu1 %1014 }
 0x178   :  { %v1113_v49 = vmul.f32 %v1081_v11, %v4350_v0  ;;  %v1178_v16 = vadd.f32 %v1146_v50, %v4328_v21  ;;  %v1084_v31 = vmul.f32 %v4389_v36, %v4389_v36  ;;  %v1101_v11 = vmul.f32 %v1069_v46, %v4373_v10  ;;  %v4420_v50 = vld [vmem:[%s5399_s4 + $0x28] sm:$0xff]  ;;  %v4422_v26 = vpop.eup %3112 }
 0x179   :  { %v1129_v29 = vmul.f32 0.044715, %v1097_v48  ;;  %3120 = vtanh.f32 %v1198_v15  ;;  %5514 = vst [vmem:[#allocation15_spill] sm:$0xff] %v4420_v50  ;;  %v1194_v21 = vmul.f32 0.7978846, %v1162_v12  ;;  %v1086_v63 = vmul.f32 %v1054_v39, %v4106_v38  ;;  %v4446_v39 = vld [vmem:[%s5399_s4 + $0x38] sm:$0xff] }
 0x17a   :  { %v1145_v51 = vmul.f32 0.044715, %v1113_v49  ;;  %v1210_v55 = vmul.f32 0.7978846, %v1178_v16  ;;  %v1116_v46 = vmul.f32 %v1084_v31, %v4389_v36  ;;  %v1133_v59 = vmul.f32 0.044715, %v1101_v11  ;;  %v4426_v49 = vpop.eup %3114  ;;  %1416 = vperm.xlu0 %2997, %v4420_v50  }
 0x17b   :  { %v1161_v15 = vadd.f32 %v1129_v29, %v4353_v23  ;;  %v4435_v16 = vld [vmem:[%s5399_s4 + $0x30] sm:$0xff]  ;;  %v4437_v12 = vpop.eup %3116  ;;  %v1264_v54 = vadd.f32 1.0, %v3105_v56 }
 0x17c   :  { %v1177_v48 = vadd.f32 %v1145_v51, %v4350_v0  ;;  %3122 = vtanh.f32 %v1210_v55  ;;  %v1148_v31 = vmul.f32 0.044715, %v1116_v46  ;;  %v1165_v11 = vadd.f32 %v1133_v59, %v4373_v10  ;;  %v4448_v43 = vpop.eup %3118  ;;  %1421 = vperm.xlu1 %2998, %v4435_v16  }
 0x17d   :  { %v1071_v51 = vmul.f32 %v4130_v35, %v4130_v35  ;;  %5515 = vst [vmem:[#allocation21_spill] sm:$0xff] %v4448_v43  ;;  %v1193_v23 = vmul.f32 0.7978846, %v1161_v15  ;;  %3124 = vtanh.f32 %v1194_v21  ;;  %v1117_v55 = vmul.f32 0.044715, %v1085_v8  ;;  %v4463_v8 = vld [vmem:[%s5399_s4 + $0x40] sm:$0xff] }
 0x17e   :  { %v1209_v29 = vmul.f32 0.7978846, %v1177_v48  ;;  %v4451_v46 = vadd.f32 %v1148_v31, %v4389_v36  ;;  %v1197_v59 = vmul.f32 0.7978846, %v1165_v11  ;;  %v1118_v0 = vmul.f32 0.044715, %v1086_v63  ;;  %1426 = vperm.xlu0 %2997, %v4446_v39  }
 0x17f   :  { %v1103_v45 = vmul.f32 %v1071_v51, %v4130_v35  ;;  %v1149_v50 = vadd.f32 %v1117_v55, %v4103_v47  ;;  %v5517_v43 = vsub.f32 %v5516_v33, %v3965_v17  ;;  %5518 = vst [vmem:[#allocation5_spill] sm:$0xff] %v4463_v8  ;;  %v1247_v15 = vadd.f32 1.0, %v4291_v2  ;;  %v5519_v11 = vld [vmem:[#allocation30_spill] sm:$0xff]  ;;  %v951_v51 = vpop.permute.xlu1 %950 }
 0x180   :  { %3126 = vtanh.f32 %v1209_v29  ;;  %v1150_v63 = vadd.f32 %v1118_v0, %v4106_v38  ;;  %v1296_v31 = vmul.f32 0.5, %v1264_v54  ;;  %v1248_v0 = vadd.f32 1.0, %v4296_v5  ;;  %1431 = vperm.xlu1 %2998, %v4463_v8   ;;  %v4487_v29 = vld [vmem:[%s5399_s4 + $0x50] sm:$0xff] }
 0x181   :  { %v731_v48 = vmul.f32 %v4040_v6, %v5517_v43  ;;  %3128 = vtanh.f32 %v1193_v23  ;;  %v1135_v21 = vmul.f32 0.044715, %v1103_v45  ;;  %v1181_v56 = vmul.f32 0.7978846, %v1149_v50  ;;  %v4472_v6 = vld [vmem:[%s5399_s4 + $0x48] sm:$0xff] }
 0x182   :  { %3130 = vtanh.f32 %v1197_v59  ;;  %v1182_v33 = vmul.f32 0.7978846, %v1150_v63  ;;  %v1279_v45 = vmul.f32 0.5, %v1247_v15  ;;  %v4478_v54 = vmul.f32 %v1296_v31, %v4232_v62  ;;  %1436 = vperm.xlu0 %2997, %v4472_v6  }
 0x183   :  { %v891_v17 = vmul.f32 %v5519_v11, %v731_v48  ;;  %v1167_v23 = vadd.f32 %v1135_v21, %v4130_v35  ;;  %v3121_v2 = vpop.eup %3120  ;;  %3132 = vtanh.f32 %v1181_v56  ;;  %v1073_v43 = vmul.f32 %v4133_v22, %v4133_v22  ;;  %v4500_v21 = vld [vmem:[%s5399_s4 + $0x58] sm:$0xff] }
 0x184   :  { %v1262_v5 = vadd.f32 1.0, %v3121_v2  ;;  %3134 = vtanh.f32 %v1182_v33  ;;  %v1280_v59 = vmul.f32 0.5, %v1248_v0  ;;  %v1266_v63 = vadd.f32 1.0, %v4413_v52  ;;  %5520 = vst [vmem:[#allocation9_spill] sm:$0xff] %v4500_v21  ;;  %1441 = vperm.xlu1 %2998, %v4487_v29   ;;  %v4518_v0 = vld [vmem:[%s5399_s4 + $0x60] sm:$0xff]  ;;  %v955_v2 = vpop.permute.xlu1 %954 }
 0x185   :  { %v4480_v50 = vadd.f32 %v1015_v27, %v891_v17  ;;  %v1199_v55 = vmul.f32 0.7978846, %v1167_v23  ;;  %v4493_v27 = vmul.f32 %v1279_v45, %v4109_v20  ;;  %v1105_v48 = vmul.f32 %v1073_v43, %v4133_v22  ;;  %5521 = vst [vmem:[#allocation13_spill] sm:$0xff] %v4518_v0 }
 0x186   :  { %v4502_v15 = vpop.eup %3122  ;;  %v1294_v56 = vmul.f32 0.5, %v1262_v5  ;;  %v4505_v31 = vmul.f32 %v1280_v59, %v4114_v60  ;;  %v4508_v11 = vadd.f32 %v951_v51, %v4380_v30  ;;  %v1298_v33 = vmul.f32 0.5, %v1266_v63  ;;  %1446 = vperm.xlu0 %2997, %v4500_v21   ;;  %v4538_v59 = vld [vmem:[%s5399_s4 + $0x68] sm:$0xff] }
 0x187   :  { %v1083_v62 = vmul.f32 %v4480_v50, %v4480_v50  ;;  %3136 = vtanh.f32 %v1199_v55  ;;  %v4511_v20 = vpop.eup %3124  ;;  %v1137_v17 = vmul.f32 0.044715, %v1105_v48  ;;  %v1249_v23 = vadd.f32 1.0, %v4299_v57 }
 0x188   :  { %v4521_v60 = vmul.f32 %v1294_v56, %v4191_v14  ;;  %v1067_v45 = vmul.f32 %v4508_v11, %v4508_v11  ;;  %v1250_v51 = vadd.f32 1.0, %v4304_v28  ;;  %v4533_v55 = vmul.f32 %v1298_v33, %v4254_v37  ;;  %1451 = vperm.xlu1 %2998, %v4518_v0  }
 0x189   :  { %v1115_v52 = vmul.f32 %v1083_v62, %v4480_v50  ;;  %v1169_v5 = vadd.f32 %v1137_v17, %v4133_v22  ;;  %v1281_v14 = vmul.f32 0.5, %v1249_v23  ;;  %v1267_v63 = vadd.f32 1.0, %v4317_v42  ;;  %v5522_v23 = vld [vmem:[#allocation31_spill] sm:$0xff] }
 0x18a   :  { %v4529_v57 = vpop.eup %3126  ;;  %v1099_v28 = vmul.f32 %v1067_v45, %v4508_v11  ;;  %v1282_v48 = vmul.f32 0.5, %v1250_v51  ;;  %v1268_v56 = vadd.f32 1.0, %v4422_v26  ;;  %v4551_v30 = vadd.f32 %v955_v2, %v5522_v23  ;;  %v4556_v45 = vld [vmem:[%s5399_s4 + $0x70] sm:$0xff]  ;;  %1456 = vperm.xlu0 %2997, %v4538_v59  }
 0x18b   :  { %v1147_v43 = vmul.f32 0.044715, %v1115_v52  ;;  %v4540_v62 = vpop.eup %3128  ;;  %v1201_v17 = vmul.f32 0.7978846, %v1169_v5  ;;  %v4548_v33 = vmul.f32 %v1281_v14, %v4117_v32  ;;  %v1299_v0 = vmul.f32 0.5, %v1267_v63  ;;  %v4567_v14 = vld [vmem:[%s5399_s4 + $0x78] sm:$0xff] }
 0x18c   :  { %v3131_v52 = vpop.eup %3130  ;;  %v1131_v51 = vmul.f32 0.044715, %v1099_v28  ;;  %v4559_v26 = vmul.f32 %v1282_v48, %v4120_v58  ;;  %v1300_v32 = vmul.f32 0.5, %v1268_v56  ;;  %v1068_v2 = vmul.f32 %v4551_v30, %v4551_v30  ;;  %1461 = vperm.xlu1 %2998, %v4556_v45  }
 0x18d   :  { %v1179_v37 = vadd.f32 %v1147_v43, %v4480_v50  ;;  %v1261_v42 = vadd.f32 1.0, %v3131_v52  ;;  %v3133_v43 = vpop.eup %3132  ;;  %3138 = vtanh.f32 %v1201_v17  ;;  %v4574_v56 = vmul.f32 %v1299_v0, %v4136_v18 }
 0x18e   :  { %v3135_v52 = vpop.eup %3134  ;;  %v1245_v23 = vadd.f32 1.0, %v3133_v43  ;;  %v1163_v58 = vadd.f32 %v1131_v51, %v4508_v11  ;;  %v1100_v51 = vmul.f32 %v1068_v2, %v4551_v30  ;;  %1466 = vperm.xlu0 %2997, %v4567_v14   ;;  %v1251_v18 = vadd.f32 1.0, %v4311_v7 }
 0x18f   :  { %v1211_v5 = vmul.f32 0.7978846, %v1179_v37  ;;  %v1293_v28 = vmul.f32 0.5, %v1261_v42  ;;  %v1246_v63 = vadd.f32 1.0, %v3135_v52  ;;  %v4577_v37 = vmul.f32 %v1300_v32, %v4256_v3 }
 0x190   :  { %v1277_v42 = vmul.f32 0.5, %v1245_v23  ;;  %v1195_v43 = vmul.f32 0.7978846, %v1163_v58  ;;  %v1132_v32 = vmul.f32 0.044715, %v1100_v51  ;;  %v1283_v23 = vmul.f32 0.5, %v1251_v18 }
 0x191   :  { %3140 = vtanh.f32 %v1211_v5  ;;  %v3137_v17 = vpop.eup %3136  ;;  %v1325_v21 = vmul.f32 %v1293_v28, %v4373_v10  ;;  %v1278_v48 = vmul.f32 0.5, %v1246_v63  ;;  %v1368_v5 = vpack.c.bf16 %v4577_v37, %v4574_v56 }
 0x192   :  { %v1263_v8 = vadd.f32 1.0, %v3137_v17  ;;  %v1309_v3 = vmul.f32 %v1277_v42, %v4103_v47  ;;  %3142 = vtanh.f32 %v1195_v43  ;;  %v5523_v10 = vmov 1  }
 0x193   :  { %v1365_v0 = vpack.c.bf16 %v4521_v60, %v1325_v21  ;;  %2999 = vset.pattern.permute.xlu1 %v5523_v10  ;;  %v1310_v52 = vmul.f32 %v1278_v48, %v4106_v38  ;;  %v1252_v28 = vadd.f32 1.0, %v4313_v53  ;;  %v1164_v58 = vadd.f32 %v1132_v32, %v4551_v30 }
 0x194   :  { %v1295_v2 = vmul.f32 0.5, %v1263_v8  ;;  %1743 = vperm.xlu1 %2999, %v4367_v40   ;;  %v1269_v7 = vadd.f32 1.0, %v4267_v41  ;;  %v1270_v21 = vadd.f32 1.0, %v4394_v25  ;;  %v1253_v47 = vadd.f32 1.0, %v4260_v1 }
 0x195   :  { %2795 = vmatprep.subr.bf16.mxu1 %v1365_v0  ;;  %v5524_v60 = vmov 2   ;;  %v1357_v63 = vpack.c.bf16 %v1310_v52, %v1309_v3  ;;  %v1284_v8 = vmul.f32 0.5, %v1252_v28  ;;  %v4598_v53 = vmul.f32 %v1283_v23, %v4123_v24 }
 0x196   :  { %3002 = vset.pattern.permute.xlu0 %v5524_v60  ;;  %v1327_v38 = vmul.f32 %v1295_v2, %v4130_v35  ;;  %v1196_v48 = vmul.f32 0.7978846, %v1164_v58  ;;  %v1301_v17 = vmul.f32 0.5, %v1269_v7  ;;  %v1302_v42 = vmul.f32 0.5, %v1270_v21  ;;  %v5527_v58 = vld [vmem:[#allocation21_spill] sm:$0xff] }
 0x197   :  { %1831 = vperm.xlu0 %3002, %v4362_v13   ;;  %v1254_v41 = vadd.f32 1.0, %v4274_v44  ;;  %v3139_v43 = vpop.eup %3138  ;;  %2796 = vmatpush3.bf16.msra.mxu1 %v1357_v63  ;;  %v4604_v25 = vmul.f32 %v1284_v8, %v4127_v19  ;;  %v1285_v51 = vmul.f32 0.5, %v1253_v47  ;;  %v1271_v35 = vadd.f32 1.0, %v4426_v49  ;;  %v5528_v47 = vld [vmem:[#allocation7_spill] sm:$0xff] }
 0x198   :  { %v1366_v1 = vpack.c.bf16 %v4478_v54, %v1327_v38  ;;  %3000 = vset.pattern.permute.xlu1 %v5524_v60  ;;  %v1265_v24 = vadd.f32 1.0, %v3139_v43  ;;  %3144 = vtanh.f32 %v1196_v48  ;;  %v1333_v18 = vmul.f32 %v1301_v17, %v4148_v61 }
 0x199   :  { %v1334_v0 = vmul.f32 %v1302_v42, %v4239_v34  ;;  %1823 = vperm.xlu1 %3000, %v4367_v40   ;;  %v1360_v54 = vpack.c.bf16 %v4604_v25, %v4598_v53  ;;  %v1286_v19 = vmul.f32 0.5, %v1254_v41  ;;  %v1317_v3 = vmul.f32 %v1285_v51, %v4139_v9  ;;  %v5526_v40 = vld [vmem:[#allocation16_spill] sm:$0xff]  ;;  %v5532_v25 = vld [vmem:[#allocation11_spill] sm:$0xff] }
 0x19a   :  { %2797 = vmatprep.subr.bf16.mxu1 %v1366_v1  ;;  %v1272_v49 = vadd.f32 1.0, %v4437_v12  ;;  %v1297_v32 = vmul.f32 0.5, %v1265_v24  ;;  %v1303_v2 = vmul.f32 0.5, %v1271_v35  ;;  %v1255_v61 = vadd.f32 1.0, %v4405_v4  ;;  %v5529_v4 = vld [vmem:[#allocation18_spill] sm:$0xff] }
 0x19b   :  { %v3141_v44 = vpop.eup %3140  ;;  %1847 = vperm.xlu0 %3002, %v4435_v16   ;;  %v1369_v52 = vpack.c.bf16 %v1334_v0, %v1333_v18  ;;  %v5525_v34 = vpack.c.bf16 %v4505_v31, %v4493_v27  ;;  %v1318_v28 = vmul.f32 %v1286_v19, %v5526_v40  ;;  %v1256_v7 = vadd.f32 1.0, %v5527_v58  ;;  %v5530_v27 = vld [vmem:[#allocation8_spill] sm:$0xff]  ;;  %v5538_v40 = vld [vmem:[#allocation17_spill] sm:$0xff] }
 0x19c   :  { %v1304_v23 = vmul.f32 0.5, %v1272_v49  ;;  %v1273_v9 = vadd.f32 1.0, %v4529_v57  ;;  %v3143_v21 = vpop.eup %3142  ;;  %v1329_v12 = vmul.f32 %v1297_v32, %v4133_v22  ;;  %v1335_v63 = vmul.f32 %v1303_v2, %v5528_v47  ;;  %v5531_v57 = vld [vmem:[#allocation20_spill] sm:$0xff]  ;;  %v5536_v2 = vld [vmem:[#allocation26_spill] sm:$0xff] }
 0x19d   :  { %2798 = vmatpush3.bf16.msra.mxu1 %v5525_v34  ;;  %v1287_v38 = vmul.f32 0.5, %v1255_v61  ;;  %v1274_v8 = vadd.f32 1.0, %v4502_v15  ;;  %1827 = vperm.xlu1 %3000, %v5529_v4   ;;  %v1361_v53 = vpack.c.bf16 %v1318_v28, %v1317_v3  ;;  %v1288_v48 = vmul.f32 0.5, %v1256_v7  ;;  %v5533_v15 = vld [vmem:[#allocation22_spill] sm:$0xff]  ;;  %v5534_v18 = vld [vmem:[#allocation12_spill] sm:$0xff] }
 0x19e   :  { %v1336_v31 = vmul.f32 %v1304_v23, %v5530_v27  ;;  %v1305_v17 = vmul.f32 0.5, %v1273_v9  ;;  %v1367_v42 = vpack.c.bf16 %v4533_v55, %v1329_v12  ;;  %v1257_v22 = vadd.f32 1.0, %v4540_v62  ;;  %v5539_v9 = vld [vmem:[#allocation10_spill] sm:$0xff]  ;;  %v3050_v47 = vld [vmem:[%s5398_s3] ss:$8 sps:$4 sm:$0xff]  }
 0x19f   :  { %1863 = vperm.xlu0 %3002, %v4487_v29   ;;  %v1319_v41 = vmul.f32 %v1287_v38, %v5531_v57  ;;  %v1306_v43 = vmul.f32 0.5, %v1274_v8  ;;  %v1320_v51 = vmul.f32 %v1288_v48, %v5532_v25  ;;  %v1258_v24 = vadd.f32 1.0, %v4511_v20  ;;  %v3062_v8 = vld [vmem:[%s5398_s3 + $0x44] ss:$8 sps:$4 sm:$0xff]   ;;  %v3073_v57 = vld [vmem:[%s5398_s3 + $0x70] ss:$8 sps:$4 sm:$0xff]  }
 0x1a0   :  { %v1370_v1 = vpack.c.bf16 %v1336_v31, %v1335_v63  ;;  %v1337_v35 = vmul.f32 %v1305_v17, %v5533_v15  ;;  %2799 = vmatprep.subr.bf16.mxu1 %v1367_v42  ;;  %v1289_v19 = vmul.f32 0.5, %v1257_v22  ;;  %v1212_v3 = vmul.f32 0.7978846, %v4451_v46  ;;  %v5537_v46 = vld [vmem:[#allocation23_spill] sm:$0xff]  ;;  %v3058_v63 = vld [vmem:[%s5398_s3 + $0x20] ss:$8 sps:$4 sm:$0xff]  }
 0x1a1   :  { %v1338_v0 = vmul.f32 %v1306_v43, %v5534_v18  ;;  %3001 = vset.pattern.permute.xlu1 %v5523_v10  ;;  %v5535_v55 = vpack.c.bf16 %v4559_v26, %v4548_v33  ;;  %v1362_v62 = vpack.c.bf16 %v1320_v51, %v1319_v41  ;;  %v1290_v49 = vmul.f32 0.5, %v1258_v24  ;;  %v5544_v27 = vld [vmem:[#allocation13_spill] sm:$0xff]  ;;  %v3067_v31 = vld [vmem:[%s5398_s3 + $0x50] ss:$8 sps:$4 sm:$0xff]   ;;  %v3071_v42 = vld [vmem:[%s5398_s3 + $0x74] ss:$8 sps:$4 sm:$0xff]  }
 0x1a2   :  { %v1259_v32 = vadd.f32 1.0, %v3143_v21  ;;  %1755 = vperm.xlu1 %3001, %v5536_v2   ;;  %v3145_v61 = vpop.eup %3144  ;;  %3146 = vtanh.f32 %v1212_v3  ;;  %v1321_v34 = vmul.f32 %v1289_v19, %v5537_v46  ;;  %v1275_v56 = vadd.f32 1.0, %v3141_v44  ;;  %v5540_v21 = vld [vmem:[#allocation15_spill] sm:$0xff]  ;;  %v3068_v48 = vld [vmem:[%s5398_s3 + $0x64] ss:$8 sps:$4 sm:$0xff]  }
 0x1a3   :  { %2800 = vmatpush3.bf16.msra.mxu1 %v5535_v55  ;;  %v1371_v20 = vpack.c.bf16 %v1338_v0, %v1337_v35  ;;  %3011 = vset.pattern.permute.xlu0 %v5523_v10  ;;  %v1322_v28 = vmul.f32 %v1290_v49, %v5538_v40  ;;  %v1260_v33 = vadd.f32 1.0, %v3145_v61  ;;  %v5542_v38 = vmov 0   ;;  %v3070_v17 = vld [vmem:[%s5398_s3 + $0x60] ss:$8 sps:$4 sm:$0xff]  }
 0x1a4   :  { %2801 = vmatprep.subr.bf16.mxu1 %v1368_v5  ;;  %v1291_v26 = vmul.f32 0.5, %v1259_v32  ;;  %1747 = vperm.xlu0 %3011, %v5529_v4   ;;  %v5543_v4 = vld [vmem:[#allocation9_spill] sm:$0xff] }
 0x1a5   :  { %v1363_v23 = vpack.c.bf16 %v1322_v28, %v1321_v34  ;;  %v1292_v58 = vmul.f32 0.5, %v1260_v33 }
 0x1a6   :  { %3003 = vset.pattern.permute.xlu1 %v5524_v60  ;;  %v1323_v37 = vmul.f32 %v1291_v26, %v4508_v11 }
 0x1a7   :  { %2802 = vmatpush3.bf16.msra.mxu1 %v1360_v54  ;;  %1835 = vperm.xlu1 %3003, %v5536_v2   ;;  %v1324_v5 = vmul.f32 %v1292_v58, %v4551_v30  ;;  %v1307_v54 = vmul.f32 0.5, %v1275_v56 }
 0x1a8   :  { %2803 = vmatprep.subr.bf16.mxu1 %v1369_v52  ;;  %1751 = vperm.xlu0 %3011, %v4362_v13  }
 0x1a9   :  { %v1364_v7 = vpack.c.bf16 %v1324_v5, %v1323_v37  ;;  %v1339_v11 = vmul.f32 %v1307_v54, %v4480_v50  ;;  %v3056_v50 = vld [vmem:[%s5398_s3 + $0x24] ss:$8 sps:$4 sm:$0xff]  }
 0x1ab   :  { %2804 = vmatpush3.bf16.msra.mxu1 %v1361_v53  ;;  %3004 = vset.pattern.permute.xlu1 %v5523_v10  ;;  %v3064_v53 = vld [vmem:[%s5398_s3 + $0x40] ss:$8 sps:$4 sm:$0xff]  }
 0x1ac   :  { %2805 = vmatprep.subr.bf16.mxu1 %v1370_v1  ;;  %1759 = vperm.xlu1 %3004, %v5539_v9   ;;  %v3147_v52 = vpop.eup %3146 }
 0x1ad   :  { %1763 = vperm.xlu0 %3011, %v5540_v21   ;;  %v1276_v12 = vadd.f32 1.0, %v3147_v52 }
 0x1af   :  { %2806 = vmatpush3.bf16.msra.mxu1 %v1362_v62  ;;  %v1308_v44 = vmul.f32 0.5, %v1276_v12 }
 0x1b0   :  { %2807 = vmatprep.subr.bf16.mxu1 %v1371_v20  ;;  %3005 = vset.pattern.permute.xlu1 %v5524_v60 }
 0x1b1   :  { %1767 = vperm.xlu0 %3011, %v4435_v16   ;;  %1839 = vperm.xlu1 %3005, %v5539_v9   ;;  %v1340_v13 = vmul.f32 %v1308_v44, %v4389_v36  ;;  %v3053_v16 = vld [vmem:[%s5398_s3 + $0x14] ss:$8 sps:$4 sm:$0xff]   ;;  %v3055_v36 = vld [vmem:[%s5398_s3 + $0x10] ss:$8 sps:$4 sm:$0xff]  }
 0x1b3   :  { %2808 = vmatpush3.bf16.msra.mxu1 %v1363_v23  ;;  %v1372_v30 = vpack.c.bf16 %v1340_v13, %v1339_v11 }
 0x1b5   :  { %1779 = vperm.xlu0 %3011, %v4472_v6   ;;  %1843 = vperm.xlu1 %3005, %v5540_v21  }
 0x1b6   :  { %2809 = vmatprep.subr.bf16.mxu1 %v1372_v30 }
 0x1b7   :  { %2810 = vmatpush3.bf16.msra.mxu1 %v1364_v7 }
 0x1b9   :  { %1783 = vperm.xlu0 %3011, %v4487_v29   ;;  %3006 = vset.pattern.permute.xlu1 %v5523_v10  ;;  %v5541_v29 = vld [vmem:[#allocation5_spill] sm:$0xff] }
 0x1ba   :  { %1582 = vmatmul.mubr.bf16.vlgmr.msra.gmra.mrb[0].mxu1 %v3050_v47  ;;  %1771 = vperm.xlu1 %3006, %v4446_v39  }
 0x1bb   :  { %1589 = vmatprep.mubr.bf16.mxu1 %v3053_v16 }
 0x1bd   :  { %1795 = vperm.xlu0 %3011, %v4538_v59  }
 0x1be   :  { %3007 = vset.pattern.permute.xlu1 %v5524_v60 }
 0x1bf   :  { %1851 = vperm.xlu1 %3007, %v4446_v39   ;;  %v3059_v39 = vld [vmem:[%s5398_s3 + $0x34] ss:$8 sps:$4 sm:$0xff]  }
 0x1c1   :  { %1799 = vperm.xlu0 %3011, %v4556_v45  }
 0x1c2   :  { %1590 = vmatmul.mubr.bf16.gmra.mrb[4].mxu1 %v3055_v36 }
 0x1c3   :  { %1597 = vmatprep.mubr.bf16.mxu1 %v3056_v50  ;;  %3008 = vset.pattern.permute.xlu1 %v5523_v10 }
 0x1c4   :  { %1775 = vperm.xlu1 %3008, %v5541_v29  }
 0x1c5   :  { %3016 = vset.pattern.permute.xlu0 %v5524_v60 }
 0x1c6   :  { %1879 = vperm.xlu0 %3016, %v4556_v45   ;;  %v3061_v45 = vld [vmem:[%s5398_s3 + $0x30] ss:$8 sps:$4 sm:$0xff]  }
 0x1c8   :  { %3009 = vset.pattern.permute.xlu1 %v5524_v60 }
 0x1c9   :  { %1855 = vperm.xlu1 %3009, %v5541_v29  }
 0x1ca   :  { %3019 = vset.pattern.permute.xlu0 %v5542_v38  ;;  %1598 = vmatmul.mubr.bf16.gmra.mrb[8].mxu1 %v3058_v63 }
 0x1cb   :  { %1605 = vmatprep.mubr.bf16.mxu1 %v3059_v39 }
 0x1cd   :  { %1859 = vperm.xlu1 %3009, %v4472_v6   ;;  %v3065_v6 = vld [vmem:[%s5398_s3 + $0x54] ss:$8 sps:$4 sm:$0xff]  }
 0x1d1   :  { %3010 = vset.pattern.permute.xlu1 %v5523_v10 }
 0x1d2   :  { %1606 = vmatmul.mubr.bf16.gmra.mrb[12].mxu1 %v3061_v45  ;;  %1787 = vperm.xlu1 %3010, %v5543_v4  }
 0x1d3   :  { %1613 = vmatprep.mubr.bf16.mxu1 %v3062_v8 }
 0x1d6   :  { %3012 = vset.pattern.permute.xlu1 %v5524_v60 }
 0x1d7   :  { %1867 = vperm.xlu1 %3012, %v5543_v4  }
 0x1da   :  { %1614 = vmatmul.mubr.bf16.gmra.mrb[16].mxu1 %v3064_v53 }
 0x1db   :  { %1621 = vmatprep.mubr.bf16.mxu1 %v3065_v6  ;;  %3013 = vset.pattern.permute.xlu1 %v5523_v10 }
 0x1dc   :  { %1791 = vperm.xlu1 %3013, %v5544_v27  }
 0x1e0   :  { %3014 = vset.pattern.permute.xlu1 %v5524_v60 }
 0x1e1   :  { %1871 = vperm.xlu1 %3014, %v5544_v27  }
 0x1e2   :  { %1622 = vmatmul.mubr.bf16.gmra.mrb[20].mxu1 %v3067_v31 }
 0x1e3   :  { %1629 = vmatprep.mubr.bf16.mxu1 %v3068_v48 }
 0x1e5   :  { %1875 = vperm.xlu1 %3014, %v4538_v59  }
 0x1e9   :  { %3015 = vset.pattern.permute.xlu1 %v5523_v10 }
 0x1ea   :  { %1630 = vmatmul.mubr.bf16.gmra.mrb[24].mxu1 %v3070_v17  ;;  %1803 = vperm.xlu1 %3015, %v4567_v14  }
 0x1eb   :  { %1637 = vmatprep.mubr.bf16.mxu1 %v3071_v42 }
 0x1ed   :  { %v1397_v59 = vpop.permute.xlu1 %1396 }
 0x1ee   :  { %3017 = vset.pattern.permute.xlu1 %v5524_v60 }
 0x1ef   :  { %1883 = vperm.xlu1 %3017, %v4567_v14  }
 0x1f1   :  { %v1402_v41 = vpop.permute.xlu1 %1401  ;;  %v1392_v18 = vpop.permute.xlu0 %1391 }
 0x1f2   :  { %1638 = vmatmul.mubr.bf16.gmra.mrb[28].mxu1 %v3073_v57 }
 0x1f3   :  { %3018 = vset.pattern.permute.xlu1 %v5542_v38 }
 0x1f5   :  { %v1407_v34 = vpop.permute.xlu0 %1406 }
 0x1f6   :  { %v1412_v43 = vpop.permute.xlu1 %1411 }
 0x1f9   :  { %v1417_v9 = vpop.permute.xlu0 %1416 }
 0x1fb   :  { %v1422_v22 = vpop.permute.xlu1 %1421 }
 0x1fd   :  { %v1427_v63 = vpop.permute.xlu0 %1426 }
 0x1ff   :  { %v4738_v1 = vpop.permute.xlu1 %1431 }
 0x203   :  { %v4740_v25 = vpop.permute.xlu1 %1441 }
 0x207   :  { %v4742_v51 = vpop.permute.xlu1 %1451 }
 0x20b   :  { %v4744_v15 = vpop.permute.xlu1 %1461 }
 0x213   :  { %v4746_v19 = vpop.permute.xlu1 %1743 }
 0x218   :  { %v4758_v46 = vpop.permute.xlu1 %1823 }
 0x21c   :  { %v4767_v54 = vpop.permute.xlu1 %1827 }
 0x221   :  { %v4774_v29 = vpop.permute.xlu1 %1755 }
 0x226   :  { %v4784_v57 = vpop.permute.xlu1 %1835 }
 0x28d   :  { %v2811_v35 = vpop.f32.mrb[0].mxu1 }
 0x28e   :  { %v2812_v24 = vpop.f32.mrb[1].mxu1 }
 0x28f   :  { %v2813_v0 = vadd.f32 %v2812_v24, %v2811_v35  ;;  %v2814_v14 = vpop.f32.mrb[2].mxu1 }
 0x290   :  { %v2815_v3 = vpop.f32.mrb[3].mxu1 }
 0x291   :  { %v4748_v55 = vadd.f32 %v2813_v0, %v1392_v18  ;;  %v2816_v62 = vadd.f32 %v2815_v3, %v2814_v14 }
 0x293   :  { %v4750_v49 = vadd.f32 %v2816_v62, %v1397_v59  ;;  %v1667_v32 = vmul.f32 %v4748_v55, %v4748_v55  ;;  %v1437_v59 = vpop.permute.xlu0 %1436 }
 0x295   :  { %v1646_v2 = vadd.f32 %v4750_v49, %v4748_v55  ;;  %v1668_v61 = vmul.f32 %v4750_v49, %v4750_v49  ;;  %v2817_v20 = vpop.f32.mrb[4].mxu1 }
 0x296   :  { %v2818_v40 = vpop.f32.mrb[5].mxu1 }
 0x297   :  { %v1683_v28 = vadd.f32 %v1668_v61, %v1667_v32  ;;  %v2819_v33 = vadd.f32 %v2818_v40, %v2817_v20  ;;  %v2820_v26 = vpop.f32.mrb[6].mxu1  ;;  %v1447_v61 = vpop.permute.xlu0 %1446 }
 0x298   :  { %v2821_v23 = vpop.f32.mrb[7].mxu1 }
 0x299   :  { %v4760_v58 = vadd.f32 %v2819_v33, %v1402_v41  ;;  %v2822_v56 = vadd.f32 %v2821_v23, %v2820_v26 }
 0x29b   :  { %v1647_v37 = vadd.f32 %v1646_v2, %v4760_v58  ;;  %v1669_v5 = vmul.f32 %v4760_v58, %v4760_v58  ;;  %v4765_v7 = vadd.f32 %v2822_v56, %v1407_v34  ;;  %v4796_v2 = vpop.permute.xlu1 %1759 }
 0x29d   :  { %v1684_v21 = vadd.f32 %v1683_v28, %v1669_v5  ;;  %v1648_v52 = vadd.f32 %v1647_v37, %v4765_v7  ;;  %v1670_v12 = vmul.f32 %v4765_v7, %v4765_v7  ;;  %v2823_v44 = vpop.f32.mrb[8].mxu1 }
 0x29e   :  { %v2824_v11 = vpop.f32.mrb[9].mxu1 }
 0x29f   :  { %v1685_v13 = vadd.f32 %v1684_v21, %v1670_v12  ;;  %v2825_v30 = vadd.f32 %v2824_v11, %v2823_v44  ;;  %v2826_v47 = vpop.f32.mrb[10].mxu1  ;;  %v4806_v5 = vpop.permute.xlu1 %1839 }
 0x2a0   :  { %v2827_v16 = vpop.f32.mrb[11].mxu1 }
 0x2a1   :  { %v4772_v36 = vadd.f32 %v2825_v30, %v1412_v43  ;;  %v2828_v50 = vadd.f32 %v2827_v16, %v2826_v47 }
 0x2a3   :  { %v1649_v39 = vadd.f32 %v1648_v52, %v4772_v36  ;;  %v1671_v45 = vmul.f32 %v4772_v36, %v4772_v36  ;;  %v4779_v8 = vadd.f32 %v2828_v50, %v1417_v9  ;;  %v1457_v9 = vpop.permute.xlu0 %1456 }
 0x2a5   :  { %v1686_v4 = vadd.f32 %v1685_v13, %v1671_v45  ;;  %v1650_v53 = vadd.f32 %v1649_v39, %v4779_v8  ;;  %v1672_v6 = vmul.f32 %v4779_v8, %v4779_v8  ;;  %v2829_v27 = vpop.f32.mrb[12].mxu1 }
 0x2a6   :  { %v2830_v31 = vpop.f32.mrb[13].mxu1 }
 0x2a7   :  { %v1687_v48 = vadd.f32 %v1686_v4, %v1672_v6  ;;  %v2831_v17 = vadd.f32 %v2830_v31, %v2829_v27  ;;  %v2832_v42 = vpop.f32.mrb[14].mxu1  ;;  %v1467_v39 = vpop.permute.xlu0 %1466 }
 0x2a8   :  { %v2833_v41 = vpop.f32.mrb[15].mxu1 }
 0x2a9   :  { %v4786_v43 = vadd.f32 %v2831_v17, %v1422_v22  ;;  %v2834_v35 = vadd.f32 %v2833_v41, %v2832_v42 }
 0x2ab   :  { %v1651_v24 = vadd.f32 %v1650_v53, %v4786_v43  ;;  %v1673_v18 = vmul.f32 %v4786_v43, %v4786_v43  ;;  %v4791_v0 = vadd.f32 %v2834_v35, %v1427_v63  ;;  %v4814_v63 = vpop.permute.xlu1 %1843  ;;  %v4824_v17 = vpop.permute.xlu0 %1831 }
 0x2ad   :  { %v1688_v14 = vadd.f32 %v1687_v48, %v1673_v18  ;;  %v1652_v3 = vadd.f32 %v1651_v24, %v4791_v0  ;;  %v1674_v62 = vmul.f32 %v4791_v0, %v4791_v0  ;;  %v2835_v32 = vpop.f32.mrb[16].mxu1 }
 0x2ae   :  { %v2836_v22 = vpop.f32.mrb[17].mxu1 }
 0x2af   :  { %v1689_v20 = vadd.f32 %v1688_v14, %v1674_v62  ;;  %v2837_v34 = vadd.f32 %v2836_v22, %v2835_v32  ;;  %v2838_v40 = vpop.f32.mrb[18].mxu1  ;;  %v4826_v35 = vpop.permute.xlu1 %1771 }
 0x2b0   :  { %v2839_v28 = vpop.f32.mrb[19].mxu1  ;;  %v4839_v22 = vpop.permute.xlu0 %1847 }
 0x2b1   :  { %v4799_v33 = vadd.f32 %v2837_v34, %v4738_v1  ;;  %v2840_v26 = vadd.f32 %v2839_v28, %v2838_v40 }
 0x2b3   :  { %v1653_v23 = vadd.f32 %v1652_v3, %v4799_v33  ;;  %v1675_v56 = vmul.f32 %v4799_v33, %v4799_v33  ;;  %v4804_v37 = vadd.f32 %v2840_v26, %v1437_v59  ;;  %v3074_v3 = vld [vmem:[%s5400_s5] sm:$0xff]   ;;  %v4844_v28 = vpop.permute.xlu1 %1851 }
 0x2b4   :  { %2934 = vmatprep.mubr.bf16.mxu0 %v3074_v3  ;;  %v4894_v3 = vld [vmem:[%s5401_s6 + $0x30] sm:$0xff] }
 0x2b5   :  { %v1690_v21 = vadd.f32 %v1689_v20, %v1675_v56  ;;  %v1654_v52 = vadd.f32 %v1653_v23, %v4804_v37  ;;  %v1676_v12 = vmul.f32 %v4804_v37, %v4804_v37  ;;  %v2841_v44 = vpop.f32.mrb[20].mxu1 }
 0x2b6   :  { %v2842_v1 = vpop.f32.mrb[21].mxu1 }
 0x2b7   :  { %v1691_v11 = vadd.f32 %v1690_v21, %v1676_v12  ;;  %v2843_v13 = vadd.f32 %v2842_v1, %v2841_v44  ;;  %v2844_v30 = vpop.f32.mrb[22].mxu1  ;;  %v4849_v44 = vpop.permute.xlu0 %1863 }
 0x2b8   :  { %v2845_v47 = vpop.f32.mrb[23].mxu1 }
 0x2b9   :  { %v4812_v16 = vadd.f32 %v2843_v13, %v4740_v25  ;;  %v2846_v50 = vadd.f32 %v2845_v47, %v2844_v30  ;;  %v4856_v30 = vpop.permute.xlu1 %1775 }
 0x2bb   :  { %v1655_v45 = vadd.f32 %v1654_v52, %v4812_v16  ;;  %v1677_v4 = vmul.f32 %v4812_v16, %v4812_v16  ;;  %v4819_v53 = vadd.f32 %v2846_v50, %v1447_v61 }
 0x2bd   :  { %v1692_v6 = vadd.f32 %v1691_v11, %v1677_v4  ;;  %v1656_v27 = vadd.f32 %v1655_v45, %v4819_v53  ;;  %v1678_v31 = vmul.f32 %v4819_v53, %v4819_v53  ;;  %v2847_v48 = vpop.f32.mrb[24].mxu1 }
 0x2be   :  { %v2848_v25 = vpop.f32.mrb[25].mxu1 }
 0x2bf   :  { %v1693_v42 = vadd.f32 %v1692_v6, %v1678_v31  ;;  %v2849_v59 = vadd.f32 %v2848_v25, %v2847_v48  ;;  %v2850_v41 = vpop.f32.mrb[26].mxu1  ;;  %v4875_v31 = vpop.permute.xlu0 %1747  ;;  %v4880_v48 = vld [vmem:[%s5401_s6 + $0x20] sm:$0xff] }
 0x2c0   :  { %v2851_v24 = vpop.f32.mrb[27].mxu1 }
 0x2c1   :  { %v4829_v18 = vadd.f32 %v2849_v59, %v4742_v51  ;;  %v2852_v14 = vadd.f32 %v2851_v24, %v2850_v41  ;;  %v4882_v59 = vpop.permute.xlu1 %1855 }
 0x2c3   :  { %v1657_v62 = vadd.f32 %v1656_v27, %v4829_v18  ;;  %v1679_v32 = vmul.f32 %v4829_v18, %v4829_v18  ;;  %v4837_v61 = vadd.f32 %v2852_v14, %v1457_v9  ;;  %v4873_v27 = vld [vmem:[%s5401_s6 + $0x10] sm:$0xff]  ;;  %v4888_v14 = vld [vmem:[%s5401_s6 + $0x18] sm:$0xff] }
 0x2c5   :  { %v1694_v20 = vadd.f32 %v1693_v42, %v1679_v32  ;;  %v1658_v34 = vadd.f32 %v1657_v62, %v4837_v61  ;;  %v1680_v51 = vmul.f32 %v4837_v61, %v4837_v61  ;;  %v2853_v40 = vpop.f32.mrb[28].mxu1 }
 0x2c6   :  { %v2854_v26 = vpop.f32.mrb[29].mxu1 }
 0x2c7   :  { %v1695_v23 = vadd.f32 %v1694_v20, %v1680_v51  ;;  %v2855_v56 = vadd.f32 %v2854_v26, %v2853_v40  ;;  %v2856_v21 = vpop.f32.mrb[30].mxu1  ;;  %v4896_v20 = vpop.permute.xlu0 %1751  ;;  %v4904_v26 = vld [vmem:[%s5401_s6 + $0x28] sm:$0xff] }
 0x2c8   :  { %v2857_v52 = vpop.f32.mrb[31].mxu1  ;;  %v4899_v40 = vpop.permute.xlu1 %1859 }
 0x2c9   :  { %v4847_v9 = vadd.f32 %v2855_v56, %v4744_v15  ;;  %v2858_v12 = vadd.f32 %v2857_v52, %v2856_v21  ;;  %v4864_v15 = vld [vmem:[%s5401_s6] sm:$0xff] }
 0x2ca   :  { %2072 = vperm.xlu1 %3018, %v4864_v15  }
 0x2cb   :  { %v1659_v1 = vadd.f32 %v1658_v34, %v4847_v9  ;;  %v1681_v11 = vmul.f32 %v4847_v9, %v4847_v9  ;;  %v4854_v13 = vadd.f32 %v2858_v12, %v1467_v39  ;;  %v2063_v39 = vld [vmem:[%s5401_s6 + $0x8] sm:$0xff]  ;;  %v4913_v12 = vld [vmem:[%s5401_s6 + $0x38] sm:$0xff] }
 0x2cc   :  { %2077 = vperm.xlu0 %3019, %v2063_v39  }
 0x2cd   :  { %v1696_v47 = vadd.f32 %v1695_v23, %v1681_v11  ;;  %v1660_v50 = vadd.f32 %v1659_v1, %v4854_v13  ;;  %v1682_v45 = vmul.f32 %v4854_v13, %v4854_v13  ;;  %v1764_v1 = vpop.permute.xlu0 %1763 }
 0x2ce   :  { %2082 = vperm.xlu1 %3018, %v4873_v27  }
 0x2cf   :  { %v1661_v4 = vrot.slane %v1660_v50, 4  ;;  %v1697_v6 = vadd.f32 %v1696_v47, %v1682_v45 }
 0x2d0   :  { %2092 = vperm.xlu0 %3019, %v4880_v48  }
 0x2d1   :  { %v1662_v25 = vadd.f32 %v1661_v4, %v1660_v50  ;;  %v1698_v42 = vrot.slane %v1697_v6, 4  ;;  %v1788_v4 = vpop.permute.xlu1 %1787 }
 0x2d2   :  { %2087 = vperm.xlu1 %3018, %v4888_v14  }
 0x2d3   :  { %v1663_v41 = vrot.slane %v1662_v25, 2  ;;  %v1699_v24 = vadd.f32 %v1698_v42, %v1697_v6 }
 0x2d4   :  { %2102 = vperm.xlu0 %3019, %v4894_v3  }
 0x2d5   :  { %v1664_v62 = vadd.f32 %v1663_v41, %v1662_v25  ;;  %v1700_v32 = vrot.slane %v1699_v24, 2 }
 0x2d6   :  { %2097 = vperm.xlu1 %3018, %v4904_v26  }
 0x2d7   :  { %v1665_v34 = vrot.slane %v1664_v62, 1  ;;  %v1701_v51 = vadd.f32 %v1700_v32, %v1699_v24 }
 0x2d8   :  { %3020 = vset.pattern.permute.xlu0 %v5523_v10 }
 0x2d9   :  { %v1666_v23 = vadd.f32 %v1665_v34, %v1664_v62  ;;  %v1702_v56 = vrot.slane %v1701_v51, 1  ;;  %2256 = vperm.xlu0 %3020, %v4864_v15  }
 0x2da   :  { %2107 = vperm.xlu1 %3018, %v4913_v12  }
 0x2db   :  { %v1703_v21 = vadd.f32 %v1702_v56, %v1701_v51  ;;  %v4908_v52 = vmul.f32 0.0078125, %v1666_v23  ;;  %v1768_v51 = vpop.permute.xlu0 %1767  ;;  %v1868_v23 = vpop.permute.xlu1 %1867 }
 0x2dd   :  { %v1705_v11 = vmul.f32 0.0078125, %v1703_v21  ;;  %v1706_v47 = vmul.f32 %v4908_v52, %v4908_v52  ;;  %v1715_v50 = vsub.f32 %v4791_v0, %v4908_v52  ;;  %v1716_v45 = vsub.f32 %v4799_v33, %v4908_v52  ;;  %2272 = vperm.xlu0 %3020, %v4880_v48  }
 0x2de   :  { %v1709_v6 = vsub.f32 %v4750_v49, %v4908_v52  ;;  %v1710_v25 = vsub.f32 %v4760_v58, %v4908_v52  ;;  %v1713_v42 = vsub.f32 %v4779_v8, %v4908_v52  ;;  %v1719_v41 = vsub.f32 %v4819_v53, %v4908_v52  ;;  %3021 = vset.pattern.permute.xlu1 %v5523_v10 }
 0x2df   :  { %v1707_v24 = vsub.f32 %v1705_v11, %v1706_v47  ;;  %v1714_v0 = vsub.f32 %v4786_v43, %v4908_v52  ;;  %v1717_v33 = vsub.f32 %v4804_v37, %v4908_v52  ;;  %v1720_v49 = vsub.f32 %v4829_v18, %v4908_v52  ;;  %2260 = vperm.xlu1 %3021, %v2063_v39   ;;  %v1780_v56 = vpop.permute.xlu0 %1779  ;;  %v4957_v21 = vpop.permute.xlu1 %1791 }
 0x2e1   :  { %v1724_v43 = vadd.f32 1e-05, %v1707_v24  ;;  %3025 = vset.pattern.permute.xlu0 %v5524_v60 }
 0x2e2   :  { %2300 = vperm.xlu0 %3025, %v2063_v39  }
 0x2e3   :  { %3148 = vrsqrt.f32 %v1724_v43  ;;  %3022 = vset.pattern.permute.xlu1 %v5524_v60  ;;  %v4969_v43 = vpop.permute.xlu0 %1783  ;;  %v4975_v62 = vpop.permute.xlu1 %1871 }
 0x2e4   :  { %2296 = vperm.xlu1 %3022, %v4864_v15  }
 0x2e6   :  { %2304 = vperm.xlu0 %3025, %v4873_v27  }
 0x2e8   :  { %3023 = vset.pattern.permute.xlu1 %v5523_v10 }
 0x2e9   :  { %2264 = vperm.xlu1 %3023, %v4873_v27  }
 0x2ea   :  { %2316 = vperm.xlu0 %3025, %v4904_v26  }
 0x2ed   :  { %v4961_v11 = vpop.eup %3148  ;;  %2268 = vperm.xlu1 %3023, %v4888_v14  }
 0x2ee   :  { %v1733_v47 = vmul.f32 %v4961_v11, %v1715_v50  ;;  %v1734_v39 = vmul.f32 %v4961_v11, %v1716_v45  ;;  %v1727_v24 = vmul.f32 %v4961_v11, %v1709_v6  ;;  %v1728_v15 = vmul.f32 %v4961_v11, %v1710_v25  ;;  %2320 = vperm.xlu0 %3025, %v4894_v3  }
 0x2ef   :  { %v1731_v34 = vmul.f32 %v4961_v11, %v1713_v42  ;;  %v1737_v32 = vmul.f32 %v4961_v11, %v1719_v41  ;;  %v1732_v37 = vmul.f32 %v4961_v11, %v1714_v0  ;;  %v1735_v27 = vmul.f32 %v4961_v11, %v1717_v33 }
 0x2f0   :  { %v1813_v50 = vmul.f32 %v4826_v35, %v1733_v47  ;;  %v1814_v45 = vmul.f32 %v4856_v30, %v1734_v39  ;;  %v1807_v6 = vmul.f32 %v4875_v31, %v1727_v24  ;;  %v1808_v25 = vmul.f32 %v4896_v20, %v1728_v15 }
 0x2f1   :  { %v1811_v53 = vmul.f32 %v1764_v1, %v1731_v34  ;;  %v1817_v8 = vmul.f32 %v1788_v4, %v1737_v32  ;;  %v1812_v58 = vmul.f32 %v1768_v51, %v1732_v37  ;;  %v1815_v42 = vmul.f32 %v1780_v56, %v1735_v27  ;;  %v1796_v4 = vpop.permute.xlu0 %1795  ;;  %3024 = vset.pattern.permute.xlu1 %v5524_v60 }
 0x2f2   :  { %v4983_v41 = vadd.f32 %v4844_v28, %v1813_v50  ;;  %v4986_v0 = vadd.f32 %v4767_v54, %v1807_v6  ;;  %v4989_v35 = vadd.f32 %v4882_v59, %v1814_v45  ;;  %v4992_v30 = vadd.f32 %v4824_v17, %v1808_v25  ;;  %2308 = vperm.xlu1 %3024, %v4888_v14  }
 0x2f3   :  { %v4996_v31 = vadd.f32 %v4814_v63, %v1811_v53  ;;  %v4999_v20 = vadd.f32 %v4839_v22, %v1812_v58  ;;  %v5001_v1 = vadd.f32 %v1868_v23, %v1817_v8  ;;  %v5004_v28 = vadd.f32 %v4899_v40, %v1815_v42  ;;  %v1876_v8 = vpop.permute.xlu1 %1875  ;;  %3030 = vset.pattern.permute.xlu0 %v5542_v38 }
 0x2f4   :  { %v1909_v54 = vmul.f32 %v4983_v41, %v4983_v41  ;;  %v1903_v17 = vmul.f32 %v4986_v0, %v4986_v0  ;;  %v1910_v59 = vmul.f32 %v4989_v35, %v4989_v35  ;;  %v1904_v63 = vmul.f32 %v4992_v30, %v4992_v30 }
 0x2f5   :  { %v1907_v22 = vmul.f32 %v4996_v31, %v4996_v31  ;;  %v1908_v40 = vmul.f32 %v4999_v20, %v4999_v20  ;;  %v1913_v33 = vmul.f32 %v5001_v1, %v5001_v1  ;;  %v1911_v58 = vmul.f32 %v5004_v28, %v5004_v28 }
 0x2f6   :  { %v1925_v53 = vmul.f32 %v1909_v54, %v4983_v41  ;;  %v1919_v37 = vmul.f32 %v1903_v17, %v4986_v0  ;;  %v1926_v32 = vmul.f32 %v1910_v59, %v4989_v35  ;;  %v1920_v34 = vmul.f32 %v1904_v63, %v4992_v30  ;;  %v1800_v54 = vpop.permute.xlu0 %1799  ;;  %3026 = vset.pattern.permute.xlu1 %v5523_v10 }
 0x2f7   :  { %v1923_v51 = vmul.f32 %v1907_v22, %v4996_v31  ;;  %v1929_v23 = vmul.f32 %v1913_v33, %v5001_v1  ;;  %v1738_v24 = vmul.f32 %v4961_v11, %v1720_v49  ;;  %v1924_v50 = vmul.f32 %v1908_v40, %v4999_v20  ;;  %v1804_v17 = vpop.permute.xlu1 %1803  ;;  %2276 = vperm.xlu1 %3026, %v4904_v26  }
 0x2f8   :  { %v1941_v56 = vmul.f32 0.044715, %v1925_v53  ;;  %v1935_v47 = vmul.f32 0.044715, %v1919_v37  ;;  %v1942_v39 = vmul.f32 0.044715, %v1926_v32  ;;  %v5545_v14 = vsub.f32 %v4812_v16, %v4908_v52 }
 0x2f9   :  { %v1936_v15 = vmul.f32 0.044715, %v1920_v34  ;;  %v1939_v27 = vmul.f32 0.044715, %v1923_v51  ;;  %v1945_v25 = vmul.f32 0.044715, %v1929_v23  ;;  %v1927_v42 = vmul.f32 %v1911_v58, %v5004_v28 }
 0x2fa   :  { %v1736_v45 = vmul.f32 %v4961_v11, %v5545_v14  ;;  %v1957_v6 = vadd.f32 %v1941_v56, %v4983_v41  ;;  %v1951_v18 = vadd.f32 %v1935_v47, %v4986_v0  ;;  %v1958_v49 = vadd.f32 %v1942_v39, %v4989_v35  ;;  %v1880_v39 = vpop.permute.xlu0 %1879 }
 0x2fb   :  { %v1952_v59 = vadd.f32 %v1936_v15, %v4992_v30  ;;  %v5048_v63 = vadd.f32 %v1939_v27, %v4996_v31  ;;  %v5050_v22 = vmul.f32 0.044715, %v1924_v50  ;;  %v1961_v40 = vadd.f32 %v1945_v25, %v5001_v1  ;;  %3027 = vset.pattern.permute.xlu1 %v5524_v60  ;;  %v1884_v15 = vpop.permute.xlu1 %1883 }
 0x2fc   :  { %v1973_v16 = vmul.f32 0.7978846, %v1957_v6  ;;  %v5053_v33 = vmul.f32 0.044715, %v1927_v42  ;;  %v1818_v58 = vmul.f32 %v4957_v21, %v1738_v24  ;;  %v1816_v53 = vmul.f32 %v4969_v43, %v1736_v45  ;;  %2312 = vperm.xlu1 %3027, %v4880_v48  }
 0x2fd   :  { %v1967_v37 = vmul.f32 0.7978846, %v1951_v18  ;;  %v1974_v32 = vmul.f32 0.7978846, %v1958_v49  ;;  %v5546_v26 = vsub.f32 %v4837_v61, %v4908_v52  ;;  %v5547_v51 = vsub.f32 %v4847_v9, %v4908_v52 }
 0x2fe   :  { %v1968_v56 = vmul.f32 0.7978846, %v1952_v59  ;;  %v5067_v47 = vadd.f32 %v4849_v44, %v1816_v53  ;;  %v5070_v21 = vadd.f32 %v4975_v62, %v1818_v58  ;;  %v5548_v43 = vsub.f32 %v4854_v13, %v4908_v52 }
 0x2ff   :  { %v1739_v34 = vmul.f32 %v4961_v11, %v5546_v26  ;;  %v1740_v23 = vmul.f32 %v4961_v11, %v5547_v51  ;;  %3150 = vtanh.f32 %v1973_v16  ;;  %v5549_v27 = vsub.f32 %v4748_v55, %v4908_v52 }
 0x300   :  { %v1741_v61 = vmul.f32 %v4961_v11, %v5548_v43  ;;  %v1977_v50 = vmul.f32 0.7978846, %v1961_v40  ;;  %v1914_v62 = vmul.f32 %v5070_v21, %v5070_v21  ;;  %v5550_v13 = vsub.f32 %v4765_v7, %v4908_v52  ;;  %3028 = vset.pattern.permute.xlu1 %v5523_v10 }
 0x301   :  { %v1819_v9 = vmul.f32 %v1796_v4, %v1739_v34  ;;  %v1820_v24 = vmul.f32 %v1800_v54, %v1740_v23  ;;  %v1726_v44 = vmul.f32 %v4961_v11, %v5549_v27  ;;  %3152 = vtanh.f32 %v1967_v37  ;;  %2280 = vperm.xlu1 %3028, %v4894_v3  }
 0x302   :  { %v1821_v14 = vmul.f32 %v1804_v17, %v1741_v61  ;;  %v1729_v45 = vmul.f32 %v4961_v11, %v5550_v13  ;;  %v1912_v55 = vmul.f32 %v5067_v47, %v5067_v47  ;;  %v1930_v25 = vmul.f32 %v1914_v62, %v5070_v21 }
 0x303   :  { %v5087_v48 = vadd.f32 %v1876_v8, %v1819_v9  ;;  %v5089_v4 = vadd.f32 %v1880_v39, %v1820_v24  ;;  %v1806_v6 = vmul.f32 %v4746_v19, %v1726_v44  ;;  %v5551_v18 = vsub.f32 %v4772_v36, %v4908_v52 }
 0x304   :  { %v5095_v42 = vadd.f32 %v1884_v15, %v1821_v14  ;;  %v1809_v54 = vmul.f32 %v4774_v29, %v1729_v45  ;;  %v1946_v17 = vmul.f32 0.044715, %v1930_v25  ;;  %3154 = vtanh.f32 %v1968_v56 }
 0x305   :  { %v1915_v7 = vmul.f32 %v5087_v48, %v5087_v48  ;;  %v1916_v8 = vmul.f32 %v5089_v4, %v5089_v4  ;;  %v5104_v19 = vadd.f32 %v4758_v46, %v1806_v6  ;;  %v1730_v49 = vmul.f32 %v4961_v11, %v5551_v18  ;;  %2284 = vperm.xlu1 %3028, %v4913_v12  }
 0x306   :  { %v1917_v29 = vmul.f32 %v5095_v42, %v5095_v42  ;;  %v5114_v59 = vadd.f32 %v4784_v57, %v1809_v54  ;;  %v1928_v52 = vmul.f32 %v1912_v55, %v5067_v47  ;;  %v1962_v3 = vadd.f32 %v1946_v17, %v5070_v21 }
 0x307   :  { %v1931_v16 = vmul.f32 %v1915_v7, %v5087_v48  ;;  %v1932_v46 = vmul.f32 %v1916_v8, %v5089_v4  ;;  %v1902_v40 = vmul.f32 %v5104_v19, %v5104_v19  ;;  %v1810_v36 = vmul.f32 %v4796_v2, %v1730_v49 }
 0x308   :  { %v1933_v11 = vmul.f32 %v1917_v29, %v5095_v42  ;;  %v1905_v57 = vmul.f32 %v5114_v59, %v5114_v59  ;;  %3156 = vtanh.f32 %v1974_v32  ;;  %v1978_v2 = vmul.f32 0.7978846, %v1962_v3 }
 0x309   :  { %v1947_v58 = vmul.f32 0.044715, %v1931_v16  ;;  %v1948_v53 = vmul.f32 0.044715, %v1932_v46  ;;  %v1918_v37 = vmul.f32 %v1902_v40, %v5104_v19  ;;  %v5128_v26 = vadd.f32 %v4806_v5, %v1810_v36  ;;  %v3151_v23 = vpop.eup %3150  ;;  %3029 = vset.pattern.permute.xlu1 %v5524_v60 }
 0x30a   :  { %v1949_v34 = vmul.f32 0.044715, %v1933_v11  ;;  %v1921_v51 = vmul.f32 %v1905_v57, %v5114_v59  ;;  %v1944_v9 = vmul.f32 0.044715, %v1928_v52  ;;  %3158 = vtanh.f32 %v1978_v2  ;;  %2324 = vperm.xlu1 %3029, %v4913_v12  }
 0x30b   :  { %v1963_v56 = vadd.f32 %v1947_v58, %v5087_v48  ;;  %v1964_v43 = vadd.f32 %v1948_v53, %v5089_v4  ;;  %v1934_v61 = vmul.f32 0.044715, %v1918_v37  ;;  %v1906_v39 = vmul.f32 %v5128_v26, %v5128_v26  ;;  %v3153_v15 = vpop.eup %3152 }
 0x30c   :  { %v1965_v5 = vadd.f32 %v1949_v34, %v5095_v42  ;;  %v1937_v24 = vmul.f32 0.044715, %v1921_v51  ;;  %v1956_v14 = vadd.f32 %v5050_v22, %v4999_v20  ;;  %3160 = vtanh.f32 %v1977_v50 }
 0x30d   :  { %v1979_v32 = vmul.f32 0.7978846, %v1963_v56  ;;  %v1980_v27 = vmul.f32 0.7978846, %v1964_v43  ;;  %v1950_v44 = vadd.f32 %v1934_v61, %v5104_v19  ;;  %v1922_v62 = vmul.f32 %v1906_v39, %v5128_v26 }
 0x30e   :  { %v1981_v13 = vmul.f32 0.7978846, %v1965_v5  ;;  %v1953_v45 = vadd.f32 %v1937_v24, %v5114_v59  ;;  %v1959_v6 = vadd.f32 %v5053_v33, %v5004_v28  ;;  %v3155_v54 = vpop.eup %3154  ;;  %v1971_v7 = vmul.f32 0.7978846, %v5048_v63  ;;  %3031 = vset.pattern.permute.xlu1 %v5542_v38 }
 0x30f   :  { %3162 = vtanh.f32 %v1979_v32  ;;  %v1966_v55 = vmul.f32 0.7978846, %v1950_v44  ;;  %v1938_v25 = vmul.f32 0.044715, %v1922_v62  ;;  %v1960_v60 = vadd.f32 %v1944_v9, %v5067_v47 }
 0x310   :  { %3164 = vtanh.f32 %v1981_v13  ;;  %v1969_v8 = vmul.f32 0.7978846, %v1953_v45  ;;  %v1972_v50 = vmul.f32 0.7978846, %v1956_v14  ;;  %v1975_v12 = vmul.f32 0.7978846, %v1959_v6 }
 0x311   :  { %3166 = vtanh.f32 %v1980_v27  ;;  %v1954_v22 = vadd.f32 %v1938_v25, %v5128_v26  ;;  %v1976_v49 = vmul.f32 0.7978846, %v1960_v60  ;;  %v1999_v17 = vadd.f32 1.0, %v3153_v15 }
 0x312   :  { %3168 = vtanh.f32 %v1966_v55  ;;  %v3157_v18 = vpop.eup %3156  ;;  %v2000_v29 = vadd.f32 1.0, %v3155_v54  ;;  %v2005_v16 = vadd.f32 1.0, %v3151_v23 }
 0x313   :  { %3170 = vtanh.f32 %v1969_v8  ;;  %v1970_v33 = vmul.f32 0.7978846, %v1954_v22  ;;  %v2015_v36 = vmul.f32 0.5, %v1999_v17  ;;  %v2006_v37 = vadd.f32 1.0, %v3157_v18 }
 0x314   :  { %3172 = vtanh.f32 %v1971_v7  ;;  %v3159_v63 = vpop.eup %3158  ;;  %v2016_v3 = vmul.f32 0.5, %v2000_v29  ;;  %v2021_v57 = vmul.f32 0.5, %v2005_v16 }
 0x315   :  { %3174 = vtanh.f32 %v1970_v33  ;;  %v2010_v46 = vadd.f32 1.0, %v3159_v63  ;;  %v2031_v51 = vmul.f32 %v2015_v36, %v4986_v0  ;;  %v2022_v45 = vmul.f32 0.5, %v2006_v37  ;;  %v2419_v37 = vld [vmem:[%s5403_s8] sm:$0xff] }
 0x316   :  { %3176 = vtanh.f32 %v1972_v50  ;;  %v3161_v40 = vpop.eup %3160  ;;  %v2032_v9 = vmul.f32 %v2016_v3, %v4992_v30  ;;  %v2037_v27 = vmul.f32 %v2021_v57, %v4983_v41  ;;  %2429 = vperm.xlu0 %3030, %v2419_v37  }
 0x317   :  { %3178 = vtanh.f32 %v1975_v12  ;;  %v2026_v38 = vmul.f32 0.5, %v2010_v46  ;;  %v2009_v5 = vadd.f32 1.0, %v3161_v40 }
 0x318   :  { %3180 = vtanh.f32 %v1976_v49 }
 0x319   :  { %v3163_v52 = vpop.eup %3162  ;;  %v2042_v23 = vmul.f32 %v2026_v38, %v5070_v21  ;;  %v2025_v22 = vmul.f32 0.5, %v2009_v5 }
 0x31a   :  { %v3165_v11 = vpop.eup %3164  ;;  %v2011_v58 = vadd.f32 1.0, %v3163_v52 }
 0x31b   :  { %v3167_v53 = vpop.eup %3166  ;;  %v2013_v2 = vadd.f32 1.0, %v3165_v11 }
 0x31c   :  { %v3169_v34 = vpop.eup %3168  ;;  %v2027_v56 = vmul.f32 0.5, %v2011_v58  ;;  %v2012_v43 = vadd.f32 1.0, %v3167_v53  ;;  %v2420_v53 = vld [vmem:[%s5403_s8 + $0x8] sm:$0xff] }
 0x31d   :  { %v3171_v61 = vpop.eup %3170  ;;  %v1998_v39 = vadd.f32 1.0, %v3169_v34  ;;  %v2029_v24 = vmul.f32 0.5, %v2013_v2  ;;  %2434 = vperm.xlu1 %3031, %v2420_v53   ;;  %v2421_v2 = vld [vmem:[%s5403_s8 + $0x10] sm:$0xff]  ;;  %v2422_v34 = vld [vmem:[%s5403_s8 + $0x18] sm:$0xff] }
 0x31e   :  { %v3173_v15 = vpop.eup %3172  ;;  %v2001_v32 = vadd.f32 1.0, %v3171_v61  ;;  %v2043_v44 = vmul.f32 %v2027_v56, %v5087_v48  ;;  %v2028_v62 = vmul.f32 0.5, %v2012_v43  ;;  %2444 = vperm.xlu0 %3030, %v2422_v34   ;;  %v2423_v56 = vld [vmem:[%s5403_s8 + $0x20] sm:$0xff] }
 0x31f   :  { %v3175_v14 = vpop.eup %3174  ;;  %v2014_v13 = vmul.f32 0.5, %v1998_v39  ;;  %v2003_v0 = vadd.f32 1.0, %v3173_v15  ;;  %v2045_v21 = vmul.f32 %v2029_v24, %v5095_v42  ;;  %v2425_v39 = vld [vmem:[%s5403_s8 + $0x30] sm:$0xff] }
 0x320   :  { %v3177_v6 = vpop.eup %3176  ;;  %v2017_v55 = vmul.f32 0.5, %v2001_v32  ;;  %v2002_v25 = vadd.f32 1.0, %v3175_v14  ;;  %v2060_v54 = vpack.c.bf16 %v2043_v44, %v2042_v23  ;;  %v2044_v30 = vmul.f32 %v2028_v62, %v5089_v4  ;;  %v2424_v23 = vld [vmem:[%s5403_s8 + $0x28] sm:$0xff] }
 0x321   :  { %v3179_v7 = vpop.eup %3178  ;;  %v2030_v60 = vmul.f32 %v2014_v13, %v5104_v19  ;;  %v2019_v8 = vmul.f32 0.5, %v2003_v0  ;;  %v2004_v41 = vadd.f32 1.0, %v3177_v6  ;;  %v2038_v19 = vmul.f32 %v2022_v45, %v4989_v35  ;;  %v3075_v35 = vld [vmem:[%s5400_s5 + $0x8] sm:$0xff]   ;;  %2439 = vperm.xlu1 %3031, %v2421_v2  }
 0x322   :  { %v3181_v48 = vpop.eup %3180  ;;  %v2033_v50 = vmul.f32 %v2017_v55, %v5114_v59  ;;  %v2018_v12 = vmul.f32 0.5, %v2002_v25  ;;  %v2007_v33 = vadd.f32 1.0, %v3179_v7  ;;  %v2061_v18 = vpack.c.bf16 %v2045_v21, %v2044_v30  ;;  %2454 = vperm.xlu0 %3030, %v2424_v23  }
 0x323   :  { %v2054_v49 = vpack.c.bf16 %v2031_v51, %v2030_v60  ;;  %v2035_v42 = vmul.f32 %v2019_v8, %v4996_v31  ;;  %v2020_v17 = vmul.f32 0.5, %v2004_v41  ;;  %v2008_v29 = vadd.f32 1.0, %v3181_v48 }
 0x324   :  { %v2055_v63 = vpack.c.bf16 %v2033_v50, %v2032_v9  ;;  %v2034_v4 = vmul.f32 %v2018_v12, %v5128_v26  ;;  %v2023_v16 = vmul.f32 0.5, %v2007_v33  ;;  %v2041_v59 = vmul.f32 %v2025_v22, %v5001_v1  ;;  %v3077_v1 = vld [vmem:[%s5400_s5 + $0x18] sm:$0xff]   ;;  %v3078_v26 = vld [vmem:[%s5402_s7] sm:$0xff]  }
 0x325   :  { %2918 = vmatprep.subr.bf16.mxu0 %v2054_v49  ;;  %v2036_v46 = vmul.f32 %v2020_v17, %v4999_v20  ;;  %v2024_v40 = vmul.f32 0.5, %v2008_v29  ;;  %v3076_v20 = vld [vmem:[%s5400_s5 + $0x10] sm:$0xff]   ;;  %2449 = vperm.xlu1 %3031, %v2423_v56   ;;  %v2426_v9 = vld [vmem:[%s5403_s8 + $0x38] sm:$0xff] }
 0x326   :  { %2919 = vmatpush3.bf16.msra.mxu0 %v2054_v49  ;;  %v2056_v36 = vpack.c.bf16 %v2035_v42, %v2034_v4  ;;  %v2039_v52 = vmul.f32 %v2023_v16, %v5004_v28  ;;  %2464 = vperm.xlu0 %3030, %v2426_v9  }
 0x327   :  { %2920 = vmatprep.subr.bf16.mxu0 %v2055_v63  ;;  %v2057_v31 = vpack.c.bf16 %v2037_v27, %v2036_v46  ;;  %v2040_v3 = vmul.f32 %v2024_v40, %v5067_v47 }
 0x328   :  { %v2058_v38 = vpack.c.bf16 %v2039_v52, %v2038_v19 }
 0x329   :  { %v2059_v11 = vpack.c.bf16 %v2041_v59, %v2040_v3  ;;  %2459 = vperm.xlu1 %3031, %v2425_v39  }
 0x32a   :  { %2921 = vmatpush3.bf16.msra.mxu0 %v2055_v63  ;;  %3033 = vset.pattern.permute.xlu0 %v5523_v10 }
 0x32b   :  { %2922 = vmatprep.subr.bf16.mxu0 %v2056_v36 }
 0x32d   :  { %3032 = vset.pattern.permute.xlu1 %v5523_v10 }
 0x32e   :  { %2923 = vmatpush3.bf16.msra.mxu0 %v2056_v36  ;;  %2645 = vperm.xlu1 %3032, %v2419_v37  }
 0x32f   :  { %2924 = vmatprep.subr.bf16.mxu0 %v2057_v31 }
 0x332   :  { %2925 = vmatpush3.bf16.msra.mxu0 %v2057_v31 }
 0x333   :  { %2926 = vmatprep.subr.bf16.mxu0 %v2058_v38 }
 0x336   :  { %2927 = vmatpush3.bf16.msra.mxu0 %v2058_v38 }
 0x337   :  { %2928 = vmatprep.subr.bf16.mxu0 %v2059_v11 }
 0x33a   :  { %2929 = vmatpush3.bf16.msra.mxu0 %v2059_v11 }
 0x33b   :  { %2930 = vmatprep.subr.bf16.mxu0 %v2060_v54 }
 0x33e   :  { %2931 = vmatpush3.bf16.msra.mxu0 %v2060_v54 }
 0x33f   :  { %2932 = vmatprep.subr.bf16.mxu0 %v2061_v18 }
 0x342   :  { %2933 = vmatpush3.bf16.msra.mxu0 %v2061_v18 }
 0x345   :  { %2935 = vmatmul.mubr.bf16.vlgmr.msra.gmra.mrb[32].mxu0 %v3075_v35 }
 0x346   :  { %2938 = vmatprep.mubr.bf16.mxu0 %v3076_v20 }
 0x349   :  { %v2073_v28 = vpop.permute.xlu1 %2072 }
 0x34b   :  { %v2078_v43 = vpop.permute.xlu0 %2077 }
 0x34d   :  { %2939 = vmatmul.mubr.bf16.gmra.mrb[36].mxu0 %v3077_v1  ;;  %v2083_v47 = vpop.permute.xlu1 %2082 }
 0x34e   :  { %2950 = vmatprep.mubr.msk.bf16.mxu0 %vm2487_vm2, %v3078_v26 }
 0x34f   :  { %v2093_v44 = vpop.permute.xlu0 %2092 }
 0x351   :  { %v2088_v57 = vpop.permute.xlu1 %2087 }
 0x353   :  { %v2103_v8 = vpop.permute.xlu0 %2102 }
 0x355   :  { %v2098_v58 = vpop.permute.xlu1 %2097 }
 0x358   :  { %v2257_v1 = vpop.permute.xlu0 %2256 }
 0x359   :  { %v2108_v51 = vpop.permute.xlu1 %2107 }
 0x35c   :  { %v2273_v2 = vpop.permute.xlu0 %2272 }
 0x35e   :  { %v5197_v61 = vpop.permute.xlu1 %2260 }
 0x363   :  { %v5213_v0 = vpop.permute.xlu1 %2296 }
 0x368   :  { %v5233_v33 = vpop.permute.xlu1 %2264 }
 0x36c   :  { %v2269_v59 = vpop.permute.xlu1 %2268 }
 0x371   :  { %v2309_v20 = vpop.permute.xlu1 %2308 }
 0x376   :  { %v2277_v37 = vpop.permute.xlu1 %2276 }
 0x418   :  { %v2936_v5 = vpop.f32.mrb[32].mxu0 }
 0x419   :  { %v2168_v24 = vpop.f32.mrb[33].mxu0  ;;  %v5207_v62 = vadd.f32 %v2936_v5, %v2083_v47 }
 0x41a   :  { %v5205_v15 = vadd.f32 %v2168_v24, %v2073_v28  ;;  %v2937_v32 = vpop.f32.mrb[34].mxu0 }
 0x41b   :  { %v2171_v27 = vpop.f32.mrb[35].mxu0  ;;  %v5211_v13 = vadd.f32 %v2937_v32, %v2088_v57  ;;  %v2214_v55 = vmul.f32 %v5207_v62, %v5207_v62 }
 0x41c   :  { %v5209_v14 = vadd.f32 %v2171_v27, %v2078_v43  ;;  %v2212_v45 = vmul.f32 %v5205_v15, %v5205_v15 }
 0x41d   :  { %v2215_v60 = vmul.f32 %v5211_v13, %v5211_v13 }
 0x41e   :  { %v2199_v21 = vadd.f32 %v5209_v14, %v5205_v15  ;;  %v2213_v6 = vmul.f32 %v5209_v14, %v5209_v14 }
 0x420   :  { %v2200_v25 = vadd.f32 %v2199_v21, %v5207_v62  ;;  %v2220_v54 = vadd.f32 %v2213_v6, %v2212_v45  ;;  %v2940_v30 = vpop.f32.mrb[36].mxu0  ;;  %v2313_v45 = vpop.permute.xlu1 %2312 }
 0x421   :  { %v2184_v7 = vpop.f32.mrb[37].mxu0  ;;  %v5231_v10 = vadd.f32 %v2940_v30, %v2103_v8  ;;  %v2301_v21 = vpop.permute.xlu0 %2300 }
 0x422   :  { %v2221_v41 = vadd.f32 %v2220_v54, %v2214_v55  ;;  %v5228_v22 = vadd.f32 %v2184_v7, %v2093_v44  ;;  %v2201_v48 = vadd.f32 %v2200_v25, %v5211_v13  ;;  %v2941_v50 = vpop.f32.mrb[38].mxu0 }
 0x423   :  { %v2187_v12 = vpop.f32.mrb[39].mxu0  ;;  %v2196_v63 = vadd.f32 %v2941_v50, %v2108_v51  ;;  %v2218_v19 = vmul.f32 %v5231_v10, %v5231_v10 }
 0x424   :  { %v2202_v18 = vadd.f32 %v2201_v48, %v5228_v22  ;;  %v2216_v49 = vmul.f32 %v5228_v22, %v5228_v22  ;;  %v2222_v42 = vadd.f32 %v2221_v41, %v2215_v60  ;;  %v2188_v17 = vadd.f32 %v2187_v12, %v2098_v58  ;;  %v2281_v30 = vpop.permute.xlu1 %2280 }
 0x425   :  { %v2219_v36 = vmul.f32 %v2196_v63, %v2196_v63  ;;  %v2305_v7 = vpop.permute.xlu0 %2304 }
 0x426   :  { %v2223_v29 = vadd.f32 %v2222_v42, %v2216_v49  ;;  %v2203_v4 = vadd.f32 %v2202_v18, %v2188_v17  ;;  %v2217_v16 = vmul.f32 %v2188_v17, %v2188_v17 }
 0x428   :  { %v2204_v46 = vadd.f32 %v2203_v4, %v5231_v10  ;;  %v2224_v40 = vadd.f32 %v2223_v29, %v2217_v16 }
 0x429   :  { %v2317_v60 = vpop.permute.xlu0 %2316 }
 0x42a   :  { %v2205_v52 = vadd.f32 %v2204_v46, %v2196_v63  ;;  %v2225_v31 = vadd.f32 %v2224_v40, %v2218_v19 }
 0x42c   :  { %v2206_v3 = vrot.slane %v2205_v52, 4  ;;  %v2226_v38 = vadd.f32 %v2225_v31, %v2219_v36 }
 0x42d   :  { %v2321_v29 = vpop.permute.xlu0 %2320 }
 0x42e   :  { %v2207_v11 = vadd.f32 %v2206_v3, %v2205_v52  ;;  %v2227_v35 = vrot.slane %v2226_v38, 4 }
 0x430   :  { %v2208_v28 = vrot.slane %v2207_v11, 2  ;;  %v2228_v47 = vadd.f32 %v2227_v35, %v2226_v38 }
 0x432   :  { %v2209_v26 = vadd.f32 %v2208_v28, %v2207_v11  ;;  %v2229_v57 = vrot.slane %v2228_v47, 2 }
 0x434   :  { %v2210_v58 = vrot.slane %v2209_v26, 1  ;;  %v2230_v53 = vadd.f32 %v2229_v57, %v2228_v47 }
 0x436   :  { %v2211_v34 = vadd.f32 %v2210_v58, %v2209_v26  ;;  %v2231_v51 = vrot.slane %v2230_v53, 1 }
 0x438   :  { %v2232_v56 = vadd.f32 %v2231_v51, %v2230_v53  ;;  %v2233_v23 = vmul.f32 0.015625, %v2211_v34 }
 0x43a   :  { %v2234_v43 = vmul.f32 0.015625, %v2232_v56  ;;  %v2235_v39 = vmul.f32 %v2233_v23, %v2233_v23  ;;  %v2238_v9 = vsub.f32 %v5209_v14, %v2233_v23  ;;  %v2239_v5 = vsub.f32 %v5207_v62, %v2233_v23  ;;  %v2285_v14 = vpop.permute.xlu1 %2284 }
 0x43b   :  { %v2240_v24 = vsub.f32 %v5211_v13, %v2233_v23  ;;  %v2237_v32 = vsub.f32 %v5205_v15, %v2233_v23  ;;  %v2242_v27 = vsub.f32 %v2188_v17, %v2233_v23  ;;  %v2241_v44 = vsub.f32 %v5228_v22, %v2233_v23 }
 0x43c   :  { %v2236_v6 = vsub.f32 %v2234_v43, %v2235_v39  ;;  %v2243_v55 = vsub.f32 %v5231_v10, %v2233_v23  ;;  %v2244_v25 = vsub.f32 %v2196_v63, %v2233_v23 }
 0x43e   :  { %v2245_v54 = vadd.f32 1e-05, %v2236_v6  ;;  %v2325_v17 = vpop.permute.xlu1 %2324 }
 0x440   :  { %3182 = vrsqrt.f32 %v2245_v54 }
 0x44a   :  { %v3183_v62 = vpop.eup %3182 }
 0x44b   :  { %v2248_v8 = vmul.f32 %v3183_v62, %v2238_v9  ;;  %v2249_v13 = vmul.f32 %v3183_v62, %v2239_v5  ;;  %v2250_v41 = vmul.f32 %v3183_v62, %v2240_v24  ;;  %v2247_v15 = vmul.f32 %v3183_v62, %v2237_v32 }
 0x44c   :  { %v2252_v48 = vmul.f32 %v3183_v62, %v2242_v27  ;;  %v2251_v50 = vmul.f32 %v3183_v62, %v2241_v44  ;;  %v2253_v22 = vmul.f32 %v3183_v62, %v2243_v55  ;;  %v2254_v12 = vmul.f32 %v3183_v62, %v2244_v25 }
 0x44d   :  { %v2288_v18 = vmul.f32 %v5197_v61, %v2248_v8  ;;  %v2289_v10 = vmul.f32 %v5233_v33, %v2249_v13  ;;  %v2290_v49 = vmul.f32 %v2269_v59, %v2250_v41  ;;  %v2287_v42 = vmul.f32 %v2257_v1, %v2247_v15 }
 0x44e   :  { %v2292_v63 = vmul.f32 %v2277_v37, %v2252_v48  ;;  %v2291_v4 = vmul.f32 %v2273_v2, %v2251_v50  ;;  %v2293_v16 = vmul.f32 %v2281_v30, %v2253_v22  ;;  %v2294_v19 = vmul.f32 %v2285_v14, %v2254_v12 }
 0x44f   :  { %v5249_v46 = vadd.f32 %v2309_v20, %v2290_v49  ;;  %v5252_v40 = vadd.f32 %v5213_v0, %v2287_v42  ;;  %v5254_v36 = vadd.f32 %v2301_v21, %v2288_v18  ;;  %v5256_v52 = vadd.f32 %v2305_v7, %v2289_v10 }
 0x450   :  { %v5258_v61 = vadd.f32 %v2313_v45, %v2291_v4  ;;  %v5260_v33 = vadd.f32 %v2317_v60, %v2292_v63  ;;  %v5262_v59 = vadd.f32 %v2325_v17, %v2294_v19  ;;  %v5264_v31 = vadd.f32 %v2321_v29, %v2293_v16 }
 0x451   :  { %v2338_v3 = vmul.f32 %v5249_v46, %v5249_v46  ;;  %v2335_v38 = vmul.f32 %v5252_v40, %v5252_v40  ;;  %v2336_v0 = vmul.f32 %v5254_v36, %v5254_v36  ;;  %v2337_v11 = vmul.f32 %v5256_v52, %v5256_v52 }
 0x452   :  { %v2339_v35 = vmul.f32 %v5258_v61, %v5258_v61  ;;  %v2340_v20 = vmul.f32 %v5260_v33, %v5260_v33  ;;  %v2342_v1 = vmul.f32 %v5262_v59, %v5262_v59  ;;  %v2341_v28 = vmul.f32 %v5264_v31, %v5264_v31 }
 0x453   :  { %v2346_v47 = vmul.f32 %v2338_v3, %v5249_v46  ;;  %v2343_v26 = vmul.f32 %v2335_v38, %v5252_v40  ;;  %v2344_v57 = vmul.f32 %v2336_v0, %v5254_v36  ;;  %v2345_v58 = vmul.f32 %v2337_v11, %v5256_v52 }
 0x454   :  { %v2347_v53 = vmul.f32 %v2339_v35, %v5258_v61  ;;  %v2348_v37 = vmul.f32 %v2340_v20, %v5260_v33  ;;  %v2350_v2 = vmul.f32 %v2342_v1, %v5262_v59  ;;  %v2349_v34 = vmul.f32 %v2341_v28, %v5264_v31 }
 0x455   :  { %v2354_v51 = vmul.f32 0.044715, %v2346_v47  ;;  %v2351_v56 = vmul.f32 0.044715, %v2343_v26  ;;  %v2352_v23 = vmul.f32 0.044715, %v2344_v57 }
 0x456   :  { %v2355_v43 = vmul.f32 0.044715, %v2347_v53  ;;  %v2353_v39 = vmul.f32 0.044715, %v2345_v58  ;;  %v2356_v9 = vmul.f32 0.044715, %v2348_v37 }
 0x457   :  { %v2362_v5 = vadd.f32 %v2354_v51, %v5249_v46  ;;  %v2360_v24 = vadd.f32 %v2352_v23, %v5254_v36  ;;  %v2358_v32 = vmul.f32 0.044715, %v2350_v2  ;;  %v2357_v21 = vmul.f32 0.044715, %v2349_v34 }
 0x458   :  { %v2363_v27 = vadd.f32 %v2355_v43, %v5258_v61  ;;  %v2361_v44 = vadd.f32 %v2353_v39, %v5256_v52  ;;  %v2364_v45 = vadd.f32 %v2356_v9, %v5260_v33  ;;  %v2359_v54 = vadd.f32 %v2351_v56, %v5252_v40 }
 0x459   :  { %v2370_v6 = vmul.f32 0.7978846, %v2362_v5  ;;  %v2368_v55 = vmul.f32 0.7978846, %v2360_v24  ;;  %v2366_v25 = vadd.f32 %v2358_v32, %v5262_v59  ;;  %v2365_v14 = vadd.f32 %v2357_v21, %v5264_v31 }
 0x45a   :  { %v2371_v30 = vmul.f32 0.7978846, %v2363_v27  ;;  %v2369_v7 = vmul.f32 0.7978846, %v2361_v44  ;;  %v2372_v60 = vmul.f32 0.7978846, %v2364_v45 }
 0x45b   :  { %3184 = vtanh.f32 %v2370_v6  ;;  %v2374_v62 = vmul.f32 0.7978846, %v2366_v25  ;;  %v2373_v8 = vmul.f32 0.7978846, %v2365_v14  ;;  %v2367_v13 = vmul.f32 0.7978846, %v2359_v54 }
 0x45c   :  { %3186 = vtanh.f32 %v2371_v30 }
 0x45d   :  { %3188 = vtanh.f32 %v2368_v55 }
 0x45e   :  { %3190 = vtanh.f32 %v2369_v7 }
 0x45f   :  { %3192 = vtanh.f32 %v2372_v60 }
 0x460   :  { %3194 = vtanh.f32 %v2374_v62 }
 0x461   :  { %3196 = vtanh.f32 %v2373_v8 }
 0x462   :  { %3198 = vtanh.f32 %v2367_v13 }
 0x465   :  { %v3185_v41 = vpop.eup %3184 }
 0x466   :  { %v3187_v15 = vpop.eup %3186  ;;  %v2386_v48 = vadd.f32 1.0, %v3185_v41 }
 0x467   :  { %v3189_v50 = vpop.eup %3188  ;;  %v2387_v22 = vadd.f32 1.0, %v3187_v15 }
 0x468   :  { %v3191_v12 = vpop.eup %3190  ;;  %v2384_v18 = vadd.f32 1.0, %v3189_v50  ;;  %v2394_v10 = vmul.f32 0.5, %v2386_v48 }
 0x469   :  { %v3193_v49 = vpop.eup %3192  ;;  %v2385_v42 = vadd.f32 1.0, %v3191_v12  ;;  %v2395_v17 = vmul.f32 0.5, %v2387_v22 }
 0x46a   :  { %v3195_v29 = vpop.eup %3194  ;;  %v2388_v63 = vadd.f32 1.0, %v3193_v49  ;;  %v2392_v16 = vmul.f32 0.5, %v2384_v18  ;;  %v2402_v3 = vmul.f32 %v2394_v10, %v5249_v46 }
 0x46b   :  { %v3197_v4 = vpop.eup %3196  ;;  %v2393_v19 = vmul.f32 0.5, %v2385_v42  ;;  %v2390_v38 = vadd.f32 1.0, %v3195_v29  ;;  %v2403_v35 = vmul.f32 %v2395_v17, %v5258_v61 }
 0x46c   :  { %v3199_v0 = vpop.eup %3198  ;;  %v2396_v11 = vmul.f32 0.5, %v2388_v63  ;;  %v2389_v20 = vadd.f32 1.0, %v3197_v4  ;;  %v2400_v53 = vmul.f32 %v2392_v16, %v5254_v36  ;;  %v3079_v36 = vld [vmem:[%s5402_s7 + $0x8] sm:$0xff]  }
 0x46d   :  { %v2383_v1 = vadd.f32 1.0, %v3199_v0  ;;  %v2401_v28 = vmul.f32 %v2393_v19, %v5256_v52  ;;  %v2398_v47 = vmul.f32 0.5, %v2390_v38  ;;  %v3080_v52 = vld [vmem:[%s5402_s7 + $0x10] sm:$0xff]  }
 0x46e   :  { %v2404_v26 = vmul.f32 %v2396_v11, %v5260_v33  ;;  %v2397_v57 = vmul.f32 0.5, %v2389_v20  ;;  %v3247_v33 = vmov 0.0  }
 0x46f   :  { %v2391_v58 = vmul.f32 0.5, %v2383_v1  ;;  %v2416_v37 = vpack.c.bf16 %v2402_v3, %v2401_v28  ;;  %v2406_v2 = vmul.f32 %v2398_v47, %v5262_v59  ;;  %2958 = vmatprep.subr.bf16.mxu1 %v3247_v33  ;;  %2966 = vmatprep.mubr.msk.bf16.mxu1 %vm3248_vm3, %v3247_v33  ;;  %v2435_v59 = vpop.permute.xlu1 %2434 }
 0x470   :  { %v2417_v46 = vpack.c.bf16 %v2404_v26, %v2403_v35  ;;  %v2405_v34 = vmul.f32 %v2397_v57, %v5264_v31  ;;  %v2430_v31 = vpop.permute.xlu0 %2429 }
 0x471   :  { %v2399_v51 = vmul.f32 %v2391_v58, %v5252_v40  ;;  %v3081_v40 = vld [vmem:[%s5402_s7 + $0x18] sm:$0xff]  }
 0x472   :  { %v2418_v61 = vpack.c.bf16 %v2406_v2, %v2405_v34 }
 0x473   :  { %v2415_v56 = vpack.c.bf16 %v2400_v53, %v2399_v51  ;;  %v2440_v23 = vpop.permute.xlu1 %2439 }
 0x474   :  { %v2445_v43 = vpop.permute.xlu0 %2444 }
 0x475   :  { %2942 = vmatprep.subr.bf16.mxu0 %v2415_v56 }
 0x476   :  { %2943 = vmatpush3.bf16.msra.mxu0 %v2415_v56 }
 0x477   :  { %2944 = vmatprep.subr.bf16.mxu0 %v2416_v37  ;;  %v2450_v24 = vpop.permute.xlu1 %2449 }
 0x478   :  { %v2455_v6 = vpop.permute.xlu0 %2454 }
 0x47a   :  { %2945 = vmatpush3.bf16.msra.mxu0 %v2416_v37 }
 0x47b   :  { %2946 = vmatprep.subr.bf16.mxu0 %v2417_v46  ;;  %v2460_v13 = vpop.permute.xlu1 %2459 }
 0x47c   :  { %v2465_v10 = vpop.permute.xlu0 %2464 }
 0x47e   :  { %2947 = vmatpush3.bf16.msra.mxu0 %v2417_v46 }
 0x47f   :  { %2948 = vmatprep.subr.bf16.mxu0 %v2418_v61 }
 0x482   :  { %2949 = vmatpush3.bf16.msra.mxu0 %v2418_v61 }
 0x485   :  { %2951 = vmatmul.mubr.msk.bf16.vlgmr.msra.gmra.mrb[40].mxu0 %vm2487_vm2, %v3079_v36 }
 0x486   :  { %2954 = vmatprep.mubr.msk.bf16.mxu0 %vm2487_vm2, %v3080_v52 }
 0x48d   :  { %2955 = vmatmul.mubr.msk.bf16.gmra.mrb[44].mxu0 %vm2487_vm2, %v3081_v40 }
 0x558   :  { %v2952_v39 = vpop.f32.mrb[40].mxu0 }
 0x559   :  { %v5320_v9 = vadd.f32 %v2952_v39, %v2440_v23  ;;  %v2534_v5 = vpop.f32.mrb[41].mxu0 }
 0x55a   :  { %v5322_v32 = vadd.f32 %v2534_v5, %v2430_v31  ;;  %v2953_v27 = vpop.f32.mrb[42].mxu0 }
 0x55b   :  { %v2567_v44 = vmul.f32 %v5320_v9, %v5320_v9  ;;  %v5326_v45 = vadd.f32 %v2953_v27, %v2445_v43  ;;  %v2537_v21 = vpop.f32.mrb[43].mxu0 }
 0x55c   :  { %v2565_v55 = vmul.f32 %v5322_v32, %v5322_v32  ;;  %v5330_v25 = vadd.f32 %v2537_v21, %v2435_v59 }
 0x55d   :  { %v2575_v54 = vmul.f32 %v2567_v44, %v5320_v9  ;;  %v2568_v30 = vmul.f32 %v5326_v45, %v5326_v45 }
 0x55e   :  { %v2573_v7 = vmul.f32 %v2565_v55, %v5322_v32  ;;  %v2566_v14 = vmul.f32 %v5330_v25, %v5330_v25 }
 0x55f   :  { %v2583_v60 = vmul.f32 0.044715, %v2575_v54  ;;  %v2576_v62 = vmul.f32 %v2568_v30, %v5326_v45 }
 0x560   :  { %v2581_v8 = vmul.f32 0.044715, %v2573_v7  ;;  %v2574_v41 = vmul.f32 %v2566_v14, %v5330_v25  ;;  %v2956_v15 = vpop.f32.mrb[44].mxu0 }
 0x561   :  { %v2591_v48 = vadd.f32 %v2583_v60, %v5320_v9  ;;  %v2584_v50 = vmul.f32 0.044715, %v2576_v62  ;;  %v5341_v22 = vadd.f32 %v2956_v15, %v2460_v13  ;;  %v2550_v12 = vpop.f32.mrb[45].mxu0 }
 0x562   :  { %v2589_v18 = vadd.f32 %v2581_v8, %v5322_v32  ;;  %v2582_v49 = vmul.f32 0.044715, %v2574_v41  ;;  %v5344_v42 = vadd.f32 %v2550_v12, %v2450_v24  ;;  %v2957_v17 = vpop.f32.mrb[46].mxu0 }
 0x563   :  { %v2599_v29 = vmul.f32 0.7978846, %v2591_v48  ;;  %v2592_v63 = vadd.f32 %v2584_v50, %v5326_v45  ;;  %v2571_v4 = vmul.f32 %v5341_v22, %v5341_v22  ;;  %v5349_v16 = vadd.f32 %v2957_v17, %v2465_v10  ;;  %v2553_v19 = vpop.f32.mrb[47].mxu0 }
 0x564   :  { %v2597_v3 = vmul.f32 0.7978846, %v2589_v18  ;;  %v2590_v38 = vadd.f32 %v2582_v49, %v5330_v25  ;;  %v2569_v0 = vmul.f32 %v5344_v42, %v5344_v42  ;;  %v5354_v11 = vadd.f32 %v2553_v19, %v2455_v6 }
 0x565   :  { %3200 = vtanh.f32 %v2599_v29  ;;  %v2600_v35 = vmul.f32 0.7978846, %v2592_v63  ;;  %v2579_v20 = vmul.f32 %v2571_v4, %v5341_v22  ;;  %v2572_v1 = vmul.f32 %v5349_v16, %v5349_v16 }
 0x566   :  { %3202 = vtanh.f32 %v2597_v3  ;;  %v2598_v28 = vmul.f32 0.7978846, %v2590_v38  ;;  %v2577_v47 = vmul.f32 %v2569_v0, %v5344_v42  ;;  %v2570_v26 = vmul.f32 %v5354_v11, %v5354_v11  ;;  %v2637_v3 = vld [vmem:[%s5404_s9] sm:$0xf]  ;;  %s3220_s9 = scalar_lea.vmem %s2709_s16, 128 }
 0x567   :  { %3204 = vtanh.f32 %v2600_v35  ;;  %v2587_v57 = vmul.f32 0.044715, %v2579_v20  ;;  %v2580_v58 = vmul.f32 %v2572_v1, %v5349_v16  ;;  %p3221_p0 = scmp.ne.s32.totalorder %s2709_s16, %s3220_s9  ;;  %p3226_p2 = scmp.lt.s32.totalorder %s3220_s9, %s3220_s9 }
 0x568   :  { %3206 = vtanh.f32 %v2598_v28  ;;  %v2585_v53 = vmul.f32 0.044715, %v2577_v47  ;;  %v2578_v37 = vmul.f32 %v2570_v26, %v5354_v11  ;;  %v2691_v28 = vlaneseq }
 0x569   :  { %v2595_v2 = vadd.f32 %v2587_v57, %v5341_v22  ;;  %v2588_v46 = vmul.f32 0.044715, %v2580_v58  ;;  %p3227_p3 = por %p3226_p2, %p3225_p1 }
 0x56a   :  { %v2593_v34 = vadd.f32 %v2585_v53, %v5344_v42  ;;  %v2586_v51 = vmul.f32 0.044715, %v2578_v37 }
 0x56b   :  { %v2603_v61 = vmul.f32 0.7978846, %v2595_v2  ;;  %v2596_v56 = vadd.f32 %v2588_v46, %v5349_v16  ;;  %p3228_p4 = pnand %p3227_p3, %p3221_p0 }
 0x56c   :  { %v2601_v36 = vmul.f32 0.7978846, %v2593_v34  ;;  %v2594_v52 = vadd.f32 %v2586_v51, %v5354_v11 }
 0x56d   :  { %3208 = vtanh.f32 %v2603_v61  ;;  %v2604_v40 = vmul.f32 0.7978846, %v2596_v56 }
 0x56e   :  { %3210 = vtanh.f32 %v2601_v36  ;;  %v2602_v59 = vmul.f32 0.7978846, %v2594_v52 }
 0x56f   :  { %v3201_v31 = vpop.eup %3200  ;;  %3212 = vtanh.f32 %v2604_v40 }
 0x570   :  { %v3203_v23 = vpop.eup %3202  ;;  %v2615_v43 = vadd.f32 1.0, %v3201_v31  ;;  %3214 = vtanh.f32 %v2602_v59 }
 0x571   :  { %v3205_v39 = vpop.eup %3204  ;;  %v2613_v5 = vadd.f32 1.0, %v3203_v23 }
 0x572   :  { %v3207_v24 = vpop.eup %3206  ;;  %v2623_v27 = vmul.f32 0.5, %v2615_v43  ;;  %v2616_v44 = vadd.f32 1.0, %v3205_v39 }
 0x573   :  { %v2621_v21 = vmul.f32 0.5, %v2613_v5  ;;  %v2614_v6 = vadd.f32 1.0, %v3207_v24 }
 0x574   :  { %v2624_v55 = vmul.f32 0.5, %v2616_v44  ;;  %v2631_v30 = vmul.f32 %v2623_v27, %v5320_v9 }
 0x575   :  { %v2622_v54 = vmul.f32 0.5, %v2614_v6  ;;  %v2629_v60 = vmul.f32 %v2621_v21, %v5322_v32 }
 0x576   :  { %v2632_v7 = vmul.f32 %v2624_v55, %v5326_v45 }
 0x577   :  { %v3209_v14 = vpop.eup %3208  ;;  %v2630_v62 = vmul.f32 %v2622_v54, %v5330_v25 }
 0x578   :  { %v3211_v8 = vpop.eup %3210  ;;  %v2619_v13 = vadd.f32 1.0, %v3209_v14  ;;  %v2639_v41 = vpack.c.bf16 %v2632_v7, %v2631_v30 }
 0x579   :  { %v3213_v15 = vpop.eup %3212  ;;  %v2617_v48 = vadd.f32 1.0, %v3211_v8  ;;  %v2638_v50 = vpack.c.bf16 %v2630_v62, %v2629_v60 }
 0x57a   :  { %v3215_v12 = vpop.eup %3214  ;;  %v2627_v18 = vmul.f32 0.5, %v2619_v13  ;;  %v2620_v10 = vadd.f32 1.0, %v3213_v15 }
 0x57b   :  { %v2625_v49 = vmul.f32 0.5, %v2617_v48  ;;  %v2618_v17 = vadd.f32 1.0, %v3215_v12  ;;  %2959 = vmatpush3.bf16.msra.mxu1 %v2638_v50 }
 0x57c   :  { %v2628_v9 = vmul.f32 0.5, %v2620_v10  ;;  %2960 = vmatprep.subr.bf16.mxu1 %v3247_v33  ;;  %v2635_v32 = vmul.f32 %v2627_v18, %v5341_v22  ;;  %v2646_v22 = vpop.permute.xlu1 %2645 }
 0x57d   :  { %v2626_v45 = vmul.f32 0.5, %v2618_v17  ;;  %v2633_v29 = vmul.f32 %v2625_v49, %v5344_v42 }
 0x57e   :  { %v2636_v25 = vmul.f32 %v2628_v9, %v5349_v16 }
 0x57f   :  { %v2634_v63 = vmul.f32 %v2626_v45, %v5354_v11  ;;  %2961 = vmatpush3.bf16.msra.mxu1 %v2639_v41 }
 0x580   :  { %2962 = vmatprep.subr.bf16.mxu1 %v3247_v33  ;;  %v2641_v4 = vpack.c.bf16 %v2636_v25, %v2635_v32 }
 0x581   :  { %v2640_v19 = vpack.c.bf16 %v2634_v63, %v2633_v29 }
 0x583   :  { %2963 = vmatpush3.bf16.msra.mxu1 %v2640_v19 }
 0x584   :  { %2964 = vmatprep.subr.bf16.mxu1 %v3247_v33  ;;  %v2692_v33 = vshrl.u32 %v2691_v28, 7 }
 0x586   :  { %vm2693_vm4 = vcmp.eq.s32.totalorder %v2692_v33, 1 }
 0x587   :  { %2965 = vmatpush3.bf16.msra.mxu1 %v2641_v4 }
 0x58a   :  { %2967 = vmatmul.mubr.msk.bf16.vlgmr.msra.gmra.mrb[32].mxu1 %vm2487_vm2, %v2637_v3 }
 0x65d   :  { %v2685_v16 = vpop.f32.mrb[32].mxu1 }
 0x65e   :  { %v2686_v42 = vadd.f32 %v2685_v16, %v2646_v22  ;;  %v2968_v38 = vpop.f32.mrb[33].mxu1 }
 0x65f   :  { %v2688_v0 = vpop.f32.mrb[34].mxu1 }
 0x660   :  { %v2777_v11 = vmul.f32 -1.442695, %v2686_v42  ;;  %v2969_v35 = vpop.f32.mrb[35].mxu1 }
 0x662   :  { %3216 = vpow2.f32 %v2777_v11 }
 0x66c   :  { %v3217_v20 = vpop.eup %3216 }
 0x66d   :  { %v2697_v1 = vadd.f32 1.0, %v3217_v20 }
 0x66f   :  { %3218 = vrcp.f32 %v2697_v1 }
 0x679   :  { %v3219_v47 = vpop.eup %3218 }
 0x67a   :  { %v2700_v26 = vsel %vm2693_vm4, %v3219_v47, %v2686_v42 }
 0x67b   :  { %2701 = vst [vmem:[#allocation2] sm:$0xff] %v2700_v26 }
 0x67c   :  { %3231 = shalt.err (!%p3228_p4)
}
 0x67d   :  { %s3232_s19 = scalar_lea.hbm %s5405_s10, 128 }
 0x67e   :  { %p3233_p5 = scmp.ne.s32.totalorder %s5405_s10, %s3232_s19  ;;  %p3236_p6 = scmp.lt.u32.totalorder %s3232_s19, %s5405_s10 }
 0x680   :  { %p3238_p7 = pnand %p3236_p6, %p3233_p5 }
 0x682   :  { %3241 = shalt.err (!%p3238_p7)
}
 0x683   :  { %2711 = dma.vmem_to_hbm [thread:$0]  %s2709_s16, 128, %s5405_s10, [#allocation3]  }
 0x684   :  { %3242 = dma.done.wait [#allocation3], 128  }
 0x685   :  { %3243 = vsyncadd [#allocation3], 4294967168 }
 0x686   :  { %2715 = vsyncpa [#allocation3], 1 }

</bundles_post_ra>
